<compile_context>
chip_gen: v5e
topology: v5e:2x2
jax: 0.10.0
libtpu: 0.0.40
codegen_flags: <defaults>
</compile_context>

<pallas_src>
import functools
import math

import jax
import jax.numpy as jnp
from jax import lax
from jax.experimental import pallas as pl

# ---- small, deterministic hyper-params consistent with the module ----
VOCAB = 64
H = 32            # hidden_size
NH = 2            # attention heads
DH = H // NH      # head dim
NLAYERS = 2
INTER = 64        # intermediate (FFN) size
MAX_POS = 32
NUM_CLASSES = 5
PAD_ID = 1        # stands in for token_to_index[vocab['padding_token']]
B, S = 2, 8
LN_EPS = 1e-12
LANE = 128        # lane-dense padding width


# --------------------------------------------------------------------------
# Fused forward kernel (no scratch; everything lives in vregs / operand VMEM)
# --------------------------------------------------------------------------
def _fused_forward_kernel(
    # inputs
    emb_ref,      # (B*S, H)      token+pos+type embeddings (pre-LN)
    maskb_ref,    # (B, S)        additive key mask bias
    w_ref,        # (L, 160, 128) packed per-layer 2D weights
    vec_ref,      # (L, 8, 128)   packed per-layer bias / LN vectors
    misc_ref,     # (48, 128)     emb-LN, pooler/emission/CRF params, [ff_w|pool_w]
    # outputs
    enc_ref,      # (B*S, H)      last encoder layer
    pooled_ref,   # (B, H)        BERT pooler output
    tags_ref,     # (B, S) int32  Viterbi-decoded tags
    # static config
    *, bsz, seq, n_layers, n_heads, head_dim, num_tags, inter,
):
    hid = n_heads * head_dim
    scale = 1.0 / math.sqrt(head_dim)

    def layernorm(h, g, b):
        mu = jnp.mean(h, axis=-1, keepdims=True)
        d = h - mu
        var = jnp.mean(d * d, axis=-1, keepdims=True)
        return d * lax.rsqrt(var + LN_EPS) * g + b

    def gelu(y):
        # TODO(synk): exact erf-GELU replaced with tanh approximation.
        return 0.5 * y * (1.0 + jnp.tanh(0.7978845608028654 * (y + 0.044715 * y * y * y)))

    # ---- embedding LayerNorm ----
    x2 = layernorm(emb_ref[...], misc_ref[0:1, 0:hid], misc_ref[1:2, 0:hid])   # (B*S, H)

    # mask bias: loaded once, per-batch rows hoisted out of the layer loop
    maskb = maskb_ref[...]                                                     # (B, S)
    mbias_rows = [maskb[b:b + 1, :] for b in range(bsz)]                       # each (1, S)

    # ---- transformer layers: fully unrolled, weights VMEM resident ----
    # TODO(synk): per-(b,h) attention matmuls could be batched into a single
    # (B*NH, S, DH) dot_general on v6e/v7x; kept unrolled here for robustness.
    for l in range(n_layers):
        # fused QKV projection, lane-dense 128-wide weight slab (cols 96..127 are zero pad)
        wqkv = w_ref[l, 0:hid, :]                                              # (H, 128)
        bqkv = vec_ref[l, 0:1, :]                                              # (1, 128)
        qkv = jnp.dot(x2, wqkv, preferred_element_type=jnp.float32) + bqkv     # (B*S, 128)

        ctx_rows = []
        for b in range(bsz):
            r0 = b * seq
            qkv_b = qkv[r0:r0 + seq, :]                                        # (S, 128), hoisted
            mbias = mbias_rows[b]                                              # (1, S)
            head_ctx = []
            for h in range(n_heads):
                c0 = h * head_dim
                q_bh = qkv_b[:, c0:c0 + head_dim]                              # (S, DH)
                k_bh = qkv_b[:, hid + c0:hid + c0 + head_dim]
                v_bh = qkv_b[:, 2 * hid + c0:2 * hid + c0 + head_dim]

                s_mat = lax.dot_general(
                    q_bh, k_bh, (((1,), (1,)), ((), ())),
                    preferred_element_type=jnp.float32) * scale                # (S, S)
                s_mat = s_mat + mbias                                          # mask keys
                mx = jnp.max(s_mat, axis=-1, keepdims=True)
                p = jnp.exp(s_mat - mx)
                denom = jnp.sum(p, axis=-1, keepdims=True)
                p = p / denom                                                  # exact divide
                head_ctx.append(
                    jnp.dot(p, v_bh, preferred_element_type=jnp.float32))      # (S, DH)
            ctx_rows.append(jnp.concatenate(head_ctx, axis=1))                 # (S, H)
        ctx = jnp.concatenate(ctx_rows, axis=0)                                # (B*S, H), vregs only

        # attention output projection + residual + LN (fused)
        wo = w_ref[l, hid:2 * hid, 0:hid]
        bo = vec_ref[l, 1:2, 0:hid]
        attn_out = jnp.dot(ctx, wo, preferred_element_type=jnp.float32) + bo
        x2 = layernorm(attn_out + x2, vec_ref[l, 2:3, 0:hid], vec_ref[l, 3:4, 0:hid])

        # FFN + residual + LN (fused)
        wi = w_ref[l, 2 * hid:3 * hid, 0:inter]
        bi = vec_ref[l, 4:5, 0:inter]
        inter_a = gelu(jnp.dot(x2, wi, preferred_element_type=jnp.float32) + bi)
        wf = w_ref[l, 3 * hid:3 * hid + inter, 0:hid]
        bf = vec_ref[l, 5:6, 0:hid]
        ffn = jnp.dot(inter_a, wf, preferred_element_type=jnp.float32) + bf
        x2 = layernorm(ffn + x2, vec_ref[l, 6:7, 0:hid], vec_ref[l, 7:8, 0:hid])

    enc_ref[...] = x2.astype(enc_ref.dtype)

    # ---- fused emission projection + BERT pooler (single matmul) ----
    # misc rows 16:48 hold [ff_w | pool_w] padded to 128 lanes.
    head_w = misc_ref[16:48, :]                                                # (H, 128)
    head_out = jnp.dot(x2, head_w, preferred_element_type=jnp.float32)         # (B*S, 128)

    em = head_out[:, 0:num_tags] + misc_ref[3:4, 0:num_tags]                   # (B*S, T)

    cls_rows = jnp.concatenate(
        [head_out[b * seq:b * seq + 1, num_tags:num_tags + hid] for b in range(bsz)],
        axis=0)                                                                # (B, H)
    pooled = jnp.tanh(cls_rows + misc_ref[2:3, 0:hid])
    pooled_ref[...] = pooled.astype(pooled_ref.dtype)                          # one store

    # ---- CRF Viterbi decode, fully unrolled (matches crf.decode(emissions)) ----
    start = misc_ref[4:5, 0:num_tags]                                          # (1, T)
    end = misc_ref[5:6, 0:num_tags]                                            # (1, T)
    transT = misc_ref[6:6 + num_tags, 0:num_tags]                              # transT[j,i] = trans[i,j]
    big = jnp.int32(10 ** 9)

    def em_at(i):
        # per-step emissions (B, T) from static row slices of the vreg value
        return jnp.concatenate(
            [em[b * seq + i:b * seq + i + 1, :] for b in range(bsz)], axis=0)

    score = start + em_at(0)                                                   # (B, T)
    history = []                                                               # backpointers in vregs
    for i in range(1, seq):
        # cand[b, j_cur, i_src] = score[b, i_src] + trans[i_src, j_cur]
        cand = score[:, None, :] + transT[None, :, :]                          # (B, T, T)
        best = jnp.max(cand, axis=-1)                                          # (B, T)
        iot = lax.broadcasted_iota(jnp.int32, cand.shape, 2)
        idx = jnp.min(jnp.where(cand == best[:, :, None], iot, big), axis=-1)
        history.append(idx.astype(jnp.int32))
        score = best + em_at(i)

    score = score + end
    mx = jnp.max(score, axis=-1, keepdims=True)
    iot2 = lax.broadcasted_iota(jnp.int32, score.shape, 1)
    cur = jnp.min(jnp.where(score == mx, iot2, big), axis=-1,
                  keepdims=True).astype(jnp.int32)                             # (B, 1)

    # accumulate tags in a loop-carried (B, S) value; single store at the end
    col_iota = lax.broadcasted_iota(jnp.int32, (bsz, seq), 1)
    tags = jnp.where(col_iota == (seq - 1), cur, jnp.int32(0))                 # (B, S)
    tag_iota = lax.broadcasted_iota(jnp.int32, (bsz, num_tags), 1)
    for i in range(seq - 1, 0, -1):
        bp_i = history[i - 1]                                                  # (B, T)
        onehot = tag_iota == cur
        prev = jnp.sum(jnp.where(onehot, bp_i, jnp.int32(0)), axis=-1,
                       keepdims=True).astype(jnp.int32)                        # (B, 1)
        tags = jnp.where(col_iota == (i - 1), prev, tags)
        cur = prev
    tags_ref[...] = tags


# --------------------------------------------------------------------------
# One-time parameter packing (OUTSIDE the per-call jitted path)
# --------------------------------------------------------------------------
def _pad2d(x, rows, cols):
    r, c = x.shape
    return jnp.pad(x, ((0, rows - r), (0, cols - c)))


def _pad_row(v):
    return jnp.pad(v, (0, LANE - v.shape[0]))


def pack_params(params):
    """Pack raw parameters into 3 lane-dense VMEM slabs + embedding tables."""
    layers = params["layers"]

    w_blocks, v_blocks = [], []
    for lp in layers:
        wqkv = jnp.concatenate([lp["wq"], lp["wk"], lp["wv"]], axis=1)         # (H, 3H)
        w = jnp.concatenate([
            _pad2d(wqkv, H, LANE),        # rows   0:32
            _pad2d(lp["wo"], H, LANE),    # rows  32:64
            _pad2d(lp["wi"], H, LANE),    # rows  64:96
            _pad2d(lp["wf"], INTER, LANE)  # rows 96:160
        ], axis=0)                                                             # (160, 128)
        w_blocks.append(w)

        bqkv = jnp.concatenate([lp["bq"], lp["bk"], lp["bv"]])
        rows = [bqkv, lp["bo"], lp["ln1_g"], lp["ln1_b"],
                lp["bi"], lp["bf"], lp["ln2_g"], lp["ln2_b"]]
        v_blocks.append(jnp.stack([_pad_row(r) for r in rows]))                # (8, 128)

    w_slab = jnp.stack(w_blocks)                                               # (L, 160, 128)
    vec_slab = jnp.stack(v_blocks)                                             # (L, 8, 128)

    transT = params["crf_trans"].T                                             # (T, T)
    misc_rows = [
        _pad_row(params["emb_ln_g"]),      # row 0
        _pad_row(params["emb_ln_b"]),      # row 1
        _pad_row(params["pool_b"]),        # row 2
        _pad_row(params["ff_b"]),          # row 3
        _pad_row(params["crf_start"]),     # row 4
        _pad_row(params["crf_end"]),       # row 5
    ] + [_pad_row(transT[j]) for j in range(NUM_CLASSES)]                      # rows 6:11
    misc_top = jnp.stack(misc_rows)
    misc_top = jnp.pad(misc_top, ((0, 16 - misc_top.shape[0]), (0, 0)))        # (16, 128)
    head_w = jnp.concatenate([params["ff_w"], params["pool_w"]], axis=1)       # (H, T+H)
    head_w = _pad2d(head_w, H, LANE)                                           # (32, 128)
    misc_slab = jnp.concatenate([misc_top, head_w], axis=0)                    # (48, 128)

    return {
        "w_slab": w_slab.astype(jnp.float32),
        "vec_slab": vec_slab.astype(jnp.float32),
        "misc_slab": misc_slab.astype(jnp.float32),
        "word_emb": params["word_emb"],
        "pos_emb": params["pos_emb"],
        "type_emb": params["type_emb"],
    }


# --------------------------------------------------------------------------
# Per-call wrapper: embedding lookup + single pallas_call
# --------------------------------------------------------------------------
def kobert_crf_forward(packed, input_ids, token_type_ids=None):
    bsz, seq = input_ids.shape
    if token_type_ids is None:
        token_type_ids = jnp.zeros_like(input_ids)

    # attention_mask = input_ids.ne(pad_token).float()  -> additive key bias
    attention_mask = (input_ids != PAD_ID).astype(jnp.float32)
    mask_bias = (1.0 - attention_mask) * -10000.0                              # (B, S)

    # embedding table gathers stay in the JAX wrapper (glue only)
    emb = (packed["word_emb"][input_ids]
           + packed["pos_emb"][None, :seq, :]
           + packed["type_emb"][token_type_ids])
    emb2 = emb.reshape(bsz * seq, H)

    n_layers = packed["w_slab"].shape[0]
    kernel = functools.partial(
        _fused_forward_kernel,
        bsz=bsz, seq=seq, n_layers=n_layers,
        n_heads=NH, head_dim=DH, num_tags=NUM_CLASSES, inter=INTER)

    enc2, pooled, tags = pl.pallas_call(
        kernel,
        out_shape=(
            jax.ShapeDtypeStruct((bsz * seq, H), jnp.float32),                 # last encoder layer
            jax.ShapeDtypeStruct((bsz, H), jnp.float32),                       # pooled
            jax.ShapeDtypeStruct((bsz, seq), jnp.int32),                       # decoded tags
        ),
    )(emb2, mask_bias, packed["w_slab"], packed["vec_slab"], packed["misc_slab"])

    last_encoder_layer = enc2.reshape(bsz, seq, H)
    # dropout: inference mode -> identity
    sequence_of_tags = tags
    return sequence_of_tags, (last_encoder_layer, pooled)


# --------------------------------------------------------------------------
# Deterministic parameter init (synthetic; no checkpoint load)
# --------------------------------------------------------------------------
def init_params(key):
    keys = iter(jax.random.split(key, 128))

    def nrm(shape, scale=0.02):
        return (scale * jax.random.normal(next(keys), shape)).astype(jnp.float32)

    def uni(shape):
        return jax.random.uniform(next(keys), shape, minval=-0.1, maxval=0.1,
                                  dtype=jnp.float32)

    p = {
        "word_emb": nrm((VOCAB, H)),
        "pos_emb": nrm((MAX_POS, H)),
        "type_emb": nrm((2, H)),
        "emb_ln_g": jnp.ones((H,), jnp.float32),
        "emb_ln_b": jnp.zeros((H,), jnp.float32),
        "layers": [],
        "pool_w": nrm((H, H)),
        "pool_b": jnp.zeros((H,), jnp.float32),
        "ff_w": nrm((H, NUM_CLASSES)),
        "ff_b": jnp.zeros((NUM_CLASSES,), jnp.float32),
        "crf_start": uni((NUM_CLASSES,)),
        "crf_end": uni((NUM_CLASSES,)),
        "crf_trans": uni((NUM_CLASSES, NUM_CLASSES)),
    }
    for _ in range(NLAYERS):
        p["layers"].append({
            "wq": nrm((H, H)), "bq": jnp.zeros((H,), jnp.float32),
            "wk": nrm((H, H)), "bk": jnp.zeros((H,), jnp.float32),
            "wv": nrm((H, H)), "bv": jnp.zeros((H,), jnp.float32),
            "wo": nrm((H, H)), "bo": jnp.zeros((H,), jnp.float32),
            "ln1_g": jnp.ones((H,), jnp.float32), "ln1_b": jnp.zeros((H,), jnp.float32),
            "wi": nrm((H, INTER)), "bi": jnp.zeros((INTER,), jnp.float32),
            "wf": nrm((INTER, H)), "bf": jnp.zeros((H,), jnp.float32),
            "ln2_g": jnp.ones((H,), jnp.float32), "ln2_b": jnp.zeros((H,), jnp.float32),
        })
    return p


if __name__ == "__main__":
    root = jax.random.PRNGKey(0)
    k_param, k_ids = jax.random.split(root)

    params = init_params(k_param)
    packed = pack_params(params)          # one-time packing, OUTSIDE the per-call path
    packed = jax.device_put(packed)

    input_ids = jax.random.randint(k_ids, (B, S), 2, VOCAB, dtype=jnp.int32)
    # make the second sequence end in padding tokens to exercise the attention mask
    input_ids = input_ids.at[1, 6:].set(PAD_ID)

    fwd = jax.jit(kobert_crf_forward)
    tags, (last_layer, pooled) = fwd(packed, input_ids)
    jax.block_until_ready(tags)
    jax.block_until_ready(last_layer)
    jax.block_until_ready(pooled)

    assert tags.shape == (B, S) and tags.dtype == jnp.int32
    assert last_layer.shape == (B, S, H)
    assert pooled.shape == (B, H)
    assert bool(jnp.all(tags >= 0)) and bool(jnp.all(tags < NUM_CLASSES))
    print("KERNEL_OK")
</pallas_src>

<mosaic_0001>
module attributes {stable_mosaic.version = 11 : i64} {
  func.func @_fused_forward_kernel(%arg0: memref<16x32xf32, #tpu.memory_space<vmem>>, %arg1: memref<2x8xf32, #tpu.memory_space<vmem>>, %arg2: memref<2x160x128xf32, #tpu.memory_space<vmem>>, %arg3: memref<2x8x128xf32, #tpu.memory_space<vmem>>, %arg4: memref<48x128xf32, #tpu.memory_space<vmem>>, %arg5: memref<16x32xf32, #tpu.memory_space<vmem>>, %arg6: memref<2x32xf32, #tpu.memory_space<vmem>>, %arg7: memref<2x8xi32, #tpu.memory_space<vmem>>) attributes {dimension_semantics = [], scalar_prefetch = 0 : i64, scratch_operands = 0 : i64, tpu.core_type = #tpu.core_type<tc>} {
    %c0 = arith.constant 0 : index
    %c0_0 = arith.constant 0 : index
    %0 = vector.load %arg0[%c0, %c0_0] : memref<16x32xf32, #tpu.memory_space<vmem>>, vector<16x32xf32>
    %c0_1 = arith.constant 0 : index
    %c0_2 = arith.constant 0 : index
    %1 = vector.load %arg4[%c0_1, %c0_2] : memref<48x128xf32, #tpu.memory_space<vmem>>, vector<1x32xf32>
    %c1 = arith.constant 1 : index
    %c0_3 = arith.constant 0 : index
    %2 = vector.load %arg4[%c1, %c0_3] : memref<48x128xf32, #tpu.memory_space<vmem>>, vector<1x32xf32>
    %cst = arith.constant dense<0.000000e+00> : vector<16xf32>
    %3 = vector.multi_reduction <add>, %0, %cst [1] : vector<16x32xf32> to vector<16xf32>
    %4 = vector.shape_cast %3 : vector<16xf32> to vector<16x1xf32>
    %cst_4 = arith.constant 3.200000e+01 : f32
    %5 = vector.broadcast %cst_4 : f32 to vector<16x1xf32>
    %6 = arith.divf %4, %5 : vector<16x1xf32>
    %7 = vector.broadcast %6 : vector<16x1xf32> to vector<16x32xf32>
    %8 = arith.subf %0, %7 : vector<16x32xf32>
    %9 = arith.mulf %8, %8 : vector<16x32xf32>
    %cst_5 = arith.constant dense<0.000000e+00> : vector<16xf32>
    %10 = vector.multi_reduction <add>, %9, %cst_5 [1] : vector<16x32xf32> to vector<16xf32>
    %11 = vector.shape_cast %10 : vector<16xf32> to vector<16x1xf32>
    %cst_6 = arith.constant 3.200000e+01 : f32
    %12 = vector.broadcast %cst_6 : f32 to vector<16x1xf32>
    %13 = arith.divf %11, %12 : vector<16x1xf32>
    %cst_7 = arith.constant 9.99999996E-13 : f32
    %14 = vector.broadcast %cst_7 : f32 to vector<16x1xf32>
    %15 = arith.addf %13, %14 : vector<16x1xf32>
    %16 = math.rsqrt %15 : vector<16x1xf32>
    %17 = vector.broadcast %16 : vector<16x1xf32> to vector<16x32xf32>
    %18 = arith.mulf %8, %17 : vector<16x32xf32>
    %19 = vector.broadcast %1 : vector<1x32xf32> to vector<16x32xf32>
    %20 = arith.mulf %18, %19 : vector<16x32xf32>
    %21 = vector.broadcast %2 : vector<1x32xf32> to vector<16x32xf32>
    %22 = arith.addf %20, %21 : vector<16x32xf32>
    %c0_8 = arith.constant 0 : index
    %c0_9 = arith.constant 0 : index
    %23 = vector.load %arg1[%c0_8, %c0_9] : memref<2x8xf32, #tpu.memory_space<vmem>>, vector<2x8xf32>
    %24 = vector.extract_strided_slice %23 {offsets = [0, 0], sizes = [1, 8], strides = [1, 1]} : vector<2x8xf32> to vector<1x8xf32>
    %25 = vector.extract_strided_slice %23 {offsets = [1, 0], sizes = [1, 8], strides = [1, 1]} : vector<2x8xf32> to vector<1x8xf32>
    %c0_10 = arith.constant 0 : index
    %c0_11 = arith.constant 0 : index
    %c0_12 = arith.constant 0 : index
    %26 = vector.load %arg2[%c0_10, %c0_11, %c0_12] : memref<2x160x128xf32, #tpu.memory_space<vmem>>, vector<1x32x128xf32>
    %27 = vector.shape_cast %26 : vector<1x32x128xf32> to vector<32x128xf32>
    %c0_13 = arith.constant 0 : index
    %c0_14 = arith.constant 0 : index
    %c0_15 = arith.constant 0 : index
    %28 = vector.load %arg3[%c0_13, %c0_14, %c0_15] : memref<2x8x128xf32, #tpu.memory_space<vmem>>, vector<1x1x128xf32>
    %29 = vector.shape_cast %28 : vector<1x1x128xf32> to vector<1x128xf32>
    %cst_16 = arith.constant dense<0.000000e+00> : vector<16x128xf32>
    %30 = tpu.matmul %22, %27, %cst_16 {dimension_numbers = #tpu.dot_dimension_numbers<[1], [0], [0], [1], [0, 0, 1, 1], [], []>} : vector<16x32xf32>, vector<32x128xf32>, vector<16x128xf32> -> vector<16x128xf32>
    %31 = vector.broadcast %29 : vector<1x128xf32> to vector<16x128xf32>
    %32 = arith.addf %30, %31 : vector<16x128xf32>
    %33 = vector.extract_strided_slice %32 {offsets = [0, 0], sizes = [8, 128], strides = [1, 1]} : vector<16x128xf32> to vector<8x128xf32>
    %34 = vector.extract_strided_slice %33 {offsets = [0, 0], sizes = [8, 16], strides = [1, 1]} : vector<8x128xf32> to vector<8x16xf32>
    %35 = vector.extract_strided_slice %33 {offsets = [0, 32], sizes = [8, 16], strides = [1, 1]} : vector<8x128xf32> to vector<8x16xf32>
    %36 = vector.extract_strided_slice %33 {offsets = [0, 64], sizes = [8, 16], strides = [1, 1]} : vector<8x128xf32> to vector<8x16xf32>
    %cst_17 = arith.constant dense<0.000000e+00> : vector<8x8xf32>
    %37 = tpu.matmul %34, %35, %cst_17 {dimension_numbers = #tpu.dot_dimension_numbers<[1], [1], [0], [0], [0, 0, 1, 0], [], []>} : vector<8x16xf32>, vector<8x16xf32>, vector<8x8xf32> -> vector<8x8xf32>
    %cst_18 = arith.constant 2.500000e-01 : f32
    %38 = vector.broadcast %cst_18 : f32 to vector<8x8xf32>
    %39 = arith.mulf %37, %38 : vector<8x8xf32>
    %40 = vector.broadcast %24 : vector<1x8xf32> to vector<8x8xf32>
    %41 = arith.addf %39, %40 : vector<8x8xf32>
    %cst_19 = arith.constant dense<0xFF800000> : vector<8xf32>
    %42 = vector.multi_reduction <maximumf>, %41, %cst_19 [1] : vector<8x8xf32> to vector<8xf32>
    %43 = vector.shape_cast %42 : vector<8xf32> to vector<8x1xf32>
    %44 = vector.broadcast %43 : vector<8x1xf32> to vector<8x8xf32>
    %45 = arith.subf %41, %44 : vector<8x8xf32>
    %46 = math.exp %45 : vector<8x8xf32>
    %cst_20 = arith.constant dense<0.000000e+00> : vector<8xf32>
    %47 = vector.multi_reduction <add>, %46, %cst_20 [1] : vector<8x8xf32> to vector<8xf32>
    %48 = vector.shape_cast %47 : vector<8xf32> to vector<8x1xf32>
    %49 = vector.broadcast %48 : vector<8x1xf32> to vector<8x8xf32>
    %50 = arith.divf %46, %49 : vector<8x8xf32>
    %cst_21 = arith.constant dense<0.000000e+00> : vector<8x16xf32>
    %51 = tpu.matmul %50, %36, %cst_21 {dimension_numbers = #tpu.dot_dimension_numbers<[1], [0], [0], [1], [0, 0, 1, 1], [], []>} : vector<8x8xf32>, vector<8x16xf32>, vector<8x16xf32> -> vector<8x16xf32>
    %52 = vector.extract_strided_slice %33 {offsets = [0, 16], sizes = [8, 16], strides = [1, 1]} : vector<8x128xf32> to vector<8x16xf32>
    %53 = vector.extract_strided_slice %33 {offsets = [0, 48], sizes = [8, 16], strides = [1, 1]} : vector<8x128xf32> to vector<8x16xf32>
    %54 = vector.extract_strided_slice %33 {offsets = [0, 80], sizes = [8, 16], strides = [1, 1]} : vector<8x128xf32> to vector<8x16xf32>
    %cst_22 = arith.constant dense<0.000000e+00> : vector<8x8xf32>
    %55 = tpu.matmul %52, %53, %cst_22 {dimension_numbers = #tpu.dot_dimension_numbers<[1], [1], [0], [0], [0, 0, 1, 0], [], []>} : vector<8x16xf32>, vector<8x16xf32>, vector<8x8xf32> -> vector<8x8xf32>
    %cst_23 = arith.constant 2.500000e-01 : f32
    %56 = vector.broadcast %cst_23 : f32 to vector<8x8xf32>
    %57 = arith.mulf %55, %56 : vector<8x8xf32>
    %58 = vector.broadcast %24 : vector<1x8xf32> to vector<8x8xf32>
    %59 = arith.addf %57, %58 : vector<8x8xf32>
    %cst_24 = arith.constant dense<0xFF800000> : vector<8xf32>
    %60 = vector.multi_reduction <maximumf>, %59, %cst_24 [1] : vector<8x8xf32> to vector<8xf32>
    %61 = vector.shape_cast %60 : vector<8xf32> to vector<8x1xf32>
    %62 = vector.broadcast %61 : vector<8x1xf32> to vector<8x8xf32>
    %63 = arith.subf %59, %62 : vector<8x8xf32>
    %64 = math.exp %63 : vector<8x8xf32>
    %cst_25 = arith.constant dense<0.000000e+00> : vector<8xf32>
    %65 = vector.multi_reduction <add>, %64, %cst_25 [1] : vector<8x8xf32> to vector<8xf32>
    %66 = vector.shape_cast %65 : vector<8xf32> to vector<8x1xf32>
    %67 = vector.broadcast %66 : vector<8x1xf32> to vector<8x8xf32>
    %68 = arith.divf %64, %67 : vector<8x8xf32>
    %cst_26 = arith.constant dense<0.000000e+00> : vector<8x16xf32>
    %69 = tpu.matmul %68, %54, %cst_26 {dimension_numbers = #tpu.dot_dimension_numbers<[1], [0], [0], [1], [0, 0, 1, 1], [], []>} : vector<8x8xf32>, vector<8x16xf32>, vector<8x16xf32> -> vector<8x16xf32>
    %70 = tpu.concatenate %51, %69 in 1 : vector<8x16xf32>, vector<8x16xf32> -> vector<8x32xf32>
    %71 = vector.extract_strided_slice %32 {offsets = [8, 0], sizes = [8, 128], strides = [1, 1]} : vector<16x128xf32> to vector<8x128xf32>
    %72 = vector.extract_strided_slice %71 {offsets = [0, 0], sizes = [8, 16], strides = [1, 1]} : vector<8x128xf32> to vector<8x16xf32>
    %73 = vector.extract_strided_slice %71 {offsets = [0, 32], sizes = [8, 16], strides = [1, 1]} : vector<8x128xf32> to vector<8x16xf32>
    %74 = vector.extract_strided_slice %71 {offsets = [0, 64], sizes = [8, 16], strides = [1, 1]} : vector<8x128xf32> to vector<8x16xf32>
    %cst_27 = arith.constant dense<0.000000e+00> : vector<8x8xf32>
    %75 = tpu.matmul %72, %73, %cst_27 {dimension_numbers = #tpu.dot_dimension_numbers<[1], [1], [0], [0], [0, 0, 1, 0], [], []>} : vector<8x16xf32>, vector<8x16xf32>, vector<8x8xf32> -> vector<8x8xf32>
    %cst_28 = arith.constant 2.500000e-01 : f32
    %76 = vector.broadcast %cst_28 : f32 to vector<8x8xf32>
    %77 = arith.mulf %75, %76 : vector<8x8xf32>
    %78 = vector.broadcast %25 : vector<1x8xf32> to vector<8x8xf32>
    %79 = arith.addf %77, %78 : vector<8x8xf32>
    %cst_29 = arith.constant dense<0xFF800000> : vector<8xf32>
    %80 = vector.multi_reduction <maximumf>, %79, %cst_29 [1] : vector<8x8xf32> to vector<8xf32>
    %81 = vector.shape_cast %80 : vector<8xf32> to vector<8x1xf32>
    %82 = vector.broadcast %81 : vector<8x1xf32> to vector<8x8xf32>
    %83 = arith.subf %79, %82 : vector<8x8xf32>
    %84 = math.exp %83 : vector<8x8xf32>
    %cst_30 = arith.constant dense<0.000000e+00> : vector<8xf32>
    %85 = vector.multi_reduction <add>, %84, %cst_30 [1] : vector<8x8xf32> to vector<8xf32>
    %86 = vector.shape_cast %85 : vector<8xf32> to vector<8x1xf32>
    %87 = vector.broadcast %86 : vector<8x1xf32> to vector<8x8xf32>
    %88 = arith.divf %84, %87 : vector<8x8xf32>
    %cst_31 = arith.constant dense<0.000000e+00> : vector<8x16xf32>
    %89 = tpu.matmul %88, %74, %cst_31 {dimension_numbers = #tpu.dot_dimension_numbers<[1], [0], [0], [1], [0, 0, 1, 1], [], []>} : vector<8x8xf32>, vector<8x16xf32>, vector<8x16xf32> -> vector<8x16xf32>
    %90 = vector.extract_strided_slice %71 {offsets = [0, 16], sizes = [8, 16], strides = [1, 1]} : vector<8x128xf32> to vector<8x16xf32>
    %91 = vector.extract_strided_slice %71 {offsets = [0, 48], sizes = [8, 16], strides = [1, 1]} : vector<8x128xf32> to vector<8x16xf32>
    %92 = vector.extract_strided_slice %71 {offsets = [0, 80], sizes = [8, 16], strides = [1, 1]} : vector<8x128xf32> to vector<8x16xf32>
    %cst_32 = arith.constant dense<0.000000e+00> : vector<8x8xf32>
    %93 = tpu.matmul %90, %91, %cst_32 {dimension_numbers = #tpu.dot_dimension_numbers<[1], [1], [0], [0], [0, 0, 1, 0], [], []>} : vector<8x16xf32>, vector<8x16xf32>, vector<8x8xf32> -> vector<8x8xf32>
    %cst_33 = arith.constant 2.500000e-01 : f32
    %94 = vector.broadcast %cst_33 : f32 to vector<8x8xf32>
    %95 = arith.mulf %93, %94 : vector<8x8xf32>
    %96 = vector.broadcast %25 : vector<1x8xf32> to vector<8x8xf32>
    %97 = arith.addf %95, %96 : vector<8x8xf32>
    %cst_34 = arith.constant dense<0xFF800000> : vector<8xf32>
    %98 = vector.multi_reduction <maximumf>, %97, %cst_34 [1] : vector<8x8xf32> to vector<8xf32>
    %99 = vector.shape_cast %98 : vector<8xf32> to vector<8x1xf32>
    %100 = vector.broadcast %99 : vector<8x1xf32> to vector<8x8xf32>
    %101 = arith.subf %97, %100 : vector<8x8xf32>
    %102 = math.exp %101 : vector<8x8xf32>
    %cst_35 = arith.constant dense<0.000000e+00> : vector<8xf32>
    %103 = vector.multi_reduction <add>, %102, %cst_35 [1] : vector<8x8xf32> to vector<8xf32>
    %104 = vector.shape_cast %103 : vector<8xf32> to vector<8x1xf32>
    %105 = vector.broadcast %104 : vector<8x1xf32> to vector<8x8xf32>
    %106 = arith.divf %102, %105 : vector<8x8xf32>
    %cst_36 = arith.constant dense<0.000000e+00> : vector<8x16xf32>
    %107 = tpu.matmul %106, %92, %cst_36 {dimension_numbers = #tpu.dot_dimension_numbers<[1], [0], [0], [1], [0, 0, 1, 1], [], []>} : vector<8x8xf32>, vector<8x16xf32>, vector<8x16xf32> -> vector<8x16xf32>
    %108 = tpu.concatenate %89, %107 in 1 : vector<8x16xf32>, vector<8x16xf32> -> vector<8x32xf32>
    %109 = tpu.concatenate %70, %108 in 0 : vector<8x32xf32>, vector<8x32xf32> -> vector<16x32xf32>
    %c0_37 = arith.constant 0 : index
    %c32 = arith.constant 32 : index
    %c0_38 = arith.constant 0 : index
    %110 = vector.load %arg2[%c0_37, %c32, %c0_38] : memref<2x160x128xf32, #tpu.memory_space<vmem>>, vector<1x32x32xf32>
    %111 = vector.shape_cast %110 : vector<1x32x32xf32> to vector<32x32xf32>
    %c0_39 = arith.constant 0 : index
    %c1_40 = arith.constant 1 : index
    %c0_41 = arith.constant 0 : index
    %112 = vector.load %arg3[%c0_39, %c1_40, %c0_41] : memref<2x8x128xf32, #tpu.memory_space<vmem>>, vector<1x1x32xf32>
    %113 = vector.shape_cast %112 : vector<1x1x32xf32> to vector<1x32xf32>
    %cst_42 = arith.constant dense<0.000000e+00> : vector<16x32xf32>
    %114 = tpu.matmul %109, %111, %cst_42 {dimension_numbers = #tpu.dot_dimension_numbers<[1], [0], [0], [1], [0, 0, 1, 1], [], []>} : vector<16x32xf32>, vector<32x32xf32>, vector<16x32xf32> -> vector<16x32xf32>
    %115 = vector.broadcast %113 : vector<1x32xf32> to vector<16x32xf32>
    %116 = arith.addf %114, %115 : vector<16x32xf32>
    %117 = arith.addf %116, %22 : vector<16x32xf32>
    %c0_43 = arith.constant 0 : index
    %c2 = arith.constant 2 : index
    %c0_44 = arith.constant 0 : index
    %118 = vector.load %arg3[%c0_43, %c2, %c0_44] : memref<2x8x128xf32, #tpu.memory_space<vmem>>, vector<1x1x32xf32>
    %119 = vector.shape_cast %118 : vector<1x1x32xf32> to vector<1x32xf32>
    %c0_45 = arith.constant 0 : index
    %c3 = arith.constant 3 : index
    %c0_46 = arith.constant 0 : index
    %120 = vector.load %arg3[%c0_45, %c3, %c0_46] : memref<2x8x128xf32, #tpu.memory_space<vmem>>, vector<1x1x32xf32>
    %121 = vector.shape_cast %120 : vector<1x1x32xf32> to vector<1x32xf32>
    %cst_47 = arith.constant dense<0.000000e+00> : vector<16xf32>
    %122 = vector.multi_reduction <add>, %117, %cst_47 [1] : vector<16x32xf32> to vector<16xf32>
    %123 = vector.shape_cast %122 : vector<16xf32> to vector<16x1xf32>
    %cst_48 = arith.constant 3.200000e+01 : f32
    %124 = vector.broadcast %cst_48 : f32 to vector<16x1xf32>
    %125 = arith.divf %123, %124 : vector<16x1xf32>
    %126 = vector.broadcast %125 : vector<16x1xf32> to vector<16x32xf32>
    %127 = arith.subf %117, %126 : vector<16x32xf32>
    %128 = arith.mulf %127, %127 : vector<16x32xf32>
    %cst_49 = arith.constant dense<0.000000e+00> : vector<16xf32>
    %129 = vector.multi_reduction <add>, %128, %cst_49 [1] : vector<16x32xf32> to vector<16xf32>
    %130 = vector.shape_cast %129 : vector<16xf32> to vector<16x1xf32>
    %cst_50 = arith.constant 3.200000e+01 : f32
    %131 = vector.broadcast %cst_50 : f32 to vector<16x1xf32>
    %132 = arith.divf %130, %131 : vector<16x1xf32>
    %cst_51 = arith.constant 9.99999996E-13 : f32
    %133 = vector.broadcast %cst_51 : f32 to vector<16x1xf32>
    %134 = arith.addf %132, %133 : vector<16x1xf32>
    %135 = math.rsqrt %134 : vector<16x1xf32>
    %136 = vector.broadcast %135 : vector<16x1xf32> to vector<16x32xf32>
    %137 = arith.mulf %127, %136 : vector<16x32xf32>
    %138 = vector.broadcast %119 : vector<1x32xf32> to vector<16x32xf32>
    %139 = arith.mulf %137, %138 : vector<16x32xf32>
    %140 = vector.broadcast %121 : vector<1x32xf32> to vector<16x32xf32>
    %141 = arith.addf %139, %140 : vector<16x32xf32>
    %c0_52 = arith.constant 0 : index
    %c64 = arith.constant 64 : index
    %c0_53 = arith.constant 0 : index
    %142 = vector.load %arg2[%c0_52, %c64, %c0_53] : memref<2x160x128xf32, #tpu.memory_space<vmem>>, vector<1x32x64xf32>
    %143 = vector.shape_cast %142 : vector<1x32x64xf32> to vector<32x64xf32>
    %c0_54 = arith.constant 0 : index
    %c4 = arith.constant 4 : index
    %c0_55 = arith.constant 0 : index
    %144 = vector.load %arg3[%c0_54, %c4, %c0_55] : memref<2x8x128xf32, #tpu.memory_space<vmem>>, vector<1x1x64xf32>
    %145 = vector.shape_cast %144 : vector<1x1x64xf32> to vector<1x64xf32>
    %cst_56 = arith.constant dense<0.000000e+00> : vector<16x64xf32>
    %146 = tpu.matmul %141, %143, %cst_56 {dimension_numbers = #tpu.dot_dimension_numbers<[1], [0], [0], [1], [0, 0, 1, 1], [], []>} : vector<16x32xf32>, vector<32x64xf32>, vector<16x64xf32> -> vector<16x64xf32>
    %147 = vector.broadcast %145 : vector<1x64xf32> to vector<16x64xf32>
    %148 = arith.addf %146, %147 : vector<16x64xf32>
    %cst_57 = arith.constant 5.000000e-01 : f32
    %149 = vector.broadcast %cst_57 : f32 to vector<16x64xf32>
    %150 = arith.mulf %149, %148 : vector<16x64xf32>
    %cst_58 = arith.constant 4.471500e-02 : f32
    %151 = vector.broadcast %cst_58 : f32 to vector<16x64xf32>
    %152 = arith.mulf %151, %148 : vector<16x64xf32>
    %153 = arith.mulf %152, %148 : vector<16x64xf32>
    %154 = arith.mulf %153, %148 : vector<16x64xf32>
    %155 = arith.addf %148, %154 : vector<16x64xf32>
    %cst_59 = arith.constant 0.797884583 : f32
    %156 = vector.broadcast %cst_59 : f32 to vector<16x64xf32>
    %157 = arith.mulf %156, %155 : vector<16x64xf32>
    %158 = math.tanh %157 : vector<16x64xf32>
    %cst_60 = arith.constant 1.000000e+00 : f32
    %159 = vector.broadcast %cst_60 : f32 to vector<16x64xf32>
    %160 = arith.addf %159, %158 : vector<16x64xf32>
    %161 = arith.mulf %150, %160 : vector<16x64xf32>
    %c0_61 = arith.constant 0 : index
    %c96 = arith.constant 96 : index
    %c0_62 = arith.constant 0 : index
    %162 = vector.load %arg2[%c0_61, %c96, %c0_62] : memref<2x160x128xf32, #tpu.memory_space<vmem>>, vector<1x64x32xf32>
    %163 = vector.shape_cast %162 : vector<1x64x32xf32> to vector<64x32xf32>
    %c0_63 = arith.constant 0 : index
    %c5 = arith.constant 5 : index
    %c0_64 = arith.constant 0 : index
    %164 = vector.load %arg3[%c0_63, %c5, %c0_64] : memref<2x8x128xf32, #tpu.memory_space<vmem>>, vector<1x1x32xf32>
    %165 = vector.shape_cast %164 : vector<1x1x32xf32> to vector<1x32xf32>
    %cst_65 = arith.constant dense<0.000000e+00> : vector<16x32xf32>
    %166 = tpu.matmul %161, %163, %cst_65 {dimension_numbers = #tpu.dot_dimension_numbers<[1], [0], [0], [1], [0, 0, 1, 1], [], []>} : vector<16x64xf32>, vector<64x32xf32>, vector<16x32xf32> -> vector<16x32xf32>
    %167 = vector.broadcast %165 : vector<1x32xf32> to vector<16x32xf32>
    %168 = arith.addf %166, %167 : vector<16x32xf32>
    %169 = arith.addf %168, %141 : vector<16x32xf32>
    %c0_66 = arith.constant 0 : index
    %c6 = arith.constant 6 : index
    %c0_67 = arith.constant 0 : index
    %170 = vector.load %arg3[%c0_66, %c6, %c0_67] : memref<2x8x128xf32, #tpu.memory_space<vmem>>, vector<1x1x32xf32>
    %171 = vector.shape_cast %170 : vector<1x1x32xf32> to vector<1x32xf32>
    %c0_68 = arith.constant 0 : index
    %c7 = arith.constant 7 : index
    %c0_69 = arith.constant 0 : index
    %172 = vector.load %arg3[%c0_68, %c7, %c0_69] : memref<2x8x128xf32, #tpu.memory_space<vmem>>, vector<1x1x32xf32>
    %173 = vector.shape_cast %172 : vector<1x1x32xf32> to vector<1x32xf32>
    %cst_70 = arith.constant dense<0.000000e+00> : vector<16xf32>
    %174 = vector.multi_reduction <add>, %169, %cst_70 [1] : vector<16x32xf32> to vector<16xf32>
    %175 = vector.shape_cast %174 : vector<16xf32> to vector<16x1xf32>
    %cst_71 = arith.constant 3.200000e+01 : f32
    %176 = vector.broadcast %cst_71 : f32 to vector<16x1xf32>
    %177 = arith.divf %175, %176 : vector<16x1xf32>
    %178 = vector.broadcast %177 : vector<16x1xf32> to vector<16x32xf32>
    %179 = arith.subf %169, %178 : vector<16x32xf32>
    %180 = arith.mulf %179, %179 : vector<16x32xf32>
    %cst_72 = arith.constant dense<0.000000e+00> : vector<16xf32>
    %181 = vector.multi_reduction <add>, %180, %cst_72 [1] : vector<16x32xf32> to vector<16xf32>
    %182 = vector.shape_cast %181 : vector<16xf32> to vector<16x1xf32>
    %cst_73 = arith.constant 3.200000e+01 : f32
    %183 = vector.broadcast %cst_73 : f32 to vector<16x1xf32>
    %184 = arith.divf %182, %183 : vector<16x1xf32>
    %cst_74 = arith.constant 9.99999996E-13 : f32
    %185 = vector.broadcast %cst_74 : f32 to vector<16x1xf32>
    %186 = arith.addf %184, %185 : vector<16x1xf32>
    %187 = math.rsqrt %186 : vector<16x1xf32>
    %188 = vector.broadcast %187 : vector<16x1xf32> to vector<16x32xf32>
    %189 = arith.mulf %179, %188 : vector<16x32xf32>
    %190 = vector.broadcast %171 : vector<1x32xf32> to vector<16x32xf32>
    %191 = arith.mulf %189, %190 : vector<16x32xf32>
    %192 = vector.broadcast %173 : vector<1x32xf32> to vector<16x32xf32>
    %193 = arith.addf %191, %192 : vector<16x32xf32>
    %c1_75 = arith.constant 1 : index
    %c0_76 = arith.constant 0 : index
    %c0_77 = arith.constant 0 : index
    %194 = vector.load %arg2[%c1_75, %c0_76, %c0_77] : memref<2x160x128xf32, #tpu.memory_space<vmem>>, vector<1x32x128xf32>
    %195 = vector.shape_cast %194 : vector<1x32x128xf32> to vector<32x128xf32>
    %c1_78 = arith.constant 1 : index
    %c0_79 = arith.constant 0 : index
    %c0_80 = arith.constant 0 : index
    %196 = vector.load %arg3[%c1_78, %c0_79, %c0_80] : memref<2x8x128xf32, #tpu.memory_space<vmem>>, vector<1x1x128xf32>
    %197 = vector.shape_cast %196 : vector<1x1x128xf32> to vector<1x128xf32>
    %cst_81 = arith.constant dense<0.000000e+00> : vector<16x128xf32>
    %198 = tpu.matmul %193, %195, %cst_81 {dimension_numbers = #tpu.dot_dimension_numbers<[1], [0], [0], [1], [0, 0, 1, 1], [], []>} : vector<16x32xf32>, vector<32x128xf32>, vector<16x128xf32> -> vector<16x128xf32>
    %199 = vector.broadcast %197 : vector<1x128xf32> to vector<16x128xf32>
    %200 = arith.addf %198, %199 : vector<16x128xf32>
    %201 = vector.extract_strided_slice %200 {offsets = [0, 0], sizes = [8, 128], strides = [1, 1]} : vector<16x128xf32> to vector<8x128xf32>
    %202 = vector.extract_strided_slice %201 {offsets = [0, 0], sizes = [8, 16], strides = [1, 1]} : vector<8x128xf32> to vector<8x16xf32>
    %203 = vector.extract_strided_slice %201 {offsets = [0, 32], sizes = [8, 16], strides = [1, 1]} : vector<8x128xf32> to vector<8x16xf32>
    %204 = vector.extract_strided_slice %201 {offsets = [0, 64], sizes = [8, 16], strides = [1, 1]} : vector<8x128xf32> to vector<8x16xf32>
    %cst_82 = arith.constant dense<0.000000e+00> : vector<8x8xf32>
    %205 = tpu.matmul %202, %203, %cst_82 {dimension_numbers = #tpu.dot_dimension_numbers<[1], [1], [0], [0], [0, 0, 1, 0], [], []>} : vector<8x16xf32>, vector<8x16xf32>, vector<8x8xf32> -> vector<8x8xf32>
    %cst_83 = arith.constant 2.500000e-01 : f32
    %206 = vector.broadcast %cst_83 : f32 to vector<8x8xf32>
    %207 = arith.mulf %205, %206 : vector<8x8xf32>
    %208 = vector.broadcast %24 : vector<1x8xf32> to vector<8x8xf32>
    %209 = arith.addf %207, %208 : vector<8x8xf32>
    %cst_84 = arith.constant dense<0xFF800000> : vector<8xf32>
    %210 = vector.multi_reduction <maximumf>, %209, %cst_84 [1] : vector<8x8xf32> to vector<8xf32>
    %211 = vector.shape_cast %210 : vector<8xf32> to vector<8x1xf32>
    %212 = vector.broadcast %211 : vector<8x1xf32> to vector<8x8xf32>
    %213 = arith.subf %209, %212 : vector<8x8xf32>
    %214 = math.exp %213 : vector<8x8xf32>
    %cst_85 = arith.constant dense<0.000000e+00> : vector<8xf32>
    %215 = vector.multi_reduction <add>, %214, %cst_85 [1] : vector<8x8xf32> to vector<8xf32>
    %216 = vector.shape_cast %215 : vector<8xf32> to vector<8x1xf32>
    %217 = vector.broadcast %216 : vector<8x1xf32> to vector<8x8xf32>
    %218 = arith.divf %214, %217 : vector<8x8xf32>
    %cst_86 = arith.constant dense<0.000000e+00> : vector<8x16xf32>
    %219 = tpu.matmul %218, %204, %cst_86 {dimension_numbers = #tpu.dot_dimension_numbers<[1], [0], [0], [1], [0, 0, 1, 1], [], []>} : vector<8x8xf32>, vector<8x16xf32>, vector<8x16xf32> -> vector<8x16xf32>
    %220 = vector.extract_strided_slice %201 {offsets = [0, 16], sizes = [8, 16], strides = [1, 1]} : vector<8x128xf32> to vector<8x16xf32>
    %221 = vector.extract_strided_slice %201 {offsets = [0, 48], sizes = [8, 16], strides = [1, 1]} : vector<8x128xf32> to vector<8x16xf32>
    %222 = vector.extract_strided_slice %201 {offsets = [0, 80], sizes = [8, 16], strides = [1, 1]} : vector<8x128xf32> to vector<8x16xf32>
    %cst_87 = arith.constant dense<0.000000e+00> : vector<8x8xf32>
    %223 = tpu.matmul %220, %221, %cst_87 {dimension_numbers = #tpu.dot_dimension_numbers<[1], [1], [0], [0], [0, 0, 1, 0], [], []>} : vector<8x16xf32>, vector<8x16xf32>, vector<8x8xf32> -> vector<8x8xf32>
    %cst_88 = arith.constant 2.500000e-01 : f32
    %224 = vector.broadcast %cst_88 : f32 to vector<8x8xf32>
    %225 = arith.mulf %223, %224 : vector<8x8xf32>
    %226 = vector.broadcast %24 : vector<1x8xf32> to vector<8x8xf32>
    %227 = arith.addf %225, %226 : vector<8x8xf32>
    %cst_89 = arith.constant dense<0xFF800000> : vector<8xf32>
    %228 = vector.multi_reduction <maximumf>, %227, %cst_89 [1] : vector<8x8xf32> to vector<8xf32>
    %229 = vector.shape_cast %228 : vector<8xf32> to vector<8x1xf32>
    %230 = vector.broadcast %229 : vector<8x1xf32> to vector<8x8xf32>
    %231 = arith.subf %227, %230 : vector<8x8xf32>
    %232 = math.exp %231 : vector<8x8xf32>
    %cst_90 = arith.constant dense<0.000000e+00> : vector<8xf32>
    %233 = vector.multi_reduction <add>, %232, %cst_90 [1] : vector<8x8xf32> to vector<8xf32>
    %234 = vector.shape_cast %233 : vector<8xf32> to vector<8x1xf32>
    %235 = vector.broadcast %234 : vector<8x1xf32> to vector<8x8xf32>
    %236 = arith.divf %232, %235 : vector<8x8xf32>
    %cst_91 = arith.constant dense<0.000000e+00> : vector<8x16xf32>
    %237 = tpu.matmul %236, %222, %cst_91 {dimension_numbers = #tpu.dot_dimension_numbers<[1], [0], [0], [1], [0, 0, 1, 1], [], []>} : vector<8x8xf32>, vector<8x16xf32>, vector<8x16xf32> -> vector<8x16xf32>
    %238 = tpu.concatenate %219, %237 in 1 : vector<8x16xf32>, vector<8x16xf32> -> vector<8x32xf32>
    %239 = vector.extract_strided_slice %200 {offsets = [8, 0], sizes = [8, 128], strides = [1, 1]} : vector<16x128xf32> to vector<8x128xf32>
    %240 = vector.extract_strided_slice %239 {offsets = [0, 0], sizes = [8, 16], strides = [1, 1]} : vector<8x128xf32> to vector<8x16xf32>
    %241 = vector.extract_strided_slice %239 {offsets = [0, 32], sizes = [8, 16], strides = [1, 1]} : vector<8x128xf32> to vector<8x16xf32>
    %242 = vector.extract_strided_slice %239 {offsets = [0, 64], sizes = [8, 16], strides = [1, 1]} : vector<8x128xf32> to vector<8x16xf32>
    %cst_92 = arith.constant dense<0.000000e+00> : vector<8x8xf32>
    %243 = tpu.matmul %240, %241, %cst_92 {dimension_numbers = #tpu.dot_dimension_numbers<[1], [1], [0], [0], [0, 0, 1, 0], [], []>} : vector<8x16xf32>, vector<8x16xf32>, vector<8x8xf32> -> vector<8x8xf32>
    %cst_93 = arith.constant 2.500000e-01 : f32
    %244 = vector.broadcast %cst_93 : f32 to vector<8x8xf32>
    %245 = arith.mulf %243, %244 : vector<8x8xf32>
    %246 = vector.broadcast %25 : vector<1x8xf32> to vector<8x8xf32>
    %247 = arith.addf %245, %246 : vector<8x8xf32>
    %cst_94 = arith.constant dense<0xFF800000> : vector<8xf32>
    %248 = vector.multi_reduction <maximumf>, %247, %cst_94 [1] : vector<8x8xf32> to vector<8xf32>
    %249 = vector.shape_cast %248 : vector<8xf32> to vector<8x1xf32>
    %250 = vector.broadcast %249 : vector<8x1xf32> to vector<8x8xf32>
    %251 = arith.subf %247, %250 : vector<8x8xf32>
    %252 = math.exp %251 : vector<8x8xf32>
    %cst_95 = arith.constant dense<0.000000e+00> : vector<8xf32>
    %253 = vector.multi_reduction <add>, %252, %cst_95 [1] : vector<8x8xf32> to vector<8xf32>
    %254 = vector.shape_cast %253 : vector<8xf32> to vector<8x1xf32>
    %255 = vector.broadcast %254 : vector<8x1xf32> to vector<8x8xf32>
    %256 = arith.divf %252, %255 : vector<8x8xf32>
    %cst_96 = arith.constant dense<0.000000e+00> : vector<8x16xf32>
    %257 = tpu.matmul %256, %242, %cst_96 {dimension_numbers = #tpu.dot_dimension_numbers<[1], [0], [0], [1], [0, 0, 1, 1], [], []>} : vector<8x8xf32>, vector<8x16xf32>, vector<8x16xf32> -> vector<8x16xf32>
    %258 = vector.extract_strided_slice %239 {offsets = [0, 16], sizes = [8, 16], strides = [1, 1]} : vector<8x128xf32> to vector<8x16xf32>
    %259 = vector.extract_strided_slice %239 {offsets = [0, 48], sizes = [8, 16], strides = [1, 1]} : vector<8x128xf32> to vector<8x16xf32>
    %260 = vector.extract_strided_slice %239 {offsets = [0, 80], sizes = [8, 16], strides = [1, 1]} : vector<8x128xf32> to vector<8x16xf32>
    %cst_97 = arith.constant dense<0.000000e+00> : vector<8x8xf32>
    %261 = tpu.matmul %258, %259, %cst_97 {dimension_numbers = #tpu.dot_dimension_numbers<[1], [1], [0], [0], [0, 0, 1, 0], [], []>} : vector<8x16xf32>, vector<8x16xf32>, vector<8x8xf32> -> vector<8x8xf32>
    %cst_98 = arith.constant 2.500000e-01 : f32
    %262 = vector.broadcast %cst_98 : f32 to vector<8x8xf32>
    %263 = arith.mulf %261, %262 : vector<8x8xf32>
    %264 = vector.broadcast %25 : vector<1x8xf32> to vector<8x8xf32>
    %265 = arith.addf %263, %264 : vector<8x8xf32>
    %cst_99 = arith.constant dense<0xFF800000> : vector<8xf32>
    %266 = vector.multi_reduction <maximumf>, %265, %cst_99 [1] : vector<8x8xf32> to vector<8xf32>
    %267 = vector.shape_cast %266 : vector<8xf32> to vector<8x1xf32>
    %268 = vector.broadcast %267 : vector<8x1xf32> to vector<8x8xf32>
    %269 = arith.subf %265, %268 : vector<8x8xf32>
    %270 = math.exp %269 : vector<8x8xf32>
    %cst_100 = arith.constant dense<0.000000e+00> : vector<8xf32>
    %271 = vector.multi_reduction <add>, %270, %cst_100 [1] : vector<8x8xf32> to vector<8xf32>
    %272 = vector.shape_cast %271 : vector<8xf32> to vector<8x1xf32>
    %273 = vector.broadcast %272 : vector<8x1xf32> to vector<8x8xf32>
    %274 = arith.divf %270, %273 : vector<8x8xf32>
    %cst_101 = arith.constant dense<0.000000e+00> : vector<8x16xf32>
    %275 = tpu.matmul %274, %260, %cst_101 {dimension_numbers = #tpu.dot_dimension_numbers<[1], [0], [0], [1], [0, 0, 1, 1], [], []>} : vector<8x8xf32>, vector<8x16xf32>, vector<8x16xf32> -> vector<8x16xf32>
    %276 = tpu.concatenate %257, %275 in 1 : vector<8x16xf32>, vector<8x16xf32> -> vector<8x32xf32>
    %277 = tpu.concatenate %238, %276 in 0 : vector<8x32xf32>, vector<8x32xf32> -> vector<16x32xf32>
    %c1_102 = arith.constant 1 : index
    %c32_103 = arith.constant 32 : index
    %c0_104 = arith.constant 0 : index
    %278 = vector.load %arg2[%c1_102, %c32_103, %c0_104] : memref<2x160x128xf32, #tpu.memory_space<vmem>>, vector<1x32x32xf32>
    %279 = vector.shape_cast %278 : vector<1x32x32xf32> to vector<32x32xf32>
    %c1_105 = arith.constant 1 : index
    %c1_106 = arith.constant 1 : index
    %c0_107 = arith.constant 0 : index
    %280 = vector.load %arg3[%c1_105, %c1_106, %c0_107] : memref<2x8x128xf32, #tpu.memory_space<vmem>>, vector<1x1x32xf32>
    %281 = vector.shape_cast %280 : vector<1x1x32xf32> to vector<1x32xf32>
    %cst_108 = arith.constant dense<0.000000e+00> : vector<16x32xf32>
    %282 = tpu.matmul %277, %279, %cst_108 {dimension_numbers = #tpu.dot_dimension_numbers<[1], [0], [0], [1], [0, 0, 1, 1], [], []>} : vector<16x32xf32>, vector<32x32xf32>, vector<16x32xf32> -> vector<16x32xf32>
    %283 = vector.broadcast %281 : vector<1x32xf32> to vector<16x32xf32>
    %284 = arith.addf %282, %283 : vector<16x32xf32>
    %285 = arith.addf %284, %193 : vector<16x32xf32>
    %c1_109 = arith.constant 1 : index
    %c2_110 = arith.constant 2 : index
    %c0_111 = arith.constant 0 : index
    %286 = vector.load %arg3[%c1_109, %c2_110, %c0_111] : memref<2x8x128xf32, #tpu.memory_space<vmem>>, vector<1x1x32xf32>
    %287 = vector.shape_cast %286 : vector<1x1x32xf32> to vector<1x32xf32>
    %c1_112 = arith.constant 1 : index
    %c3_113 = arith.constant 3 : index
    %c0_114 = arith.constant 0 : index
    %288 = vector.load %arg3[%c1_112, %c3_113, %c0_114] : memref<2x8x128xf32, #tpu.memory_space<vmem>>, vector<1x1x32xf32>
    %289 = vector.shape_cast %288 : vector<1x1x32xf32> to vector<1x32xf32>
    %cst_115 = arith.constant dense<0.000000e+00> : vector<16xf32>
    %290 = vector.multi_reduction <add>, %285, %cst_115 [1] : vector<16x32xf32> to vector<16xf32>
    %291 = vector.shape_cast %290 : vector<16xf32> to vector<16x1xf32>
    %cst_116 = arith.constant 3.200000e+01 : f32
    %292 = vector.broadcast %cst_116 : f32 to vector<16x1xf32>
    %293 = arith.divf %291, %292 : vector<16x1xf32>
    %294 = vector.broadcast %293 : vector<16x1xf32> to vector<16x32xf32>
    %295 = arith.subf %285, %294 : vector<16x32xf32>
    %296 = arith.mulf %295, %295 : vector<16x32xf32>
    %cst_117 = arith.constant dense<0.000000e+00> : vector<16xf32>
    %297 = vector.multi_reduction <add>, %296, %cst_117 [1] : vector<16x32xf32> to vector<16xf32>
    %298 = vector.shape_cast %297 : vector<16xf32> to vector<16x1xf32>
    %cst_118 = arith.constant 3.200000e+01 : f32
    %299 = vector.broadcast %cst_118 : f32 to vector<16x1xf32>
    %300 = arith.divf %298, %299 : vector<16x1xf32>
    %cst_119 = arith.constant 9.99999996E-13 : f32
    %301 = vector.broadcast %cst_119 : f32 to vector<16x1xf32>
    %302 = arith.addf %300, %301 : vector<16x1xf32>
    %303 = math.rsqrt %302 : vector<16x1xf32>
    %304 = vector.broadcast %303 : vector<16x1xf32> to vector<16x32xf32>
    %305 = arith.mulf %295, %304 : vector<16x32xf32>
    %306 = vector.broadcast %287 : vector<1x32xf32> to vector<16x32xf32>
    %307 = arith.mulf %305, %306 : vector<16x32xf32>
    %308 = vector.broadcast %289 : vector<1x32xf32> to vector<16x32xf32>
    %309 = arith.addf %307, %308 : vector<16x32xf32>
    %c1_120 = arith.constant 1 : index
    %c64_121 = arith.constant 64 : index
    %c0_122 = arith.constant 0 : index
    %310 = vector.load %arg2[%c1_120, %c64_121, %c0_122] : memref<2x160x128xf32, #tpu.memory_space<vmem>>, vector<1x32x64xf32>
    %311 = vector.shape_cast %310 : vector<1x32x64xf32> to vector<32x64xf32>
    %c1_123 = arith.constant 1 : index
    %c4_124 = arith.constant 4 : index
    %c0_125 = arith.constant 0 : index
    %312 = vector.load %arg3[%c1_123, %c4_124, %c0_125] : memref<2x8x128xf32, #tpu.memory_space<vmem>>, vector<1x1x64xf32>
    %313 = vector.shape_cast %312 : vector<1x1x64xf32> to vector<1x64xf32>
    %cst_126 = arith.constant dense<0.000000e+00> : vector<16x64xf32>
    %314 = tpu.matmul %309, %311, %cst_126 {dimension_numbers = #tpu.dot_dimension_numbers<[1], [0], [0], [1], [0, 0, 1, 1], [], []>} : vector<16x32xf32>, vector<32x64xf32>, vector<16x64xf32> -> vector<16x64xf32>
    %315 = vector.broadcast %313 : vector<1x64xf32> to vector<16x64xf32>
    %316 = arith.addf %314, %315 : vector<16x64xf32>
    %cst_127 = arith.constant 5.000000e-01 : f32
    %317 = vector.broadcast %cst_127 : f32 to vector<16x64xf32>
    %318 = arith.mulf %317, %316 : vector<16x64xf32>
    %cst_128 = arith.constant 4.471500e-02 : f32
    %319 = vector.broadcast %cst_128 : f32 to vector<16x64xf32>
    %320 = arith.mulf %319, %316 : vector<16x64xf32>
    %321 = arith.mulf %320, %316 : vector<16x64xf32>
    %322 = arith.mulf %321, %316 : vector<16x64xf32>
    %323 = arith.addf %316, %322 : vector<16x64xf32>
    %cst_129 = arith.constant 0.797884583 : f32
    %324 = vector.broadcast %cst_129 : f32 to vector<16x64xf32>
    %325 = arith.mulf %324, %323 : vector<16x64xf32>
    %326 = math.tanh %325 : vector<16x64xf32>
    %cst_130 = arith.constant 1.000000e+00 : f32
    %327 = vector.broadcast %cst_130 : f32 to vector<16x64xf32>
    %328 = arith.addf %327, %326 : vector<16x64xf32>
    %329 = arith.mulf %318, %328 : vector<16x64xf32>
    %c1_131 = arith.constant 1 : index
    %c96_132 = arith.constant 96 : index
    %c0_133 = arith.constant 0 : index
    %330 = vector.load %arg2[%c1_131, %c96_132, %c0_133] : memref<2x160x128xf32, #tpu.memory_space<vmem>>, vector<1x64x32xf32>
    %331 = vector.shape_cast %330 : vector<1x64x32xf32> to vector<64x32xf32>
    %c1_134 = arith.constant 1 : index
    %c5_135 = arith.constant 5 : index
    %c0_136 = arith.constant 0 : index
    %332 = vector.load %arg3[%c1_134, %c5_135, %c0_136] : memref<2x8x128xf32, #tpu.memory_space<vmem>>, vector<1x1x32xf32>
    %333 = vector.shape_cast %332 : vector<1x1x32xf32> to vector<1x32xf32>
    %cst_137 = arith.constant dense<0.000000e+00> : vector<16x32xf32>
    %334 = tpu.matmul %329, %331, %cst_137 {dimension_numbers = #tpu.dot_dimension_numbers<[1], [0], [0], [1], [0, 0, 1, 1], [], []>} : vector<16x64xf32>, vector<64x32xf32>, vector<16x32xf32> -> vector<16x32xf32>
    %335 = vector.broadcast %333 : vector<1x32xf32> to vector<16x32xf32>
    %336 = arith.addf %334, %335 : vector<16x32xf32>
    %337 = arith.addf %336, %309 : vector<16x32xf32>
    %c1_138 = arith.constant 1 : index
    %c6_139 = arith.constant 6 : index
    %c0_140 = arith.constant 0 : index
    %338 = vector.load %arg3[%c1_138, %c6_139, %c0_140] : memref<2x8x128xf32, #tpu.memory_space<vmem>>, vector<1x1x32xf32>
    %339 = vector.shape_cast %338 : vector<1x1x32xf32> to vector<1x32xf32>
    %c1_141 = arith.constant 1 : index
    %c7_142 = arith.constant 7 : index
    %c0_143 = arith.constant 0 : index
    %340 = vector.load %arg3[%c1_141, %c7_142, %c0_143] : memref<2x8x128xf32, #tpu.memory_space<vmem>>, vector<1x1x32xf32>
    %341 = vector.shape_cast %340 : vector<1x1x32xf32> to vector<1x32xf32>
    %cst_144 = arith.constant dense<0.000000e+00> : vector<16xf32>
    %342 = vector.multi_reduction <add>, %337, %cst_144 [1] : vector<16x32xf32> to vector<16xf32>
    %343 = vector.shape_cast %342 : vector<16xf32> to vector<16x1xf32>
    %cst_145 = arith.constant 3.200000e+01 : f32
    %344 = vector.broadcast %cst_145 : f32 to vector<16x1xf32>
    %345 = arith.divf %343, %344 : vector<16x1xf32>
    %346 = vector.broadcast %345 : vector<16x1xf32> to vector<16x32xf32>
    %347 = arith.subf %337, %346 : vector<16x32xf32>
    %348 = arith.mulf %347, %347 : vector<16x32xf32>
    %cst_146 = arith.constant dense<0.000000e+00> : vector<16xf32>
    %349 = vector.multi_reduction <add>, %348, %cst_146 [1] : vector<16x32xf32> to vector<16xf32>
    %350 = vector.shape_cast %349 : vector<16xf32> to vector<16x1xf32>
    %cst_147 = arith.constant 3.200000e+01 : f32
    %351 = vector.broadcast %cst_147 : f32 to vector<16x1xf32>
    %352 = arith.divf %350, %351 : vector<16x1xf32>
    %cst_148 = arith.constant 9.99999996E-13 : f32
    %353 = vector.broadcast %cst_148 : f32 to vector<16x1xf32>
    %354 = arith.addf %352, %353 : vector<16x1xf32>
    %355 = math.rsqrt %354 : vector<16x1xf32>
    %356 = vector.broadcast %355 : vector<16x1xf32> to vector<16x32xf32>
    %357 = arith.mulf %347, %356 : vector<16x32xf32>
    %358 = vector.broadcast %339 : vector<1x32xf32> to vector<16x32xf32>
    %359 = arith.mulf %357, %358 : vector<16x32xf32>
    %360 = vector.broadcast %341 : vector<1x32xf32> to vector<16x32xf32>
    %361 = arith.addf %359, %360 : vector<16x32xf32>
    %c0_149 = arith.constant 0 : index
    %c0_150 = arith.constant 0 : index
    %362 = vector.load %arg5[%c0_149, %c0_150] : memref<16x32xf32, #tpu.memory_space<vmem>>, vector<16x32xf32>
    tpu.vector_store %arg5[%c0_149, %c0_150], %361 {strides = array<i32>} : memref<16x32xf32, #tpu.memory_space<vmem>>, vector<16x32xf32>,
    %c16 = arith.constant 16 : index
    %c0_151 = arith.constant 0 : index
    %363 = vector.load %arg4[%c16, %c0_151] : memref<48x128xf32, #tpu.memory_space<vmem>>, vector<32x128xf32>
    %cst_152 = arith.constant dense<0.000000e+00> : vector<16x128xf32>
    %364 = tpu.matmul %361, %363, %cst_152 {dimension_numbers = #tpu.dot_dimension_numbers<[1], [0], [0], [1], [0, 0, 1, 1], [], []>} : vector<16x32xf32>, vector<32x128xf32>, vector<16x128xf32> -> vector<16x128xf32>
    %365 = vector.extract_strided_slice %364 {offsets = [0, 0], sizes = [16, 5], strides = [1, 1]} : vector<16x128xf32> to vector<16x5xf32>
    %c3_153 = arith.constant 3 : index
    %c0_154 = arith.constant 0 : index
    %366 = vector.load %arg4[%c3_153, %c0_154] : memref<48x128xf32, #tpu.memory_space<vmem>>, vector<1x5xf32>
    %367 = vector.broadcast %366 : vector<1x5xf32> to vector<16x5xf32>
    %368 = arith.addf %365, %367 : vector<16x5xf32>
    %369 = vector.extract_strided_slice %364 {offsets = [0, 5], sizes = [1, 32], strides = [1, 1]} : vector<16x128xf32> to vector<1x32xf32>
    %370 = vector.extract_strided_slice %364 {offsets = [8, 5], sizes = [1, 32], strides = [1, 1]} : vector<16x128xf32> to vector<1x32xf32>
    %371 = tpu.concatenate %369, %370 in 0 : vector<1x32xf32>, vector<1x32xf32> -> vector<2x32xf32>
    %c2_155 = arith.constant 2 : index
    %c0_156 = arith.constant 0 : index
    %372 = vector.load %arg4[%c2_155, %c0_156] : memref<48x128xf32, #tpu.memory_space<vmem>>, vector<1x32xf32>
    %373 = vector.broadcast %372 : vector<1x32xf32> to vector<2x32xf32>
    %374 = arith.addf %371, %373 : vector<2x32xf32>
    %375 = math.tanh %374 : vector<2x32xf32>
    %c0_157 = arith.constant 0 : index
    %c0_158 = arith.constant 0 : index
    %376 = vector.load %arg6[%c0_157, %c0_158] : memref<2x32xf32, #tpu.memory_space<vmem>>, vector<2x32xf32>
    tpu.vector_store %arg6[%c0_157, %c0_158], %375 {strides = array<i32>} : memref<2x32xf32, #tpu.memory_space<vmem>>, vector<2x32xf32>,
    %c4_159 = arith.constant 4 : index
    %c0_160 = arith.constant 0 : index
    %377 = vector.load %arg4[%c4_159, %c0_160] : memref<48x128xf32, #tpu.memory_space<vmem>>, vector<1x5xf32>
    %c5_161 = arith.constant 5 : index
    %c0_162 = arith.constant 0 : index
    %378 = vector.load %arg4[%c5_161, %c0_162] : memref<48x128xf32, #tpu.memory_space<vmem>>, vector<1x5xf32>
    %c6_163 = arith.constant 6 : index
    %c0_164 = arith.constant 0 : index
    %379 = vector.load %arg4[%c6_163, %c0_164] : memref<48x128xf32, #tpu.memory_space<vmem>>, vector<5x5xf32>
    %380 = vector.extract_strided_slice %368 {offsets = [0, 0], sizes = [1, 5], strides = [1, 1]} : vector<16x5xf32> to vector<1x5xf32>
    %381 = vector.extract_strided_slice %368 {offsets = [8, 0], sizes = [1, 5], strides = [1, 1]} : vector<16x5xf32> to vector<1x5xf32>
    %382 = tpu.concatenate %380, %381 in 0 : vector<1x5xf32>, vector<1x5xf32> -> vector<2x5xf32>
    %383 = vector.broadcast %377 : vector<1x5xf32> to vector<2x5xf32>
    %384 = arith.addf %383, %382 : vector<2x5xf32>
    %385 = vector.shape_cast %384 : vector<2x5xf32> to vector<2x1x5xf32>
    %386 = vector.shape_cast %379 : vector<5x5xf32> to vector<1x5x5xf32>
    %387 = vector.broadcast %385 : vector<2x1x5xf32> to vector<2x5x5xf32>
    %388 = vector.broadcast %386 : vector<1x5x5xf32> to vector<2x5x5xf32>
    %389 = arith.addf %387, %388 : vector<2x5x5xf32>
    %cst_165 = arith.constant dense<0xFF800000> : vector<2x5xf32>
    %390 = vector.multi_reduction <maximumf>, %389, %cst_165 [2] : vector<2x5x5xf32> to vector<2x5xf32>
    %391 = tpu.iota {dimensions = array<i32: 2>} : vector<2x5x5xi32>
    %392 = vector.shape_cast %390 : vector<2x5xf32> to vector<2x5x1xf32>
    %393 = vector.broadcast %392 : vector<2x5x1xf32> to vector<2x5x5xf32>
    %394 = arith.cmpf oeq, %389, %393 : vector<2x5x5xf32>
    %c1000000000_i32 = arith.constant 1000000000 : i32
    %395 = vector.broadcast %c1000000000_i32 : i32 to vector<2x5x5xi32>
    %396 = arith.select %394, %391, %395 : vector<2x5x5xi1>, vector<2x5x5xi32>
    %cst_166 = arith.constant dense<2147483647> : vector<2x5xi32>
    %397 = vector.multi_reduction <minsi>, %396, %cst_166 [2] : vector<2x5x5xi32> to vector<2x5xi32>
    %398 = vector.extract_strided_slice %368 {offsets = [1, 0], sizes = [1, 5], strides = [1, 1]} : vector<16x5xf32> to vector<1x5xf32>
    %399 = vector.extract_strided_slice %368 {offsets = [9, 0], sizes = [1, 5], strides = [1, 1]} : vector<16x5xf32> to vector<1x5xf32>
    %400 = tpu.concatenate %398, %399 in 0 : vector<1x5xf32>, vector<1x5xf32> -> vector<2x5xf32>
    %401 = arith.addf %390, %400 : vector<2x5xf32>
    %402 = vector.shape_cast %401 : vector<2x5xf32> to vector<2x1x5xf32>
    %403 = vector.shape_cast %379 : vector<5x5xf32> to vector<1x5x5xf32>
    %404 = vector.broadcast %402 : vector<2x1x5xf32> to vector<2x5x5xf32>
    %405 = vector.broadcast %403 : vector<1x5x5xf32> to vector<2x5x5xf32>
    %406 = arith.addf %404, %405 : vector<2x5x5xf32>
    %cst_167 = arith.constant dense<0xFF800000> : vector<2x5xf32>
    %407 = vector.multi_reduction <maximumf>, %406, %cst_167 [2] : vector<2x5x5xf32> to vector<2x5xf32>
    %408 = tpu.iota {dimensions = array<i32: 2>} : vector<2x5x5xi32>
    %409 = vector.shape_cast %407 : vector<2x5xf32> to vector<2x5x1xf32>
    %410 = vector.broadcast %409 : vector<2x5x1xf32> to vector<2x5x5xf32>
    %411 = arith.cmpf oeq, %406, %410 : vector<2x5x5xf32>
    %c1000000000_i32_168 = arith.constant 1000000000 : i32
    %412 = vector.broadcast %c1000000000_i32_168 : i32 to vector<2x5x5xi32>
    %413 = arith.select %411, %408, %412 : vector<2x5x5xi1>, vector<2x5x5xi32>
    %cst_169 = arith.constant dense<2147483647> : vector<2x5xi32>
    %414 = vector.multi_reduction <minsi>, %413, %cst_169 [2] : vector<2x5x5xi32> to vector<2x5xi32>
    %415 = vector.extract_strided_slice %368 {offsets = [2, 0], sizes = [1, 5], strides = [1, 1]} : vector<16x5xf32> to vector<1x5xf32>
    %416 = vector.extract_strided_slice %368 {offsets = [10, 0], sizes = [1, 5], strides = [1, 1]} : vector<16x5xf32> to vector<1x5xf32>
    %417 = tpu.concatenate %415, %416 in 0 : vector<1x5xf32>, vector<1x5xf32> -> vector<2x5xf32>
    %418 = arith.addf %407, %417 : vector<2x5xf32>
    %419 = vector.shape_cast %418 : vector<2x5xf32> to vector<2x1x5xf32>
    %420 = vector.shape_cast %379 : vector<5x5xf32> to vector<1x5x5xf32>
    %421 = vector.broadcast %419 : vector<2x1x5xf32> to vector<2x5x5xf32>
    %422 = vector.broadcast %420 : vector<1x5x5xf32> to vector<2x5x5xf32>
    %423 = arith.addf %421, %422 : vector<2x5x5xf32>
    %cst_170 = arith.constant dense<0xFF800000> : vector<2x5xf32>
    %424 = vector.multi_reduction <maximumf>, %423, %cst_170 [2] : vector<2x5x5xf32> to vector<2x5xf32>
    %425 = tpu.iota {dimensions = array<i32: 2>} : vector<2x5x5xi32>
    %426 = vector.shape_cast %424 : vector<2x5xf32> to vector<2x5x1xf32>
    %427 = vector.broadcast %426 : vector<2x5x1xf32> to vector<2x5x5xf32>
    %428 = arith.cmpf oeq, %423, %427 : vector<2x5x5xf32>
    %c1000000000_i32_171 = arith.constant 1000000000 : i32
    %429 = vector.broadcast %c1000000000_i32_171 : i32 to vector<2x5x5xi32>
    %430 = arith.select %428, %425, %429 : vector<2x5x5xi1>, vector<2x5x5xi32>
    %cst_172 = arith.constant dense<2147483647> : vector<2x5xi32>
    %431 = vector.multi_reduction <minsi>, %430, %cst_172 [2] : vector<2x5x5xi32> to vector<2x5xi32>
    %432 = vector.extract_strided_slice %368 {offsets = [3, 0], sizes = [1, 5], strides = [1, 1]} : vector<16x5xf32> to vector<1x5xf32>
    %433 = vector.extract_strided_slice %368 {offsets = [11, 0], sizes = [1, 5], strides = [1, 1]} : vector<16x5xf32> to vector<1x5xf32>
    %434 = tpu.concatenate %432, %433 in 0 : vector<1x5xf32>, vector<1x5xf32> -> vector<2x5xf32>
    %435 = arith.addf %424, %434 : vector<2x5xf32>
    %436 = vector.shape_cast %435 : vector<2x5xf32> to vector<2x1x5xf32>
    %437 = vector.shape_cast %379 : vector<5x5xf32> to vector<1x5x5xf32>
    %438 = vector.broadcast %436 : vector<2x1x5xf32> to vector<2x5x5xf32>
    %439 = vector.broadcast %437 : vector<1x5x5xf32> to vector<2x5x5xf32>
    %440 = arith.addf %438, %439 : vector<2x5x5xf32>
    %cst_173 = arith.constant dense<0xFF800000> : vector<2x5xf32>
    %441 = vector.multi_reduction <maximumf>, %440, %cst_173 [2] : vector<2x5x5xf32> to vector<2x5xf32>
    %442 = tpu.iota {dimensions = array<i32: 2>} : vector<2x5x5xi32>
    %443 = vector.shape_cast %441 : vector<2x5xf32> to vector<2x5x1xf32>
    %444 = vector.broadcast %443 : vector<2x5x1xf32> to vector<2x5x5xf32>
    %445 = arith.cmpf oeq, %440, %444 : vector<2x5x5xf32>
    %c1000000000_i32_174 = arith.constant 1000000000 : i32
    %446 = vector.broadcast %c1000000000_i32_174 : i32 to vector<2x5x5xi32>
    %447 = arith.select %445, %442, %446 : vector<2x5x5xi1>, vector<2x5x5xi32>
    %cst_175 = arith.constant dense<2147483647> : vector<2x5xi32>
    %448 = vector.multi_reduction <minsi>, %447, %cst_175 [2] : vector<2x5x5xi32> to vector<2x5xi32>
    %449 = vector.extract_strided_slice %368 {offsets = [4, 0], sizes = [1, 5], strides = [1, 1]} : vector<16x5xf32> to vector<1x5xf32>
    %450 = vector.extract_strided_slice %368 {offsets = [12, 0], sizes = [1, 5], strides = [1, 1]} : vector<16x5xf32> to vector<1x5xf32>
    %451 = tpu.concatenate %449, %450 in 0 : vector<1x5xf32>, vector<1x5xf32> -> vector<2x5xf32>
    %452 = arith.addf %441, %451 : vector<2x5xf32>
    %453 = vector.shape_cast %452 : vector<2x5xf32> to vector<2x1x5xf32>
    %454 = vector.shape_cast %379 : vector<5x5xf32> to vector<1x5x5xf32>
    %455 = vector.broadcast %453 : vector<2x1x5xf32> to vector<2x5x5xf32>
    %456 = vector.broadcast %454 : vector<1x5x5xf32> to vector<2x5x5xf32>
    %457 = arith.addf %455, %456 : vector<2x5x5xf32>
    %cst_176 = arith.constant dense<0xFF800000> : vector<2x5xf32>
    %458 = vector.multi_reduction <maximumf>, %457, %cst_176 [2] : vector<2x5x5xf32> to vector<2x5xf32>
    %459 = tpu.iota {dimensions = array<i32: 2>} : vector<2x5x5xi32>
    %460 = vector.shape_cast %458 : vector<2x5xf32> to vector<2x5x1xf32>
    %461 = vector.broadcast %460 : vector<2x5x1xf32> to vector<2x5x5xf32>
    %462 = arith.cmpf oeq, %457, %461 : vector<2x5x5xf32>
    %c1000000000_i32_177 = arith.constant 1000000000 : i32
    %463 = vector.broadcast %c1000000000_i32_177 : i32 to vector<2x5x5xi32>
    %464 = arith.select %462, %459, %463 : vector<2x5x5xi1>, vector<2x5x5xi32>
    %cst_178 = arith.constant dense<2147483647> : vector<2x5xi32>
    %465 = vector.multi_reduction <minsi>, %464, %cst_178 [2] : vector<2x5x5xi32> to vector<2x5xi32>
    %466 = vector.extract_strided_slice %368 {offsets = [5, 0], sizes = [1, 5], strides = [1, 1]} : vector<16x5xf32> to vector<1x5xf32>
    %467 = vector.extract_strided_slice %368 {offsets = [13, 0], sizes = [1, 5], strides = [1, 1]} : vector<16x5xf32> to vector<1x5xf32>
    %468 = tpu.concatenate %466, %467 in 0 : vector<1x5xf32>, vector<1x5xf32> -> vector<2x5xf32>
    %469 = arith.addf %458, %468 : vector<2x5xf32>
    %470 = vector.shape_cast %469 : vector<2x5xf32> to vector<2x1x5xf32>
    %471 = vector.shape_cast %379 : vector<5x5xf32> to vector<1x5x5xf32>
    %472 = vector.broadcast %470 : vector<2x1x5xf32> to vector<2x5x5xf32>
    %473 = vector.broadcast %471 : vector<1x5x5xf32> to vector<2x5x5xf32>
    %474 = arith.addf %472, %473 : vector<2x5x5xf32>
    %cst_179 = arith.constant dense<0xFF800000> : vector<2x5xf32>
    %475 = vector.multi_reduction <maximumf>, %474, %cst_179 [2] : vector<2x5x5xf32> to vector<2x5xf32>
    %476 = tpu.iota {dimensions = array<i32: 2>} : vector<2x5x5xi32>
    %477 = vector.shape_cast %475 : vector<2x5xf32> to vector<2x5x1xf32>
    %478 = vector.broadcast %477 : vector<2x5x1xf32> to vector<2x5x5xf32>
    %479 = arith.cmpf oeq, %474, %478 : vector<2x5x5xf32>
    %c1000000000_i32_180 = arith.constant 1000000000 : i32
    %480 = vector.broadcast %c1000000000_i32_180 : i32 to vector<2x5x5xi32>
    %481 = arith.select %479, %476, %480 : vector<2x5x5xi1>, vector<2x5x5xi32>
    %cst_181 = arith.constant dense<2147483647> : vector<2x5xi32>
    %482 = vector.multi_reduction <minsi>, %481, %cst_181 [2] : vector<2x5x5xi32> to vector<2x5xi32>
    %483 = vector.extract_strided_slice %368 {offsets = [6, 0], sizes = [1, 5], strides = [1, 1]} : vector<16x5xf32> to vector<1x5xf32>
    %484 = vector.extract_strided_slice %368 {offsets = [14, 0], sizes = [1, 5], strides = [1, 1]} : vector<16x5xf32> to vector<1x5xf32>
    %485 = tpu.concatenate %483, %484 in 0 : vector<1x5xf32>, vector<1x5xf32> -> vector<2x5xf32>
    %486 = arith.addf %475, %485 : vector<2x5xf32>
    %487 = vector.shape_cast %486 : vector<2x5xf32> to vector<2x1x5xf32>
    %488 = vector.shape_cast %379 : vector<5x5xf32> to vector<1x5x5xf32>
    %489 = vector.broadcast %487 : vector<2x1x5xf32> to vector<2x5x5xf32>
    %490 = vector.broadcast %488 : vector<1x5x5xf32> to vector<2x5x5xf32>
    %491 = arith.addf %489, %490 : vector<2x5x5xf32>
    %cst_182 = arith.constant dense<0xFF800000> : vector<2x5xf32>
    %492 = vector.multi_reduction <maximumf>, %491, %cst_182 [2] : vector<2x5x5xf32> to vector<2x5xf32>
    %493 = tpu.iota {dimensions = array<i32: 2>} : vector<2x5x5xi32>
    %494 = vector.shape_cast %492 : vector<2x5xf32> to vector<2x5x1xf32>
    %495 = vector.broadcast %494 : vector<2x5x1xf32> to vector<2x5x5xf32>
    %496 = arith.cmpf oeq, %491, %495 : vector<2x5x5xf32>
    %c1000000000_i32_183 = arith.constant 1000000000 : i32
    %497 = vector.broadcast %c1000000000_i32_183 : i32 to vector<2x5x5xi32>
    %498 = arith.select %496, %493, %497 : vector<2x5x5xi1>, vector<2x5x5xi32>
    %cst_184 = arith.constant dense<2147483647> : vector<2x5xi32>
    %499 = vector.multi_reduction <minsi>, %498, %cst_184 [2] : vector<2x5x5xi32> to vector<2x5xi32>
    %500 = vector.extract_strided_slice %368 {offsets = [7, 0], sizes = [1, 5], strides = [1, 1]} : vector<16x5xf32> to vector<1x5xf32>
    %501 = vector.extract_strided_slice %368 {offsets = [15, 0], sizes = [1, 5], strides = [1, 1]} : vector<16x5xf32> to vector<1x5xf32>
    %502 = tpu.concatenate %500, %501 in 0 : vector<1x5xf32>, vector<1x5xf32> -> vector<2x5xf32>
    %503 = arith.addf %492, %502 : vector<2x5xf32>
    %504 = vector.broadcast %378 : vector<1x5xf32> to vector<2x5xf32>
    %505 = arith.addf %503, %504 : vector<2x5xf32>
    %cst_185 = arith.constant dense<0xFF800000> : vector<2xf32>
    %506 = vector.multi_reduction <maximumf>, %505, %cst_185 [1] : vector<2x5xf32> to vector<2xf32>
    %507 = vector.shape_cast %506 : vector<2xf32> to vector<2x1xf32>
    %508 = tpu.iota {dimensions = array<i32: 1>} : vector<2x5xi32>
    %509 = vector.broadcast %507 : vector<2x1xf32> to vector<2x5xf32>
    %510 = arith.cmpf oeq, %505, %509 : vector<2x5xf32>
    %c1000000000_i32_186 = arith.constant 1000000000 : i32
    %511 = vector.broadcast %c1000000000_i32_186 : i32 to vector<2x5xi32>
    %512 = arith.select %510, %508, %511 : vector<2x5xi1>, vector<2x5xi32>
    %cst_187 = arith.constant dense<2147483647> : vector<2xi32>
    %513 = vector.multi_reduction <minsi>, %512, %cst_187 [1] : vector<2x5xi32> to vector<2xi32>
    %514 = vector.shape_cast %513 : vector<2xi32> to vector<2x1xi32>
    %515 = tpu.iota {dimensions = array<i32: 1>} : vector<2x8xi32>
    %c7_i32 = arith.constant 7 : i32
    %516 = vector.broadcast %c7_i32 : i32 to vector<2x8xi32>
    %517 = arith.cmpi eq, %515, %516 : vector<2x8xi32>
    %c0_i32 = arith.constant 0 : i32
    %518 = vector.shape_cast %514 : vector<2x1xi32> to vector<2x1xi32>
    %519 = vector.broadcast %518 : vector<2x1xi32> to vector<2x8xi32>
    %520 = vector.broadcast %c0_i32 : i32 to vector<2x8xi32>
    %521 = arith.select %517, %519, %520 : vector<2x8xi1>, vector<2x8xi32>
    %522 = tpu.iota {dimensions = array<i32: 1>} : vector<2x5xi32>
    %523 = vector.broadcast %514 : vector<2x1xi32> to vector<2x5xi32>
    %524 = arith.cmpi eq, %522, %523 : vector<2x5xi32>
    %c0_i32_188 = arith.constant 0 : i32
    %525 = vector.broadcast %c0_i32_188 : i32 to vector<2x5xi32>
    %526 = arith.select %524, %499, %525 : vector<2x5xi1>, vector<2x5xi32>
    %cst_189 = arith.constant dense<0> : vector<2xi32>
    %527 = vector.multi_reduction <add>, %526, %cst_189 [1] : vector<2x5xi32> to vector<2xi32>
    %528 = vector.shape_cast %527 : vector<2xi32> to vector<2x1xi32>
    %c6_i32 = arith.constant 6 : i32
    %529 = vector.broadcast %c6_i32 : i32 to vector<2x8xi32>
    %530 = arith.cmpi eq, %515, %529 : vector<2x8xi32>
    %531 = vector.shape_cast %528 : vector<2x1xi32> to vector<2x1xi32>
    %532 = vector.broadcast %531 : vector<2x1xi32> to vector<2x8xi32>
    %533 = arith.select %530, %532, %521 : vector<2x8xi1>, vector<2x8xi32>
    %534 = vector.broadcast %528 : vector<2x1xi32> to vector<2x5xi32>
    %535 = arith.cmpi eq, %522, %534 : vector<2x5xi32>
    %c0_i32_190 = arith.constant 0 : i32
    %536 = vector.broadcast %c0_i32_190 : i32 to vector<2x5xi32>
    %537 = arith.select %535, %482, %536 : vector<2x5xi1>, vector<2x5xi32>
    %cst_191 = arith.constant dense<0> : vector<2xi32>
    %538 = vector.multi_reduction <add>, %537, %cst_191 [1] : vector<2x5xi32> to vector<2xi32>
    %539 = vector.shape_cast %538 : vector<2xi32> to vector<2x1xi32>
    %c5_i32 = arith.constant 5 : i32
    %540 = vector.broadcast %c5_i32 : i32 to vector<2x8xi32>
    %541 = arith.cmpi eq, %515, %540 : vector<2x8xi32>
    %542 = vector.shape_cast %539 : vector<2x1xi32> to vector<2x1xi32>
    %543 = vector.broadcast %542 : vector<2x1xi32> to vector<2x8xi32>
    %544 = arith.select %541, %543, %533 : vector<2x8xi1>, vector<2x8xi32>
    %545 = vector.broadcast %539 : vector<2x1xi32> to vector<2x5xi32>
    %546 = arith.cmpi eq, %522, %545 : vector<2x5xi32>
    %c0_i32_192 = arith.constant 0 : i32
    %547 = vector.broadcast %c0_i32_192 : i32 to vector<2x5xi32>
    %548 = arith.select %546, %465, %547 : vector<2x5xi1>, vector<2x5xi32>
    %cst_193 = arith.constant dense<0> : vector<2xi32>
    %549 = vector.multi_reduction <add>, %548, %cst_193 [1] : vector<2x5xi32> to vector<2xi32>
    %550 = vector.shape_cast %549 : vector<2xi32> to vector<2x1xi32>
    %c4_i32 = arith.constant 4 : i32
    %551 = vector.broadcast %c4_i32 : i32 to vector<2x8xi32>
    %552 = arith.cmpi eq, %515, %551 : vector<2x8xi32>
    %553 = vector.shape_cast %550 : vector<2x1xi32> to vector<2x1xi32>
    %554 = vector.broadcast %553 : vector<2x1xi32> to vector<2x8xi32>
    %555 = arith.select %552, %554, %544 : vector<2x8xi1>, vector<2x8xi32>
    %556 = vector.broadcast %550 : vector<2x1xi32> to vector<2x5xi32>
    %557 = arith.cmpi eq, %522, %556 : vector<2x5xi32>
    %c0_i32_194 = arith.constant 0 : i32
    %558 = vector.broadcast %c0_i32_194 : i32 to vector<2x5xi32>
    %559 = arith.select %557, %448, %558 : vector<2x5xi1>, vector<2x5xi32>
    %cst_195 = arith.constant dense<0> : vector<2xi32>
    %560 = vector.multi_reduction <add>, %559, %cst_195 [1] : vector<2x5xi32> to vector<2xi32>
    %561 = vector.shape_cast %560 : vector<2xi32> to vector<2x1xi32>
    %c3_i32 = arith.constant 3 : i32
    %562 = vector.broadcast %c3_i32 : i32 to vector<2x8xi32>
    %563 = arith.cmpi eq, %515, %562 : vector<2x8xi32>
    %564 = vector.shape_cast %561 : vector<2x1xi32> to vector<2x1xi32>
    %565 = vector.broadcast %564 : vector<2x1xi32> to vector<2x8xi32>
    %566 = arith.select %563, %565, %555 : vector<2x8xi1>, vector<2x8xi32>
    %567 = vector.broadcast %561 : vector<2x1xi32> to vector<2x5xi32>
    %568 = arith.cmpi eq, %522, %567 : vector<2x5xi32>
    %c0_i32_196 = arith.constant 0 : i32
    %569 = vector.broadcast %c0_i32_196 : i32 to vector<2x5xi32>
    %570 = arith.select %568, %431, %569 : vector<2x5xi1>, vector<2x5xi32>
    %cst_197 = arith.constant dense<0> : vector<2xi32>
    %571 = vector.multi_reduction <add>, %570, %cst_197 [1] : vector<2x5xi32> to vector<2xi32>
    %572 = vector.shape_cast %571 : vector<2xi32> to vector<2x1xi32>
    %c2_i32 = arith.constant 2 : i32
    %573 = vector.broadcast %c2_i32 : i32 to vector<2x8xi32>
    %574 = arith.cmpi eq, %515, %573 : vector<2x8xi32>
    %575 = vector.shape_cast %572 : vector<2x1xi32> to vector<2x1xi32>
    %576 = vector.broadcast %575 : vector<2x1xi32> to vector<2x8xi32>
    %577 = arith.select %574, %576, %566 : vector<2x8xi1>, vector<2x8xi32>
    %578 = vector.broadcast %572 : vector<2x1xi32> to vector<2x5xi32>
    %579 = arith.cmpi eq, %522, %578 : vector<2x5xi32>
    %c0_i32_198 = arith.constant 0 : i32
    %580 = vector.broadcast %c0_i32_198 : i32 to vector<2x5xi32>
    %581 = arith.select %579, %414, %580 : vector<2x5xi1>, vector<2x5xi32>
    %cst_199 = arith.constant dense<0> : vector<2xi32>
    %582 = vector.multi_reduction <add>, %581, %cst_199 [1] : vector<2x5xi32> to vector<2xi32>
    %583 = vector.shape_cast %582 : vector<2xi32> to vector<2x1xi32>
    %c1_i32 = arith.constant 1 : i32
    %584 = vector.broadcast %c1_i32 : i32 to vector<2x8xi32>
    %585 = arith.cmpi eq, %515, %584 : vector<2x8xi32>
    %586 = vector.shape_cast %583 : vector<2x1xi32> to vector<2x1xi32>
    %587 = vector.broadcast %586 : vector<2x1xi32> to vector<2x8xi32>
    %588 = arith.select %585, %587, %577 : vector<2x8xi1>, vector<2x8xi32>
    %589 = vector.broadcast %583 : vector<2x1xi32> to vector<2x5xi32>
    %590 = arith.cmpi eq, %522, %589 : vector<2x5xi32>
    %c0_i32_200 = arith.constant 0 : i32
    %591 = vector.broadcast %c0_i32_200 : i32 to vector<2x5xi32>
    %592 = arith.select %590, %397, %591 : vector<2x5xi1>, vector<2x5xi32>
    %cst_201 = arith.constant dense<0> : vector<2xi32>
    %593 = vector.multi_reduction <add>, %592, %cst_201 [1] : vector<2x5xi32> to vector<2xi32>
    %594 = vector.shape_cast %593 : vector<2xi32> to vector<2x1xi32>
    %c0_i32_202 = arith.constant 0 : i32
    %595 = vector.broadcast %c0_i32_202 : i32 to vector<2x8xi32>
    %596 = arith.cmpi eq, %515, %595 : vector<2x8xi32>
    %597 = vector.shape_cast %594 : vector<2x1xi32> to vector<2x1xi32>
    %598 = vector.broadcast %597 : vector<2x1xi32> to vector<2x8xi32>
    %599 = arith.select %596, %598, %588 : vector<2x8xi1>, vector<2x8xi32>
    %c0_203 = arith.constant 0 : index
    %c0_204 = arith.constant 0 : index
    %600 = vector.load %arg7[%c0_203, %c0_204] : memref<2x8xi32, #tpu.memory_space<vmem>>, vector<2x8xi32>
    tpu.vector_store %arg7[%c0_203, %c0_204], %599 {strides = array<i32>} : memref<2x8xi32, #tpu.memory_space<vmem>>, vector<2x8xi32>,
    return
  }
}

</mosaic_0001>

<bundles_post_ra>
// kernel: kobert_crf_forward.1
= control target key start
LH: loop header
LB: loop body
LE: loop exit
PB: predicated region body
PF: predicated region fallthrough
CT: control target
= control target key end

     0   :  { %13 = vsyncpa [#allocation3], 0  ;;  %vm29_vm0 = vcmask 261120   ;;  %s4707_s0 = inlined_call_operand.vmem [shape: f32[16,32], index: 0, kind: input, shape index: {}]   ;;  %s4708_s1 = inlined_call_operand.vmem [shape: f32[2,8], index: 1, kind: input, shape index: {}]   ;;  %s4709_s2 = inlined_call_operand.vmem [shape: f32[2,160,128], index: 2, kind: input, shape index: {}]   ;;  %s4710_s3 = inlined_call_operand.vmem [shape: f32[2,8,128], index: 3, kind: input, shape index: {}]   ;;  %s4711_s4 = inlined_call_operand.vmem [shape: f32[48,128], index: 4, kind: input, shape index: {}]   ;;  %s4712_s5 = inlined_call_operand.hbm [shape: f32[16,32], index: 5, kind: output, shape index: {0}]   ;;  %s4713_s6 = inlined_call_operand.hbm [shape: f32[2,32], index: 6, kind: output, shape index: {1}]   ;;  %s4714_s7 = inlined_call_operand.hbm [shape: s32[2,8], index: 7, kind: output, shape index: {2}]  }
   0x1   :  { %v25_v0 = vld [vmem:[%s4707_s0] sm:$0xff]  ;;  %v26_v1 = vld [vmem:[%s4707_s0 + $0x8] sm:$0xff] }
   0x2   :  { %v30_v2 = vsel %vm29_vm0, %v25_v0, 0.0  ;;  %v33_v3 = vsel %vm29_vm0, %v26_v1, 0.0 }
   0x3   :  { %31 = vadd.xlane.f32.xlu0 %v30_v2  ;;  %34 = vadd.xlane.f32.xlu1 %v33_v3 }
   0x4   :  { %14 = vsyncpa [#allocation5], 0  ;;  %v3315_v4 = vmov 32.0   ;;  %v91_v21 = vld [vmem:[%s4709_s2 + $0x18] sm:$0xff]  ;;  %v90_v22 = vld [vmem:[%s4709_s2 + $0x10] sm:$0xff]  ;;  %s3316_s18 = smov 112  }
   0x5   :  { %3175 = vrcp.f32 %v3315_v4  ;;  %112 = vmatpush.msra.mxu0 %v91_v21  ;;  %v89_v23 = vld [vmem:[%s4709_s2 + $0x8] sm:$0xff]  ;;  %v88_v24 = vld [vmem:[%s4709_s2] sm:$0xff]  ;;  %s3317_s19 = smov 96   ;;  %s3318_s20 = smov 80   ;;  %vm126_vm8 = vcmask 130048   ;;  %vm154_vm9 = vcmask 64512  }
   0x6   :  { %v3153_v42 = vld [vmem:[%s4711_s4] ss:$0 sm:$0xff]  ;;  %v3154_v46 = vld [vmem:[%s4711_s4 + $0x1] ss:$0 sm:$0xff]  ;;  %s3320_s23 = smov 48   ;;  %s3321_s24 = smov 16  }
   0x7   :  { %113 = vmatpush.msra.mxu0 %v90_v22  ;;  %v3155_v53 = vld [vmem:[%s4710_s3] ss:$0 sm:$0xff]  ;;  %s3322_s25 = smov 5   ;;  %s3323_s28 = smov 123  }
   0x8   :  { %v87_v60 = vld [vmem:[%s4708_s1] sm:$0x3]  ;;  %s3319_s1 = smov 64   ;;  %s3325_s9 = smov [#allocation4]  }
   0x9   :  { %114 = vmatpush.msra.mxu0 %v89_v23  ;;  %v3425_v61 = vperm.slane %v87_v60, 0  ;;  %s3025_s10 = sshll.u32 %s3325_s9, 4  ;;  %s3326_s11 = smov [#allocation2]   ;;  %s3026_s10 = int_to_ptr.vmem [resolvable:$true] %s3025_s10 }
   0xa   :  { %s3011_s12 = sshll.u32 %s3326_s11, 4  ;;  %s3327_s15 = smov 128   ;;  %s3012_s12 = int_to_ptr.vmem [resolvable:$true] %s3011_s12 }
   0xb   :  { %v3176_v5 = vpop.eup %3175  ;;  %115 = vmatpush.msra.mxu0 %v88_v24  ;;  %s3328_s16 = smov 8   ;;  %s3329_s17 = smov [#allocation6]  }
   0xc   :  { %v37_v6 = vmul.f32 32.0, %v3176_v5  ;;  %vm41_vm1 = vweird.f32 %v3176_v5  ;;  %s3036_s21 = sshll.u32 %s3329_s17, 4  ;;  %s3037_s21 = int_to_ptr.vmem [resolvable:$true] %s3036_s21 }
   0xe   :  { %v38_v7 = vsub.f32 1.0, %v37_v6 }
  0x10   :  { %v39_v8 = vmul.f32 %v3176_v5, %v38_v7 }
  0x12   :  { %v40_v9 = vadd.f32 %v3176_v5, %v39_v8 }
  0x14   :  { %v3378_v10 = vsel %vm41_vm1, %v3176_v5, %v40_v9 }
  0x76   :  { %v32_v11 = vpop.xlane.xlu0 %31  ;;  %v35_v12 = vpop.xlane.xlu1 %34 }
  0x77   :  { %v43_v13 = vmul.f32 %v3378_v10, %v32_v11  ;;  %v44_v14 = vmul.f32 %v3378_v10, %v35_v12 }
  0x79   :  { %v45_v15 = vsub.f32 %v25_v0, %v43_v13  ;;  %v46_v16 = vsub.f32 %v26_v1, %v44_v14 }
  0x7b   :  { %v47_v17 = vmul.f32 %v45_v15, %v45_v15  ;;  %v48_v18 = vmul.f32 %v46_v16, %v46_v16 }
  0x7d   :  { %v49_v19 = vsel %vm29_vm0, %v47_v17, 0.0  ;;  %v52_v20 = vsel %vm29_vm0, %v48_v18, 0.0 }
  0x7e   :  { %50 = vadd.xlane.f32.xlu0 %v49_v19  ;;  %53 = vadd.xlane.f32.xlu1 %v52_v20 }
  0xf1   :  { %v51_v25 = vpop.xlane.xlu0 %50  ;;  %v54_v26 = vpop.xlane.xlu1 %53 }
  0xf2   :  { %v55_v27 = vmul.f32 %v51_v25, %v3378_v10  ;;  %v56_v28 = vmul.f32 %v54_v26, %v3378_v10 }
  0xf4   :  { %v57_v29 = vadd.f32 1e-12, %v55_v27  ;;  %v58_v30 = vadd.f32 1e-12, %v56_v28 }
  0xf6   :  { %3177 = vrsqrt.f32 %v57_v29  ;;  %vm75_vm2 = vweird.f32 %v58_v30  ;;  %vm65_vm5 = vweird.f32 %v57_v29 }
  0xf7   :  { %3179 = vrsqrt.f32 %v58_v30 }
  0xfc   :  { %v3178_v31 = vpop.eup %3177 }
  0xfd   :  { %v3180_v32 = vpop.eup %3179  ;;  %v60_v33 = vmul.f32 %v3178_v31, %v57_v29  ;;  %vm66_vm4 = vweird.f32 %v3178_v31 }
  0xfe   :  { %v70_v34 = vmul.f32 %v3180_v32, %v58_v30  ;;  %vm76_vm3 = vweird.f32 %v3180_v32  ;;  %vm67_vm7 = vmor %vm65_vm5, %vm66_vm4 }
  0xff   :  { %v61_v35 = vmul.f32 %v3178_v31, %v60_v33  ;;  %vm77_vm6 = vmor %vm75_vm2, %vm76_vm3 }
 0x100   :  { %v71_v36 = vmul.f32 %v3180_v32, %v70_v34  ;;  %v3448_v34 = vperm.slane %v87_v60, 1 }
 0x101   :  { %v62_v37 = vmul.f32 0.5, %v61_v35 }
 0x102   :  { %v72_v38 = vmul.f32 0.5, %v71_v36 }
 0x103   :  { %v63_v39 = vsub.f32 1.5, %v62_v37 }
 0x104   :  { %v73_v40 = vsub.f32 1.5, %v72_v38 }
 0x105   :  { %v64_v41 = vmul.f32 %v3178_v31, %v63_v39 }
 0x106   :  { %v74_v43 = vmul.f32 %v3180_v32, %v73_v40 }
 0x107   :  { %v68_v44 = vsel %vm67_vm7, %v3178_v31, %v64_v41 }
 0x108   :  { %v79_v45 = vmul.f32 %v68_v44, %v45_v15  ;;  %v78_v47 = vsel %vm77_vm6, %v3180_v32, %v74_v43 }
 0x109   :  { %v80_v49 = vmul.f32 %v78_v47, %v46_v16 }
 0x10a   :  { %v82_v48 = vmul.f32 %v3153_v42, %v79_v45 }
 0x10b   :  { %v83_v51 = vmul.f32 %v3153_v42, %v80_v49 }
 0x10c   :  { %v3404_v50 = vadd.f32 %v3154_v46, %v82_v48 }
 0x10d   :  { %v3408_v52 = vadd.f32 %v3154_v46, %v83_v51 }
 0x10e   :  { %3056 = vmatmul.msk.f32.vlgmr.msra.gmra.mxu0 %vm29_vm0, %v3404_v50 }
 0x116   :  { %3057 = vmatmul.msk.f32.gmra.mxu0 %vm29_vm0, %v3408_v52 }
 0x18b   :  { %v117_v54 = vpop.f32.mrf.mxu0 }
 0x18c   :  { %v118_v55 = vadd.f32 %v3155_v53, %v117_v54 }
 0x18e   :  { %205 = vrot.lane.b32.xlu0 %v118_v55, %s3316_s18  ;;  %124 = vrot.lane.b32.xlu2 %v118_v55, %s3317_s19 }
 0x193   :  { %v120_v59 = vpop.f32.mrf.mxu0 }
 0x194   :  { %v3429_v4 = vadd.f32 %v3155_v53, %v120_v59 }
 0x196   :  { %207 = vrot.lane.b32.xlu2 %v118_v55, %s3318_s20 }
 0x1e8   :  { %v125_v56 = vpop.permute.xlu2 %124 }
 0x1e9   :  { %3058 = vmatpush.xpose.msk.msrb.mxu0 %vm126_vm8, %v125_v56 }
 0x1ec   :  { %3059 = vmatmul.msk.f32.vlgmr.msrb.gmra.mxu0 %vm126_vm8, %v118_v55 }
 0x1f0   :  { %v208_v57 = vpop.permute.xlu2 %207 }
 0x1f1   :  { %3061 = vmatpush.xpose.msk.msra.mxu3 %vm126_vm8, %v208_v57 }
 0x200   :  { %v206_v58 = vpop.permute.xlu0 %205 }
 0x201   :  { %3062 = vmatmul.msk.f32.vlgmr.msra.gmra.mxu3 %vm126_vm8, %v206_v58 }
 0x269   :  { %v148_v62 = vpop.f32.mrf.mxu0 }
 0x26a   :  { %v151_v63 = vmul.f32 0.25, %v148_v62 }
 0x26c   :  { %v153_v0 = vadd.f32 %v3425_v61, %v151_v63 }
 0x26e   :  { %v155_v1 = vsel %vm154_vm9, %v153_v0, -inf }
 0x26f   :  { %156 = vmax.xlane.f32.xlu1 %v155_v1 }
 0x284   :  { %v230_v2 = vpop.f32.mrf.mxu3 }
 0x285   :  { %v233_v3 = vmul.f32 0.25, %v230_v2 }
 0x287   :  { %v234_v5 = vadd.f32 %v233_v3, %v3425_v61  ;;  %v458_v3 = vld [vmem:[%s4709_s2 + $0x38] sm:$0xff] }
 0x288   :  { %291 = vrot.lane.b32.xlu1 %v3429_v4, %s3317_s19 }
 0x289   :  { %v235_v6 = vsel %vm154_vm9, %v234_v5, -inf }
 0x28a   :  { %236 = vmax.xlane.f32.xlu2 %v235_v6  ;;  %v455_v6 = vld [vmem:[%s4709_s2 + $0x20] sm:$0xff] }
 0x2a2   :  { %179 = vrot.lane.b32.xlu2 %v118_v55, %s3319_s1 }
 0x2aa   :  { %372 = vrot.lane.b32.xlu2 %v3429_v4, %s3318_s20 }
 0x2b2   :  { %370 = vrot.lane.b32.xlu2 %v3429_v4, %s3316_s18 }
 0x2e2   :  { %v157_v7 = vpop.xlane.xlu1 %156 }
 0x2e3   :  { %v158_v8 = vsub.f32 %v153_v0, %v157_v7 }
 0x2e5   :  { %v159_v9 = vmul.f32 1.442695, %v158_v8 }
 0x2e7   :  { %3181 = vpow2.f32 %v159_v9 }
 0x2ed   :  { %v3182_v11 = vpop.eup %3181 }
 0x2ee   :  { %v161_v12 = vsel %vm154_vm9, %v3182_v11, 0.0 }
 0x2ef   :  { %162 = vadd.xlane.f32.xlu0 %v161_v12 }
 0x2fa   :  { %v292_v13 = vpop.permute.xlu1 %291 }
 0x2fb   :  { %3064 = vmatpush.xpose.msk.msra.mxu1 %vm126_vm8, %v292_v13 }
 0x2fd   :  { %v237_v14 = vpop.xlane.xlu2 %236 }
 0x2fe   :  { %v238_v15 = vsub.f32 %v234_v5, %v237_v14  ;;  %3065 = vmatmul.msk.f32.vlgmr.msra.gmra.mxu1 %vm126_vm8, %v3429_v4  ;;  %v457_v5 = vld [vmem:[%s4709_s2 + $0x30] sm:$0xff] }
 0x300   :  { %v239_v16 = vmul.f32 1.442695, %v238_v15 }
 0x302   :  { %3183 = vpow2.f32 %v239_v16 }
 0x303   :  { %259 = vrot.lane.b32.xlu0 %v118_v55, %s3320_s23 }
 0x305   :  { %v180_v17 = vpop.permute.xlu2 %179 }
 0x306   :  { %200 = vmatpush.msra.mxu2 %v180_v17 }
 0x308   :  { %v3184_v18 = vpop.eup %3183 }
 0x309   :  { %v241_v19 = vsel %vm154_vm9, %v3184_v18, 0.0 }
 0x30a   :  { %242 = vadd.xlane.f32.xlu1 %v241_v19 }
 0x30d   :  { %v373_v33 = vpop.permute.xlu2 %372 }
 0x315   :  { %v371_v53 = vpop.permute.xlu2 %370 }
 0x362   :  { %v163_v20 = vpop.xlane.xlu0 %162 }
 0x363   :  { %3185 = vrcp.f32 %v163_v20  ;;  %v175_v24 = vand.u32 2147483648, %v163_v20  ;;  %v173_v26 = vand.u32 2147483647, %v163_v20  ;;  %vm169_vm11 = vweird.f32 %v163_v20 }
 0x365   :  { %v176_v28 = vor.u32 1.1754944e-38, %v175_v24  ;;  %vm174_vm13 = vcmp.eq.f32.partialorder %v173_v26, 8.507059e+37 }
 0x369   :  { %v3186_v21 = vpop.eup %3185 }
 0x36a   :  { %v165_v22 = vmul.f32 %v3186_v21, %v163_v20  ;;  %vm170_vm10 = vweird.f32 %v3186_v21 }
 0x36b   :  { %vm171_vm12 = vmor %vm169_vm11, %vm170_vm10 }
 0x36c   :  { %v166_v23 = vsub.f32 1.0, %v165_v22 }
 0x36e   :  { %v167_v25 = vmul.f32 %v3186_v21, %v166_v23 }
 0x370   :  { %v168_v27 = vadd.f32 %v3186_v21, %v167_v25 }
 0x372   :  { %v172_v29 = vsel %vm171_vm12, %v3186_v21, %v168_v27 }
 0x373   :  { %v177_v30 = vsel %vm174_vm13, %v176_v28, %v172_v29  ;;  %v3481_v29 = vld [vmem:[%s4710_s3 + $0x1] ss:$0 sm:$0xff] }
 0x374   :  { %v178_v31 = vmul.f32 %v3182_v11, %v177_v30 }
 0x375   :  { %v260_v32 = vpop.permute.xlu0 %259 }
 0x376   :  { %3060 = vmatmul.msk.f32.vlgmr.msra.gmra.mxu2 %vm154_vm9, %v178_v31 }
 0x377   :  { %280 = vmatpush.msrb.mxu2 %v260_v32 }
 0x379   :  { %3067 = vmatpush.xpose.msk.msra.mxu2 %vm126_vm8, %v373_v33 }
 0x37b   :  { %v314_v35 = vpop.f32.mrf.mxu1 }
 0x37c   :  { %v317_v36 = vmul.f32 0.25, %v314_v35 }
 0x37d   :  { %v243_v37 = vpop.xlane.xlu1 %242 }
 0x37e   :  { %3187 = vrcp.f32 %v243_v37  ;;  %v319_v38 = vadd.f32 %v3448_v34, %v317_v36  ;;  %v255_v43 = vand.u32 2147483648, %v243_v37  ;;  %v253_v45 = vand.u32 2147483647, %v243_v37 }
 0x37f   :  { %vm249_vm15 = vweird.f32 %v243_v37 }
 0x380   :  { %v320_v39 = vsel %vm154_vm9, %v319_v38, -inf  ;;  %v256_v47 = vor.u32 1.1754944e-38, %v255_v43  ;;  %vm254_vm2 = vcmp.eq.f32.partialorder %v253_v45, 8.507059e+37 }
 0x381   :  { %321 = vmax.xlane.f32.xlu1 %v320_v39 }
 0x384   :  { %v3188_v40 = vpop.eup %3187 }
 0x385   :  { %v245_v41 = vmul.f32 %v3188_v40, %v243_v37  ;;  %vm250_vm14 = vweird.f32 %v3188_v40 }
 0x386   :  { %vm251_vm1 = vmor %vm249_vm15, %vm250_vm14 }
 0x387   :  { %v246_v42 = vsub.f32 1.0, %v245_v41 }
 0x389   :  { %v247_v44 = vmul.f32 %v3188_v40, %v246_v42 }
 0x38b   :  { %v248_v46 = vadd.f32 %v3188_v40, %v247_v44 }
 0x38d   :  { %v252_v48 = vsel %vm251_vm1, %v3188_v40, %v248_v46  ;;  %vm607_vm1 = vcmask 523264  }
 0x38e   :  { %v257_v49 = vsel %vm254_vm2, %v256_v47, %v252_v48 }
 0x38f   :  { %v258_v51 = vmul.f32 %v3184_v18, %v257_v49 }
 0x391   :  { %3063 = vmatmul.msk.f32.vlgmr.msrb.gmra.mxu2 %vm154_vm9, %v258_v51 }
 0x399   :  { %3068 = vmatmul.msk.f32.vlgmr.msra.gmra.mxu2 %vm126_vm8, %v371_v53 }
 0x39a   :  { %344 = vrot.lane.b32.xlu1 %v3429_v4, %s3319_s1 }
 0x3f4   :  { %v322_v54 = vpop.xlane.xlu1 %321 }
 0x3f5   :  { %v323_v55 = vsub.f32 %v319_v38, %v322_v54  ;;  %v547_v54 = vld [vmem:[%s4709_s2 + $0x58] sm:$0xff] }
 0x3f6   :  { %568 = vmatpush.msra.mxu0 %v547_v54 }
 0x3f7   :  { %v324_v56 = vmul.f32 1.442695, %v323_v55  ;;  %v546_v55 = vld [vmem:[%s4709_s2 + $0x50] sm:$0xff] }
 0x3f8   :  { %569 = vmatpush.msra.mxu0 %v546_v55 }
 0x3f9   :  { %3189 = vpow2.f32 %v324_v56  ;;  %v202_v59 = vpop.f32.mrf.mxu2  ;;  %v545_v56 = vld [vmem:[%s4709_s2 + $0x48] sm:$0xff] }
 0x3fa   :  { %570 = vmatpush.msra.mxu0 %v545_v56 }
 0x3ff   :  { %v3190_v57 = vpop.eup %3189 }
 0x400   :  { %v326_v58 = vsel %vm154_vm9, %v3190_v57, 0.0 }
 0x401   :  { %327 = vadd.xlane.f32.xlu2 %v326_v58 }
 0x40c   :  { %v345_v60 = vpop.permute.xlu1 %344 }
 0x40d   :  { %365 = vmatpush.msrb.mxu3 %v345_v60 }
 0x40f   :  { %479 = vmatpush.msra.mxu3 %v458_v3 }
 0x411   :  { %480 = vmatpush.msra.mxu3 %v457_v5 }
 0x414   :  { %v282_v62 = vpop.f32.mrf.mxu2 }
 0x415   :  { %286 = vrot.lane.b32.xlu1 %v282_v62, %s3321_s24 }
 0x419   :  { %424 = vrot.lane.b32.xlu2 %v3429_v4, %s3320_s23  ;;  %v456_v4 = vld [vmem:[%s4709_s2 + $0x28] sm:$0xff] }
 0x41a   :  { %481 = vmatpush.msra.mxu3 %v456_v4 }
 0x41c   :  { %v395_v63 = vpop.f32.mrf.mxu2  ;;  %482 = vmatpush.msra.mxu3 %v455_v6  ;;  %v3508_v6 = vld [vmem:[%s4710_s3 + $0x2] ss:$0 sm:$0xff] }
 0x41d   :  { %v398_v0 = vmul.f32 0.25, %v395_v63 }
 0x41f   :  { %v399_v1 = vadd.f32 %v398_v0, %v3448_v34 }
 0x421   :  { %v400_v2 = vsel %vm154_vm9, %v399_v1, -inf }
 0x422   :  { %401 = vmax.xlane.f32.xlu0 %v400_v2 }
 0x474   :  { %v328_v7 = vpop.xlane.xlu2 %327 }
 0x475   :  { %3191 = vrcp.f32 %v328_v7  ;;  %v340_v13 = vand.u32 2147483648, %v328_v7  ;;  %v338_v15 = vand.u32 2147483647, %v328_v7  ;;  %vm334_vm4 = vweird.f32 %v328_v7 }
 0x477   :  { %v341_v17 = vor.u32 1.1754944e-38, %v340_v13  ;;  %vm339_vm6 = vcmp.eq.f32.partialorder %v338_v15, 8.507059e+37  ;;  %v604_v13 = vld [vmem:[%s4709_s2 + $0x98] sm:$0xff]  ;;  %v602_v15 = vld [vmem:[%s4709_s2 + $0x88] sm:$0xff] }
 0x478   :  { %622 = vmatpush.msrb.mxu2 %v604_v13 }
 0x47b   :  { %v3192_v8 = vpop.eup %3191 }
 0x47c   :  { %v330_v9 = vmul.f32 %v3192_v8, %v328_v7  ;;  %v425_v11 = vpop.permute.xlu2 %424  ;;  %vm335_vm3 = vweird.f32 %v3192_v8 }
 0x47d   :  { %445 = vmatpush.msrb.mxu1 %v425_v11  ;;  %vm336_vm5 = vmor %vm334_vm4, %vm335_vm3 }
 0x47e   :  { %v331_v12 = vsub.f32 1.0, %v330_v9  ;;  %v3513_v9 = vld [vmem:[%s4710_s3 + $0x3] ss:$0 sm:$0xff] }
 0x480   :  { %v332_v14 = vmul.f32 %v3192_v8, %v331_v12 }
 0x482   :  { %v333_v16 = vadd.f32 %v3192_v8, %v332_v14  ;;  %v603_v14 = vld [vmem:[%s4709_s2 + $0x90] sm:$0xff] }
 0x483   :  { %623 = vmatpush.msrb.mxu2 %v603_v14 }
 0x484   :  { %v337_v18 = vsel %vm336_vm5, %v3192_v8, %v333_v16  ;;  %v601_v16 = vld [vmem:[%s4709_s2 + $0x80] sm:$0xff] }
 0x485   :  { %v342_v19 = vsel %vm339_vm6, %v341_v17, %v337_v18  ;;  %624 = vmatpush.msrb.mxu2 %v602_v15  ;;  %v600_v17 = vld [vmem:[%s4709_s2 + $0x78] sm:$0xff]  ;;  %v599_v18 = vld [vmem:[%s4709_s2 + $0x70] sm:$0xff] }
 0x486   :  { %v343_v20 = vmul.f32 %v3190_v57, %v342_v19  ;;  %v544_v57 = vld [vmem:[%s4709_s2 + $0x40] sm:$0xff]  ;;  %v598_v19 = vld [vmem:[%s4709_s2 + $0x68] sm:$0xff] }
 0x487   :  { %v287_v21 = vpop.permute.xlu1 %286  ;;  %571 = vmatpush.msra.mxu0 %v544_v57  ;;  %625 = vmatpush.msrb.mxu2 %v601_v16 }
 0x488   :  { %3066 = vmatmul.msk.f32.vlgmr.msrb.gmra.mxu3 %vm154_vm9, %v343_v20  ;;  %v289_v22 = vsel %vm126_vm8, %v202_v59, %v287_v21  ;;  %v597_v20 = vld [vmem:[%s4709_s2 + $0x60] sm:$0xff] }
 0x489   :  { %626 = vmatpush.msrb.mxu2 %v600_v17 }
 0x48b   :  { %627 = vmatpush.msrb.mxu2 %v599_v18 }
 0x48d   :  { %628 = vmatpush.msrb.mxu2 %v598_v19 }
 0x48f   :  { %629 = vmatpush.msrb.mxu2 %v597_v20 }
 0x490   :  { %3070 = vmatmul.msk.f32.vlgmr.msra.gmra.mxu3 %vm29_vm0, %v289_v22  ;;  %v3545_v22 = vld [vmem:[%s4710_s3 + $0x4] ss:$0 sm:$0xff] }
 0x495   :  { %v402_v23 = vpop.xlane.xlu0 %401 }
 0x496   :  { %v403_v24 = vsub.f32 %v399_v1, %v402_v23 }
 0x498   :  { %v404_v25 = vmul.f32 1.442695, %v403_v24 }
 0x49a   :  { %3193 = vpow2.f32 %v404_v25 }
 0x4a0   :  { %v3194_v26 = vpop.eup %3193 }
 0x4a1   :  { %v406_v27 = vsel %vm154_vm9, %v3194_v26, 0.0 }
 0x4a2   :  { %407 = vadd.xlane.f32.xlu1 %v406_v27 }
 0x50b   :  { %v367_v28 = vpop.f32.mrf.mxu3 }
 0x513   :  { %v484_v30 = vpop.f32.mrf.mxu3 }
 0x514   :  { %v485_v31 = vadd.f32 %v3481_v29, %v484_v30 }
 0x515   :  { %v408_v32 = vpop.xlane.xlu1 %407 }
 0x516   :  { %3195 = vrcp.f32 %v408_v32  ;;  %v490_v33 = vadd.f32 %v485_v31, %v3404_v50  ;;  %v420_v39 = vand.u32 2147483648, %v408_v32  ;;  %v418_v41 = vand.u32 2147483647, %v408_v32 }
 0x517   :  { %vm414_vm10 = vweird.f32 %v408_v32 }
 0x518   :  { %v494_v35 = vsel %vm29_vm0, %v490_v33, 0.0  ;;  %v421_v43 = vor.u32 1.1754944e-38, %v420_v39  ;;  %vm419_vm12 = vcmp.eq.f32.partialorder %v418_v41, 8.507059e+37 }
 0x519   :  { %495 = vadd.xlane.f32.xlu0 %v494_v35 }
 0x51c   :  { %v3196_v36 = vpop.eup %3195 }
 0x51d   :  { %v410_v37 = vmul.f32 %v3196_v36, %v408_v32  ;;  %vm415_vm7 = vweird.f32 %v3196_v36 }
 0x51e   :  { %vm416_vm11 = vmor %vm414_vm10, %vm415_vm7 }
 0x51f   :  { %v411_v38 = vsub.f32 1.0, %v410_v37 }
 0x521   :  { %v412_v40 = vmul.f32 %v3196_v36, %v411_v38 }
 0x523   :  { %v413_v42 = vadd.f32 %v3196_v36, %v412_v40 }
 0x525   :  { %v417_v44 = vsel %vm416_vm11, %v3196_v36, %v413_v42  ;;  %v3557_v42 = vld [vmem:[%s4710_s3 + $0x5] ss:$0 sm:$0xff] }
 0x526   :  { %v422_v45 = vsel %vm419_vm12, %v421_v43, %v417_v44 }
 0x527   :  { %v423_v46 = vmul.f32 %v3194_v26, %v422_v45 }
 0x529   :  { %3069 = vmatmul.msk.f32.vlgmr.msrb.gmra.mxu1 %vm154_vm9, %v423_v46 }
 0x58c   :  { %v496_v50 = vpop.xlane.xlu0 %495 }
 0x58d   :  { %v500_v47 = vmul.f32 %v496_v50, %v3378_v10 }
 0x58f   :  { %v502_v48 = vsub.f32 %v490_v33, %v500_v47 }
 0x591   :  { %v504_v49 = vmul.f32 %v502_v48, %v502_v48 }
 0x593   :  { %v506_v51 = vsel %vm29_vm0, %v504_v49, 0.0 }
 0x594   :  { %507 = vadd.xlane.f32.xlu2 %v506_v51 }
 0x5a6   :  { %v447_v53 = vpop.f32.mrf.mxu1 }
 0x5a7   :  { %451 = vrot.lane.b32.xlu0 %v447_v53, %s3321_s24 }
 0x607   :  { %v508_v58 = vpop.xlane.xlu2 %507 }
 0x608   :  { %v512_v59 = vmul.f32 %v508_v58, %v3378_v10 }
 0x60a   :  { %v514_v60 = vadd.f32 1e-12, %v512_v59 }
 0x60c   :  { %3197 = vrsqrt.f32 %v514_v60  ;;  %vm522_vm14 = vweird.f32 %v514_v60 }
 0x612   :  { %v3198_v62 = vpop.eup %3197 }
 0x613   :  { %v517_v63 = vmul.f32 %v3198_v62, %v514_v60  ;;  %vm523_vm13 = vweird.f32 %v3198_v62 }
 0x614   :  { %vm524_vm15 = vmor %vm522_vm14, %vm523_vm13 }
 0x615   :  { %v518_v0 = vmul.f32 %v3198_v62, %v517_v63 }
 0x617   :  { %v519_v1 = vmul.f32 0.5, %v518_v0 }
 0x619   :  { %v520_v2 = vsub.f32 1.5, %v519_v1  ;;  %v452_v3 = vpop.permute.xlu0 %451 }
 0x61a   :  { %v454_v5 = vsel %vm126_vm8, %v367_v28, %v452_v3  ;;  %v3079_v3 = vld [vmem:[%s4709_s2 + $0xb8] sm:$0xff] }
 0x61b   :  { %v521_v4 = vmul.f32 %v3198_v62, %v520_v2  ;;  %3071 = vmatmul.msk.f32.gmra.mxu3 %vm29_vm0, %v454_v5  ;;  %717 = vmatpush.msra.mxu1 %v3079_v3  ;;  %v3078_v5 = vld [vmem:[%s4709_s2 + $0xb0] sm:$0xff] }
 0x61d   :  { %v525_v7 = vsel %vm524_vm15, %v3198_v62, %v521_v4  ;;  %718 = vmatpush.msra.mxu1 %v3078_v5  ;;  %v3077_v4 = vld [vmem:[%s4709_s2 + $0xa8] sm:$0xff] }
 0x61e   :  { %v536_v8 = vmul.f32 %v525_v7, %v502_v48 }
 0x61f   :  { %719 = vmatpush.msra.mxu1 %v3077_v4 }
 0x620   :  { %v539_v11 = vmul.f32 %v3508_v6, %v536_v8 }
 0x622   :  { %v542_v12 = vadd.f32 %v3513_v9, %v539_v11 }
 0x624   :  { %3072 = vmatmul.msk.f32.vlgmr.msra.gmra.mxu0 %vm29_vm0, %v542_v12 }
 0x69e   :  { %v487_v21 = vpop.f32.mrf.mxu3 }
 0x69f   :  { %v488_v23 = vadd.f32 %v3481_v29, %v487_v21 }
 0x6a1   :  { %v573_v24 = vpop.f32.mrf.mxu0  ;;  %v491_v25 = vadd.f32 %v488_v23, %v3408_v52 }
 0x6a2   :  { %v574_v26 = vadd.f32 %v3545_v22, %v573_v24 }
 0x6a3   :  { %v497_v27 = vsel %vm29_vm0, %v491_v25, 0.0 }
 0x6a4   :  { %v581_v28 = vmul.f32 0.044715, %v574_v26  ;;  %498 = vadd.xlane.f32.xlu0 %v497_v27  ;;  %v579_v36 = vmul.f32 0.5, %v574_v26 }
 0x6a6   :  { %v583_v30 = vmul.f32 %v581_v28, %v574_v26  ;;  %v3161_v28 = vld [vmem:[%s4710_s3 + $0x6] ss:$0 sm:$0xff] }
 0x6a8   :  { %v585_v31 = vmul.f32 %v583_v30, %v574_v26 }
 0x6aa   :  { %v587_v32 = vadd.f32 %v585_v31, %v574_v26 }
 0x6ac   :  { %v589_v33 = vmul.f32 0.7978846, %v587_v32  ;;  %v3162_v32 = vld [vmem:[%s4710_s3 + $0x7] ss:$0 sm:$0xff] }
 0x6ae   :  { %3199 = vtanh.f32 %v589_v33 }
 0x6b4   :  { %v3200_v35 = vpop.eup %3199 }
 0x6b5   :  { %v593_v37 = vadd.f32 1.0, %v3200_v35 }
 0x6b7   :  { %v595_v38 = vmul.f32 %v593_v37, %v579_v36  ;;  %v3163_v37 = vld [vmem:[%s4710_s3 + $0x8] ss:$0 sm:$0xff] }
 0x6b9   :  { %3074 = vmatmul.msk.f32.vlgmr.msrb.gmra.mxu2 %vm607_vm1, %v595_v38 }
 0x717   :  { %v499_v29 = vpop.xlane.xlu0 %498 }
 0x718   :  { %v501_v52 = vmul.f32 %v499_v29, %v3378_v10 }
 0x71a   :  { %v503_v39 = vsub.f32 %v491_v25, %v501_v52 }
 0x71c   :  { %v505_v40 = vmul.f32 %v503_v39, %v503_v39 }
 0x71e   :  { %v509_v41 = vsel %vm29_vm0, %v505_v40, 0.0 }
 0x71f   :  { %510 = vadd.xlane.f32.xlu1 %v509_v41 }
 0x73c   :  { %v631_v43 = vpop.f32.mrf.mxu2 }
 0x73d   :  { %v632_v44 = vadd.f32 %v3557_v42, %v631_v43 }
 0x73f   :  { %v637_v45 = vadd.f32 %v632_v44, %v542_v12 }
 0x741   :  { %v641_v46 = vsel %vm29_vm0, %v637_v45, 0.0 }
 0x742   :  { %642 = vadd.xlane.f32.xlu1 %v641_v46 }
 0x792   :  { %v511_v50 = vpop.xlane.xlu1 %510 }
 0x793   :  { %v513_v47 = vmul.f32 %v511_v50, %v3378_v10 }
 0x795   :  { %v515_v48 = vadd.f32 1e-12, %v513_v47 }
 0x797   :  { %3201 = vrsqrt.f32 %v515_v48  ;;  %vm532_vm3 = vweird.f32 %v515_v48 }
 0x79d   :  { %v3202_v49 = vpop.eup %3201 }
 0x79e   :  { %v527_v51 = vmul.f32 %v3202_v49, %v515_v48  ;;  %vm533_vm2 = vweird.f32 %v3202_v49 }
 0x79f   :  { %vm534_vm4 = vmor %vm532_vm3, %vm533_vm2 }
 0x7a0   :  { %v528_v53 = vmul.f32 %v3202_v49, %v527_v51 }
 0x7a2   :  { %v529_v54 = vmul.f32 0.5, %v528_v53 }
 0x7a4   :  { %v530_v55 = vsub.f32 1.5, %v529_v54 }
 0x7a6   :  { %v531_v56 = vmul.f32 %v3202_v49, %v530_v55 }
 0x7a8   :  { %v535_v57 = vsel %vm534_vm4, %v3202_v49, %v531_v56 }
 0x7a9   :  { %v537_v58 = vmul.f32 %v535_v57, %v503_v39 }
 0x7ab   :  { %v540_v59 = vmul.f32 %v3508_v6, %v537_v58  ;;  %v3076_v6 = vld [vmem:[%s4709_s2 + $0xa0] sm:$0xff] }
 0x7ac   :  { %720 = vmatpush.msra.mxu1 %v3076_v6 }
 0x7ad   :  { %v543_v60 = vadd.f32 %v3513_v9, %v540_v59 }
 0x7af   :  { %3073 = vmatmul.msk.f32.gmra.mxu0 %vm29_vm0, %v543_v60 }
 0x7b5   :  { %v643_v62 = vpop.xlane.xlu1 %642 }
 0x7b6   :  { %v647_v63 = vmul.f32 %v643_v62, %v3378_v10 }
 0x7b8   :  { %v649_v0 = vsub.f32 %v637_v45, %v647_v63 }
 0x7ba   :  { %v651_v1 = vmul.f32 %v649_v0, %v649_v0 }
 0x7bc   :  { %v653_v2 = vsel %vm29_vm0, %v651_v1, 0.0 }
 0x7bd   :  { %654 = vadd.xlane.f32.xlu1 %v653_v2 }
 0x82c   :  { %v576_v7 = vpop.f32.mrf.mxu0 }
 0x82d   :  { %v577_v8 = vadd.f32 %v3545_v22, %v576_v7 }
 0x82f   :  { %v582_v9 = vmul.f32 0.044715, %v577_v8  ;;  %v580_v24 = vmul.f32 0.5, %v577_v8 }
 0x830   :  { %v655_v11 = vpop.xlane.xlu1 %654 }
 0x831   :  { %v659_v12 = vmul.f32 %v655_v11, %v3378_v10  ;;  %v584_v13 = vmul.f32 %v582_v9, %v577_v8 }
 0x833   :  { %v661_v14 = vadd.f32 1e-12, %v659_v12  ;;  %v586_v15 = vmul.f32 %v584_v13, %v577_v8 }
 0x835   :  { %3203 = vrsqrt.f32 %v661_v14  ;;  %v588_v16 = vadd.f32 %v586_v15, %v577_v8  ;;  %vm669_vm6 = vweird.f32 %v661_v14 }
 0x837   :  { %v590_v17 = vmul.f32 0.7978846, %v588_v16 }
 0x839   :  { %3205 = vtanh.f32 %v590_v17 }
 0x83b   :  { %v3204_v18 = vpop.eup %3203 }
 0x83c   :  { %v664_v19 = vmul.f32 %v3204_v18, %v661_v14  ;;  %vm670_vm5 = vweird.f32 %v3204_v18 }
 0x83d   :  { %vm671_vm7 = vmor %vm669_vm6, %vm670_vm5 }
 0x83e   :  { %v665_v20 = vmul.f32 %v3204_v18, %v664_v19 }
 0x83f   :  { %v3206_v21 = vpop.eup %3205 }
 0x840   :  { %v666_v23 = vmul.f32 0.5, %v665_v20  ;;  %v594_v25 = vadd.f32 1.0, %v3206_v21 }
 0x842   :  { %v667_v22 = vsub.f32 1.5, %v666_v23  ;;  %v596_v26 = vmul.f32 %v594_v25, %v580_v24 }
 0x844   :  { %v668_v27 = vmul.f32 %v3204_v18, %v667_v22  ;;  %3075 = vmatmul.msk.f32.gmra.mxu2 %vm607_vm1, %v596_v26 }
 0x846   :  { %v672_v30 = vsel %vm671_vm7, %v3204_v18, %v668_v27 }
 0x847   :  { %v683_v31 = vmul.f32 %v672_v30, %v649_v0 }
 0x849   :  { %v686_v33 = vmul.f32 %v3161_v28, %v683_v31 }
 0x84b   :  { %v3588_v35 = vadd.f32 %v3162_v32, %v686_v33 }
 0x84d   :  { %3081 = vmatmul.msk.f32.vlgmr.msra.gmra.mxu1 %vm29_vm0, %v3588_v35 }
 0x8c7   :  { %v634_v36 = vpop.f32.mrf.mxu2 }
 0x8c8   :  { %v635_v38 = vadd.f32 %v3557_v42, %v634_v36 }
 0x8ca   :  { %v722_v29 = vpop.f32.mrf.mxu1  ;;  %v638_v52 = vadd.f32 %v635_v38, %v543_v60 }
 0x8cb   :  { %v3596_v39 = vadd.f32 %v3163_v37, %v722_v29 }
 0x8cc   :  { %v644_v40 = vsel %vm29_vm0, %v638_v52, 0.0 }
 0x8cd   :  { %645 = vadd.xlane.f32.xlu1 %v644_v40  ;;  %729 = vrot.lane.b32.xlu2 %v3596_v39, %s3317_s19 }
 0x927   :  { %v730_v41 = vpop.permute.xlu2 %729 }
 0x928   :  { %3083 = vmatpush.xpose.msk.msrb.mxu3 %vm126_vm8, %v730_v41 }
 0x92b   :  { %3084 = vmatmul.msk.f32.vlgmr.msrb.gmra.mxu3 %vm126_vm8, %v3596_v39 }
 0x940   :  { %v646_v43 = vpop.xlane.xlu1 %645 }
 0x941   :  { %v648_v44 = vmul.f32 %v646_v43, %v3378_v10 }
 0x943   :  { %v650_v42 = vsub.f32 %v638_v52, %v648_v44 }
 0x945   :  { %v652_v45 = vmul.f32 %v650_v42, %v650_v42 }
 0x947   :  { %v656_v46 = vsel %vm29_vm0, %v652_v45, 0.0 }
 0x948   :  { %657 = vadd.xlane.f32.xlu1 %v656_v46 }
 0x961   :  { %809 = vrot.lane.b32.xlu1 %v3596_v39, %s3318_s20 }
 0x969   :  { %781 = vrot.lane.b32.xlu1 %v3596_v39, %s3319_s1 }
 0x9ae   :  { %v752_v50 = vpop.f32.mrf.mxu3 }
 0x9af   :  { %v755_v47 = vmul.f32 0.25, %v752_v50 }
 0x9b1   :  { %v756_v48 = vadd.f32 %v755_v47, %v3425_v61 }
 0x9b3   :  { %v757_v49 = vsel %vm154_vm9, %v756_v48, -inf }
 0x9b4   :  { %758 = vmax.xlane.f32.xlu0 %v757_v49 }
 0x9bb   :  { %v658_v51 = vpop.xlane.xlu1 %657 }
 0x9bc   :  { %v660_v53 = vmul.f32 %v658_v51, %v3378_v10 }
 0x9be   :  { %v662_v54 = vadd.f32 1e-12, %v660_v53 }
 0x9c0   :  { %3207 = vrsqrt.f32 %v662_v54  ;;  %vm679_vm11 = vweird.f32 %v662_v54 }
 0x9c6   :  { %v3208_v55 = vpop.eup %3207 }
 0x9c7   :  { %v674_v56 = vmul.f32 %v3208_v55, %v662_v54  ;;  %vm680_vm10 = vweird.f32 %v3208_v55 }
 0x9c8   :  { %807 = vrot.lane.b32.xlu0 %v3596_v39, %s3316_s18  ;;  %vm681_vm12 = vmor %vm679_vm11, %vm680_vm10 }
 0x9c9   :  { %v675_v57 = vmul.f32 %v3208_v55, %v674_v56 }
 0x9cb   :  { %v676_v58 = vmul.f32 0.5, %v675_v57 }
 0x9cd   :  { %v677_v59 = vsub.f32 1.5, %v676_v58 }
 0x9cf   :  { %v678_v60 = vmul.f32 %v3208_v55, %v677_v59 }
 0x9d1   :  { %v682_v62 = vsel %vm681_vm12, %v3208_v55, %v678_v60 }
 0x9d2   :  { %v684_v63 = vmul.f32 %v682_v62, %v650_v42 }
 0x9d3   :  { %v810_v0 = vpop.permute.xlu1 %809 }
 0x9d4   :  { %3086 = vmatpush.xpose.msk.msrb.mxu1 %vm126_vm8, %v810_v0  ;;  %v687_v1 = vmul.f32 %v3161_v28, %v684_v63 }
 0x9d6   :  { %v3616_v2 = vadd.f32 %v3162_v32, %v687_v1 }
 0x9d8   :  { %3082 = vmatmul.msk.f32.gmra.mxu1 %vm29_vm0, %v3616_v2 }
 0x9db   :  { %v782_v3 = vpop.permute.xlu1 %781 }
 0x9dc   :  { %802 = vmatpush.msrb.mxu0 %v782_v3 }
 0xa27   :  { %v759_v5 = vpop.xlane.xlu0 %758 }
 0xa28   :  { %v760_v4 = vsub.f32 %v756_v48, %v759_v5 }
 0xa2a   :  { %v761_v6 = vmul.f32 1.442695, %v760_v4 }
 0xa2c   :  { %3209 = vpow2.f32 %v761_v6 }
 0xa32   :  { %v3210_v7 = vpop.eup %3209 }
 0xa33   :  { %v763_v8 = vsel %vm154_vm9, %v3210_v7, 0.0 }
 0xa34   :  { %764 = vadd.xlane.f32.xlu0 %v763_v8 }
 0xa3a   :  { %v808_v9 = vpop.permute.xlu0 %807 }
 0xa3b   :  { %3087 = vmatmul.msk.f32.vlgmr.msrb.gmra.mxu1 %vm126_vm8, %v808_v9  ;;  %v3098_v9 = vld [vmem:[%s4709_s2 + $0xd8] sm:$0xff] }
 0xa55   :  { %v725_v11 = vpop.f32.mrf.mxu1 }
 0xa56   :  { %v3622_v12 = vadd.f32 %v3163_v37, %v725_v11  ;;  %v3097_v11 = vld [vmem:[%s4709_s2 + $0xd0] sm:$0xff] }
 0xa58   :  { %973 = vrot.lane.b32.xlu2 %v3622_v12, %s3318_s20 }
 0xa60   :  { %971 = vrot.lane.b32.xlu2 %v3622_v12, %s3316_s18 }
 0xa68   :  { %893 = vrot.lane.b32.xlu2 %v3622_v12, %s3317_s19 }
 0xaa7   :  { %v765_v13 = vpop.xlane.xlu0 %764 }
 0xaa8   :  { %3211 = vrcp.f32 %v765_v13  ;;  %v777_v17 = vand.u32 2147483648, %v765_v13  ;;  %v775_v20 = vand.u32 2147483647, %v765_v13  ;;  %vm771_vm14 = vweird.f32 %v765_v13 }
 0xaaa   :  { %v778_v23 = vor.u32 1.1754944e-38, %v777_v17  ;;  %vm776_vm2 = vcmp.eq.f32.partialorder %v775_v20, 8.507059e+37 }
 0xaae   :  { %v3212_v14 = vpop.eup %3211 }
 0xaaf   :  { %v767_v15 = vmul.f32 %v3212_v14, %v765_v13  ;;  %vm772_vm13 = vweird.f32 %v3212_v14 }
 0xab0   :  { %vm773_vm15 = vmor %vm771_vm14, %vm772_vm13 }
 0xab1   :  { %v768_v16 = vsub.f32 1.0, %v767_v15 }
 0xab2   :  { %v974_v18 = vpop.permute.xlu2 %973 }
 0xab3   :  { %v769_v19 = vmul.f32 %v3212_v14, %v768_v16  ;;  %3092 = vmatpush.xpose.msk.msra.mxu1 %vm126_vm8, %v974_v18 }
 0xab5   :  { %v770_v21 = vadd.f32 %v3212_v14, %v769_v19 }
 0xab7   :  { %v774_v24 = vsel %vm773_vm15, %v3212_v14, %v770_v21  ;;  %v3096_v14 = vld [vmem:[%s4709_s2 + $0xc8] sm:$0xff] }
 0xab8   :  { %v832_v25 = vpop.f32.mrf.mxu1  ;;  %v779_v22 = vsel %vm776_vm2, %v778_v23, %v774_v24 }
 0xab9   :  { %v835_v26 = vmul.f32 0.25, %v832_v25  ;;  %v780_v27 = vmul.f32 %v3210_v7, %v779_v22 }
 0xaba   :  { %v972_v28 = vpop.permute.xlu2 %971 }
 0xabb   :  { %3085 = vmatmul.msk.f32.vlgmr.msrb.gmra.mxu0 %vm154_vm9, %v780_v27  ;;  %3093 = vmatmul.msk.f32.vlgmr.msra.gmra.mxu1 %vm126_vm8, %v972_v28  ;;  %v836_v30 = vadd.f32 %v835_v26, %v3425_v61 }
 0xabd   :  { %v837_v31 = vsel %vm154_vm9, %v836_v30, -inf }
 0xabe   :  { %838 = vmax.xlane.f32.xlu1 %v837_v31 }
 0xac2   :  { %v894_v32 = vpop.permute.xlu2 %893 }
 0xac3   :  { %3089 = vmatpush.xpose.msk.msra.mxu0 %vm126_vm8, %v894_v32 }
 0xac6   :  { %3090 = vmatmul.msk.f32.vlgmr.msra.gmra.mxu0 %vm126_vm8, %v3622_v12 }
 0xac7   :  { %1080 = vmatpush.msrb.mxu0 %v3098_v9 }
 0xac9   :  { %1081 = vmatpush.msrb.mxu0 %v3097_v11 }
 0xacb   :  { %1082 = vmatpush.msrb.mxu0 %v3096_v14 }
 0xb31   :  { %v839_v33 = vpop.xlane.xlu1 %838 }
 0xb32   :  { %v840_v36 = vsub.f32 %v836_v30, %v839_v33 }
 0xb34   :  { %v841_v37 = vmul.f32 1.442695, %v840_v36 }
 0xb36   :  { %3213 = vpow2.f32 %v841_v37 }
 0xb38   :  { %v996_v38 = vpop.f32.mrf.mxu1  ;;  %v3638_v52 = vpop.f32.mrf.mxu0 }
 0xb39   :  { %v999_v29 = vmul.f32 0.25, %v996_v38 }
 0xb3b   :  { %v1000_v40 = vadd.f32 %v999_v29, %v3448_v34 }
 0xb3c   :  { %v3214_v61 = vpop.eup %3213 }
 0xb3d   :  { %v1001_v41 = vsel %vm154_vm9, %v1000_v40, -inf  ;;  %v843_v43 = vsel %vm154_vm9, %v3214_v61, 0.0 }
 0xb3e   :  { %1002 = vmax.xlane.f32.xlu2 %v1001_v41  ;;  %844 = vadd.xlane.f32.xlu0 %v843_v43 }
 0xb43   :  { %v916_v44 = vpop.f32.mrf.mxu0 }
 0xb44   :  { %v919_v42 = vmul.f32 0.25, %v916_v44 }
 0xb46   :  { %v920_v45 = vadd.f32 %v919_v42, %v3448_v34 }
 0xb48   :  { %v921_v46 = vsel %vm154_vm9, %v920_v45, -inf }
 0xb49   :  { %922 = vmax.xlane.f32.xlu0 %v921_v46 }
 0xb56   :  { %861 = vrot.lane.b32.xlu2 %v3596_v39, %s3320_s23 }
 0xb5d   :  { %1025 = vrot.lane.b32.xlu0 %v3622_v12, %s3320_s23 }
 0xbb1   :  { %v1003_v50 = vpop.xlane.xlu2 %1002  ;;  %v845_v47 = vpop.xlane.xlu0 %844 }
 0xbb2   :  { %v1004_v48 = vsub.f32 %v1000_v40, %v1003_v50  ;;  %3215 = vrcp.f32 %v845_v47  ;;  %v855_v56 = vand.u32 2147483647, %v845_v47  ;;  %v857_v57 = vand.u32 2147483648, %v845_v47  ;;  %v3164_v50 = vld [vmem:[%s4710_s3 + $0x9] ss:$0 sm:$0xff] }
 0xbb3   :  { %vm851_vm4 = vweird.f32 %v845_v47 }
 0xbb4   :  { %v1005_v49 = vmul.f32 1.442695, %v1004_v48  ;;  %v858_v0 = vor.u32 1.1754944e-38, %v857_v57  ;;  %vm856_vm6 = vcmp.eq.f32.partialorder %v855_v56, 8.507059e+37 }
 0xbb6   :  { %3217 = vpow2.f32 %v1005_v49 }
 0xbb8   :  { %v3216_v51 = vpop.eup %3215 }
 0xbb9   :  { %v847_v53 = vmul.f32 %v3216_v51, %v845_v47  ;;  %v862_v54 = vpop.permute.xlu2 %861  ;;  %vm852_vm3 = vweird.f32 %v3216_v51 }
 0xbba   :  { %882 = vmatpush.msra.mxu3 %v862_v54  ;;  %vm853_vm5 = vmor %vm851_vm4, %vm852_vm3 }
 0xbbb   :  { %v848_v34 = vsub.f32 1.0, %v847_v53 }
 0xbbc   :  { %v3218_v55 = vpop.eup %3217  ;;  %v923_v58 = vpop.xlane.xlu0 %922 }
 0xbbd   :  { %v849_v59 = vmul.f32 %v3216_v51, %v848_v34  ;;  %v924_v39 = vsub.f32 %v920_v45, %v923_v58  ;;  %v1007_v60 = vsel %vm154_vm9, %v3218_v55, 0.0 }
 0xbbe   :  { %1008 = vadd.xlane.f32.xlu1 %v1007_v60 }
 0xbbf   :  { %v850_v62 = vadd.f32 %v3216_v51, %v849_v59  ;;  %v925_v63 = vmul.f32 1.442695, %v924_v39 }
 0xbc1   :  { %v854_v1 = vsel %vm853_vm5, %v3216_v51, %v850_v62  ;;  %3219 = vpow2.f32 %v925_v63 }
 0xbc2   :  { %v859_v3 = vsel %vm856_vm6, %v858_v0, %v854_v1  ;;  %v3106_v0 = vld [vmem:[%s4709_s2 + $0xf0] sm:$0xff]  ;;  %v3105_v1 = vld [vmem:[%s4709_s2 + $0xe8] sm:$0xff] }
 0xbc3   :  { %v860_v5 = vmul.f32 %v3214_v61, %v859_v3  ;;  %v3095_v61 = vld [vmem:[%s4709_s2 + $0xc0] sm:$0xff] }
 0xbc4   :  { %1083 = vmatpush.msrb.mxu0 %v3095_v61  ;;  %v3104_v3 = vld [vmem:[%s4709_s2 + $0xe0] sm:$0xff]  ;;  %v3113_v61 = vld [vmem:[%s4709_s2 + $0x110] sm:$0xff] }
 0xbc5   :  { %3088 = vmatmul.msk.f32.vlgmr.msra.gmra.mxu3 %vm154_vm9, %v860_v5 }
 0xbc7   :  { %v3220_v4 = vpop.eup %3219 }
 0xbc8   :  { %v927_v6 = vsel %vm154_vm9, %v3220_v4, 0.0 }
 0xbc9   :  { %928 = vadd.xlane.f32.xlu1 %v927_v6 }
 0xbcf   :  { %v1026_v7 = vpop.permute.xlu0 %1025 }
 0xbd0   :  { %1046 = vmatpush.msrb.mxu3 %v1026_v7 }
 0xbe2   :  { %945 = vrot.lane.b32.xlu1 %v3622_v12, %s3319_s1 }
 0xc31   :  { %v1009_v8 = vpop.xlane.xlu1 %1008 }
 0xc32   :  { %3221 = vrcp.f32 %v1009_v8  ;;  %v1021_v12 = vand.u32 2147483648, %v1009_v8  ;;  %v1019_v19 = vand.u32 2147483647, %v1009_v8  ;;  %vm1015_vm10 = vweird.f32 %v1009_v8 }
 0xc34   :  { %v1022_v21 = vor.u32 1.1754944e-38, %v1021_v12  ;;  %vm1020_vm12 = vcmp.eq.f32.partialorder %v1019_v19, 8.507059e+37 }
 0xc38   :  { %v3222_v13 = vpop.eup %3221 }
 0xc39   :  { %v1011_v15 = vmul.f32 %v3222_v13, %v1009_v8  ;;  %vm1016_vm7 = vweird.f32 %v3222_v13 }
 0xc3a   :  { %vm1017_vm11 = vmor %vm1015_vm10, %vm1016_vm7 }
 0xc3b   :  { %v1012_v16 = vsub.f32 1.0, %v1011_v15  ;;  %v3165_v15 = vld [vmem:[%s4710_s3 + $0xa] ss:$0 sm:$0xff] }
 0xc3c   :  { %v929_v17 = vpop.xlane.xlu1 %928 }
 0xc3d   :  { %v1013_v18 = vmul.f32 %v3222_v13, %v1012_v16  ;;  %3223 = vrcp.f32 %v929_v17  ;;  %v941_v32 = vand.u32 2147483648, %v929_v17  ;;  %vm935_vm14 = vweird.f32 %v929_v17 }
 0xc3e   :  { %v939_v33 = vand.u32 2147483647, %v929_v17 }
 0xc3f   :  { %v1014_v20 = vadd.f32 %v3222_v13, %v1013_v18  ;;  %v942_v37 = vor.u32 1.1754944e-38, %v941_v32 }
 0xc40   :  { %vm940_vm2 = vcmp.eq.f32.partialorder %v939_v33, 8.507059e+37 }
 0xc41   :  { %v1018_v23 = vsel %vm1017_vm11, %v3222_v13, %v1014_v20 }
 0xc42   :  { %v1023_v24 = vsel %vm1020_vm12, %v1022_v21, %v1018_v23 }
 0xc43   :  { %v3224_v25 = vpop.eup %3223  ;;  %v1024_v22 = vmul.f32 %v3218_v55, %v1023_v24 }
 0xc44   :  { %v931_v26 = vmul.f32 %v3224_v25, %v929_v17  ;;  %vm936_vm13 = vweird.f32 %v3224_v25  ;;  %v3166_v17 = vld [vmem:[%s4710_s3 + $0xb] ss:$0 sm:$0xff] }
 0xc45   :  { %3094 = vmatmul.msk.f32.vlgmr.msrb.gmra.mxu3 %vm154_vm9, %v1024_v22  ;;  %vm937_vm15 = vmor %vm935_vm14, %vm936_vm13  ;;  %vm1366_vm14 = vcmask 36864  }
 0xc46   :  { %v932_v27 = vsub.f32 1.0, %v931_v26 }
 0xc48   :  { %v933_v28 = vmul.f32 %v3224_v25, %v932_v27  ;;  %v884_v30 = vpop.f32.mrf.mxu3 }
 0xc49   :  { %888 = vrot.lane.b32.xlu0 %v884_v30, %s3321_s24 }
 0xc4a   :  { %v934_v31 = vadd.f32 %v3224_v25, %v933_v28 }
 0xc4c   :  { %v938_v36 = vsel %vm937_vm15, %v3224_v25, %v934_v31  ;;  %vm1347_vm15 = vcmask 254976  }
 0xc4d   :  { %v943_v38 = vsel %vm940_vm2, %v942_v37, %v938_v36  ;;  %v3118_v36 = vld [vmem:[%s4709_s2 + $0x138] sm:$0xff]  ;;  %v3117_v37 = vld [vmem:[%s4709_s2 + $0x130] sm:$0xff] }
 0xc4e   :  { %v944_v40 = vmul.f32 %v3220_v4, %v943_v38  ;;  %1222 = vmatpush.msrb.mxu1 %v3118_v36  ;;  %v3116_v38 = vld [vmem:[%s4709_s2 + $0x128] sm:$0xff] }
 0xc4f   :  { %v3169_v36 = vld [vmem:[%s4710_s3 + $0xe] ss:$0 sm:$0xff] }
 0xc50   :  { %1223 = vmatpush.msrb.mxu1 %v3117_v37 }
 0xc52   :  { %1224 = vmatpush.msrb.mxu1 %v3116_v38 }
 0xc54   :  { %v946_v29 = vpop.permute.xlu1 %945 }
 0xc55   :  { %966 = vmatpush.msra.mxu2 %v946_v29  ;;  %v3115_v29 = vld [vmem:[%s4709_s2 + $0x120] sm:$0xff] }
 0xc56   :  { %3091 = vmatmul.msk.f32.vlgmr.msra.gmra.mxu2 %vm154_vm9, %v944_v40  ;;  %v3114_v40 = vld [vmem:[%s4709_s2 + $0x118] sm:$0xff]  ;;  %1225 = vmatpush.msrb.mxu1 %v3115_v29  ;;  %v3170_v29 = vld [vmem:[%s4710_s3 + $0xf] ss:$0 sm:$0xff] }
 0xc58   :  { %1226 = vmatpush.msrb.mxu1 %v3114_v40 }
 0xc5a   :  { %1227 = vmatpush.msrb.mxu1 %v3113_v61 }
 0xcbb   :  { %v889_v41 = vpop.permute.xlu0 %888 }
 0xcbc   :  { %v891_v43 = vsel %vm126_vm8, %v3638_v52, %v889_v41  ;;  %v3112_v41 = vld [vmem:[%s4709_s2 + $0x108] sm:$0xff] }
 0xcbd   :  { %3100 = vmatmul.msk.f32.vlgmr.msrb.gmra.mxu0 %vm29_vm0, %v891_v43  ;;  %v3111_v43 = vld [vmem:[%s4709_s2 + $0x100] sm:$0xff]  ;;  %1228 = vmatpush.msrb.mxu1 %v3112_v41 }
 0xcbe   :  { %v3171_v41 = vld [vmem:[%s4711_s4 + $0x2] ss:$0 sm:$0xff] }
 0xcbf   :  { %1229 = vmatpush.msrb.mxu1 %v3111_v43 }
 0xcc8   :  { %v1048_v44 = vpop.f32.mrf.mxu3 }
 0xcc9   :  { %1052 = vrot.lane.b32.xlu2 %v1048_v44, %s3321_s24  ;;  %v3167_v44 = vld [vmem:[%s4710_s3 + $0xc] ss:$0 sm:$0xff] }
 0xcd9   :  { %v968_v42 = vpop.f32.mrf.mxu2 }
 0xd23   :  { %v1053_v45 = vpop.permute.xlu2 %1052 }
 0xd24   :  { %v1055_v46 = vsel %vm126_vm8, %v968_v42, %v1053_v45 }
 0xd25   :  { %3101 = vmatmul.msk.f32.gmra.mxu0 %vm29_vm0, %v1055_v46 }
 0xd3a   :  { %v1085_v47 = vpop.f32.mrf.mxu0 }
 0xd3b   :  { %v1086_v48 = vadd.f32 %v3164_v50, %v1085_v47 }
 0xd3d   :  { %v1091_v49 = vadd.f32 %v1086_v48, %v3588_v35 }
 0xd3f   :  { %v1095_v52 = vsel %vm29_vm0, %v1091_v49, 0.0 }
 0xd40   :  { %1096 = vadd.xlane.f32.xlu0 %v1095_v52 }
 0xda2   :  { %v1088_v51 = vpop.f32.mrf.mxu0 }
 0xda3   :  { %v1089_v53 = vadd.f32 %v3164_v50, %v1088_v51 }
 0xda5   :  { %v1092_v54 = vadd.f32 %v1089_v53, %v3616_v2  ;;  %v3107_v2 = vld [vmem:[%s4709_s2 + $0xf8] sm:$0xff]  ;;  %s3027_s2 = sshll.u32 %s4713_s6, 4  ;;  %s3013_s6 = sshll.u32 %s4712_s5, 4  ;;  %s3028_s2 = int_to_ptr.hbm [resolvable:$true] %s3027_s2  ;;  %s3014_s6 = int_to_ptr.hbm [resolvable:$true] %s3013_s6 }
 0xda6   :  { %1169 = vmatpush.msrb.mxu2 %v3107_v2  ;;  %v3168_v2 = vld [vmem:[%s4710_s3 + $0xd] ss:$0 sm:$0xff]  ;;  %s3038_s5 = sshll.u32 %s4714_s7, 4  ;;  %s3039_s5 = int_to_ptr.hbm [resolvable:$true] %s3038_s5 }
 0xda7   :  { %v1098_v34 = vsel %vm29_vm0, %v1092_v54, 0.0 }
 0xda8   :  { %1099 = vadd.xlane.f32.xlu2 %v1098_v34  ;;  %1170 = vmatpush.msrb.mxu2 %v3106_v0 }
 0xdaa   :  { %1171 = vmatpush.msrb.mxu2 %v3105_v1 }
 0xdac   :  { %1172 = vmatpush.msrb.mxu2 %v3104_v3 }
 0xdb3   :  { %v1097_v55 = vpop.xlane.xlu0 %1096 }
 0xdb4   :  { %v1101_v56 = vmul.f32 %v1097_v55, %v3378_v10 }
 0xdb6   :  { %v1103_v57 = vsub.f32 %v1091_v49, %v1101_v56 }
 0xdb8   :  { %v1105_v58 = vmul.f32 %v1103_v57, %v1103_v57 }
 0xdba   :  { %v1107_v59 = vsel %vm29_vm0, %v1105_v58, 0.0 }
 0xdbb   :  { %1108 = vadd.xlane.f32.xlu1 %v1107_v59 }
 0xe1b   :  { %v1100_v39 = vpop.xlane.xlu2 %1099 }
 0xe1c   :  { %v1102_v35 = vmul.f32 %v1100_v39, %v3378_v10 }
 0xe1e   :  { %v1104_v60 = vsub.f32 %v1092_v54, %v1102_v35 }
 0xe20   :  { %v1106_v62 = vmul.f32 %v1104_v60, %v1104_v60 }
 0xe22   :  { %v1110_v63 = vsel %vm29_vm0, %v1106_v62, 0.0 }
 0xe23   :  { %1111 = vadd.xlane.f32.xlu2 %v1110_v63 }
 0xe2e   :  { %v1109_v5 = vpop.xlane.xlu1 %1108 }
 0xe2f   :  { %v1113_v4 = vmul.f32 %v1109_v5, %v3378_v10 }
 0xe31   :  { %v1115_v6 = vadd.f32 1e-12, %v1113_v4 }
 0xe33   :  { %3225 = vrsqrt.f32 %v1115_v6  ;;  %vm1123_vm9 = vweird.f32 %v1115_v6 }
 0xe39   :  { %v3226_v7 = vpop.eup %3225 }
 0xe3a   :  { %v1118_v8 = vmul.f32 %v3226_v7, %v1115_v6  ;;  %vm1124_vm8 = vweird.f32 %v3226_v7 }
 0xe3b   :  { %vm1125_vm3 = vmor %vm1123_vm9, %vm1124_vm8  ;;  %vm1533_vm9 = vcmask 1041409  }
 0xe3c   :  { %v1119_v9 = vmul.f32 %v3226_v7, %v1118_v8 }
 0xe3e   :  { %v1120_v11 = vmul.f32 0.5, %v1119_v9 }
 0xe40   :  { %v1121_v13 = vsub.f32 1.5, %v1120_v11 }
 0xe42   :  { %v1122_v14 = vmul.f32 %v3226_v7, %v1121_v13 }
 0xe44   :  { %v1126_v16 = vsel %vm1125_vm3, %v3226_v7, %v1122_v14  ;;  %vm1535_vm3 = vcmask 1042434  }
 0xe45   :  { %v1137_v12 = vmul.f32 %v1126_v16, %v1103_v57 }
 0xe47   :  { %v1140_v18 = vmul.f32 %v3165_v15, %v1137_v12 }
 0xe49   :  { %v3705_v19 = vadd.f32 %v3166_v17, %v1140_v18 }
 0xe4b   :  { %3109 = vmatmul.msk.f32.vlgmr.msrb.gmra.mxu2 %vm29_vm0, %v3705_v19 }
 0xe96   :  { %v1112_v20 = vpop.xlane.xlu2 %1111 }
 0xe97   :  { %v1114_v21 = vmul.f32 %v1112_v20, %v3378_v10  ;;  %v1296_v20 = vld [vmem:[%s4711_s4 + $0x28] sm:$0xff] }
 0xe98   :  { %1315 = vmatpush.msra.mxu3 %v1296_v20 }
 0xe99   :  { %v1116_v23 = vadd.f32 1e-12, %v1114_v21  ;;  %v1295_v21 = vld [vmem:[%s4711_s4 + $0x20] sm:$0xff] }
 0xe9a   :  { %1316 = vmatpush.msra.mxu3 %v1295_v21 }
 0xe9b   :  { %3227 = vrsqrt.f32 %v1116_v23  ;;  %vm1133_vm5 = vweird.f32 %v1116_v23 }
 0xea1   :  { %v3228_v24 = vpop.eup %3227 }
 0xea2   :  { %v1128_v25 = vmul.f32 %v3228_v24, %v1116_v23  ;;  %vm1134_vm4 = vweird.f32 %v3228_v24  ;;  %v1294_v23 = vld [vmem:[%s4711_s4 + $0x18] sm:$0xff] }
 0xea3   :  { %vm1135_vm6 = vmor %vm1133_vm5, %vm1134_vm4  ;;  %1317 = vmatpush.msra.mxu3 %v1294_v23  ;;  %vm1537_vm4 = vcmask 1043459   ;;  %vm1539_vm5 = vcmask 1044484  }
 0xea4   :  { %v1129_v22 = vmul.f32 %v3228_v24, %v1128_v25 }
 0xea6   :  { %v1130_v26 = vmul.f32 0.5, %v1129_v22 }
 0xea8   :  { %v1131_v27 = vsub.f32 1.5, %v1130_v26 }
 0xeaa   :  { %v1132_v28 = vmul.f32 %v3228_v24, %v1131_v27 }
 0xeac   :  { %v1136_v30 = vsel %vm1135_vm6, %v3228_v24, %v1132_v28  ;;  %v1293_v24 = vld [vmem:[%s4711_s4 + $0x10] sm:$0xff] }
 0xead   :  { %v1138_v31 = vmul.f32 %v1136_v30, %v1104_v60  ;;  %1318 = vmatpush.msra.mxu3 %v1293_v24 }
 0xeaf   :  { %v1141_v32 = vmul.f32 %v3165_v15, %v1138_v31 }
 0xeb1   :  { %v1144_v33 = vadd.f32 %v3166_v17, %v1141_v32 }
 0xeb3   :  { %3110 = vmatmul.msk.f32.gmra.mxu2 %vm29_vm0, %v1144_v33 }
 0xece   :  { %v1174_v42 = vpop.f32.mrf.mxu2 }
 0xecf   :  { %v1175_v45 = vadd.f32 %v3167_v44, %v1174_v42 }
 0xed1   :  { %v1182_v46 = vmul.f32 0.044715, %v1175_v45  ;;  %v1180_v51 = vmul.f32 0.5, %v1175_v45 }
 0xed3   :  { %v1184_v50 = vmul.f32 %v1182_v46, %v1175_v45 }
 0xed5   :  { %v1186_v47 = vmul.f32 %v1184_v50, %v1175_v45 }
 0xed7   :  { %v1188_v48 = vadd.f32 %v1186_v47, %v1175_v45 }
 0xed9   :  { %v1190_v49 = vmul.f32 0.7978846, %v1188_v48 }
 0xedb   :  { %3229 = vtanh.f32 %v1190_v49 }
 0xee1   :  { %v3230_v52 = vpop.eup %3229 }
 0xee2   :  { %v1194_v53 = vadd.f32 1.0, %v3230_v52 }
 0xee4   :  { %v1196_v54 = vmul.f32 %v1194_v53, %v1180_v51 }
 0xee6   :  { %3120 = vmatmul.msk.f32.vlgmr.msrb.gmra.mxu1 %vm607_vm1, %v1196_v54  ;;  %v1373_v54 = vlaneseq }
 0xf36   :  { %v1177_v34 = vpop.f32.mrf.mxu2 }
 0xf37   :  { %v1178_v55 = vadd.f32 %v3167_v44, %v1177_v34 }
 0xf39   :  { %v1183_v56 = vmul.f32 0.044715, %v1178_v55  ;;  %v1181_v60 = vmul.f32 0.5, %v1178_v55 }
 0xf3b   :  { %v1185_v57 = vmul.f32 %v1183_v56, %v1178_v55 }
 0xf3d   :  { %v1187_v58 = vmul.f32 %v1185_v57, %v1178_v55 }
 0xf3f   :  { %v1189_v59 = vadd.f32 %v1187_v58, %v1178_v55  ;;  %v3775_v55 = vshrl.u32 %v1373_v54, 7 }
 0xf41   :  { %v1191_v39 = vmul.f32 0.7978846, %v1189_v59  ;;  %3142 = vset.pattern.permute.xlu0 %v3775_v55  ;;  %3143 = vset.pattern.permute.xlu2 %v3775_v55 }
 0xf42   :  { %3141 = vset.pattern.permute.xlu1 %v3775_v55 }
 0xf43   :  { %3231 = vtanh.f32 %v1191_v39 }
 0xf49   :  { %v3232_v35 = vpop.eup %3231 }
 0xf4a   :  { %v1195_v62 = vadd.f32 1.0, %v3232_v35  ;;  %v3792_v35 = vand.u32 127, %v1373_v54 }
 0xf4c   :  { %v1197_v63 = vmul.f32 %v1195_v62, %v1181_v60  ;;  %v3172_v62 = vld [vmem:[%s4711_s4 + $0x3] ss:$0 sm:$0xff] }
 0xf4e   :  { %3121 = vmatmul.msk.f32.gmra.mxu1 %vm607_vm1, %v1197_v63 }
 0xf63   :  { %v1231_v0 = vpop.f32.mrf.mxu1 }
 0xf64   :  { %v1232_v1 = vadd.f32 %v3168_v2, %v1231_v0 }
 0xf66   :  { %v1237_v3 = vadd.f32 %v1232_v1, %v3705_v19 }
 0xf68   :  { %v1241_v5 = vsel %vm29_vm0, %v1237_v3, 0.0 }
 0xf69   :  { %1242 = vadd.xlane.f32.xlu0 %v1241_v5 }
 0xfcb   :  { %v1234_v4 = vpop.f32.mrf.mxu1 }
 0xfcc   :  { %v1235_v6 = vadd.f32 %v3168_v2, %v1234_v4 }
 0xfce   :  { %v1238_v7 = vadd.f32 %v1235_v6, %v1144_v33 }
 0xfd0   :  { %v1244_v8 = vsel %vm29_vm0, %v1238_v7, 0.0 }
 0xfd1   :  { %1245 = vadd.xlane.f32.xlu1 %v1244_v8 }
 0xfdc   :  { %v1243_v9 = vpop.xlane.xlu0 %1242 }
 0xfdd   :  { %v1247_v11 = vmul.f32 %v1243_v9, %v3378_v10 }
 0xfdf   :  { %v1249_v13 = vsub.f32 %v1237_v3, %v1247_v11 }
 0xfe1   :  { %v1251_v14 = vmul.f32 %v1249_v13, %v1249_v13 }
 0xfe3   :  { %v1253_v15 = vsel %vm29_vm0, %v1251_v14, 0.0 }
 0xfe4   :  { %1254 = vadd.xlane.f32.xlu2 %v1253_v15 }
 0xfea   :  { %1338 = vrot.lane.b32.xlu1 %v3171_v41, %s3322_s25 }
0x1044   :  { %v1246_v16 = vpop.xlane.xlu1 %1245 }
0x1045   :  { %v1248_v12 = vmul.f32 %v1246_v16, %v3378_v10 }
0x1047   :  { %v1250_v17 = vsub.f32 %v1238_v7, %v1248_v12 }
0x1049   :  { %v1252_v18 = vmul.f32 %v1250_v17, %v1250_v17 }
0x104b   :  { %v1256_v19 = vsel %vm29_vm0, %v1252_v18, 0.0 }
0x104c   :  { %1257 = vadd.xlane.f32.xlu0 %v1256_v19 }
0x1057   :  { %v1255_v25 = vpop.xlane.xlu2 %1254 }
0x1058   :  { %v1259_v22 = vmul.f32 %v1255_v25, %v3378_v10 }
0x105a   :  { %v1261_v26 = vadd.f32 1e-12, %v1259_v22 }
0x105c   :  { %3233 = vrsqrt.f32 %v1261_v26  ;;  %vm1269_vm7 = vweird.f32 %v1261_v26 }
0x1062   :  { %v3234_v27 = vpop.eup %3233 }
0x1063   :  { %v1264_v28 = vmul.f32 %v3234_v27, %v1261_v26  ;;  %vm1270_vm1 = vweird.f32 %v3234_v27 }
0x1064   :  { %vm1271_vm10 = vmor %vm1269_vm7, %vm1270_vm1 }
0x1065   :  { %v1265_v30 = vmul.f32 %v3234_v27, %v1264_v28 }
0x1067   :  { %v1266_v31 = vmul.f32 0.5, %v1265_v30 }
0x1069   :  { %v1267_v32 = vsub.f32 1.5, %v1266_v31 }
0x106b   :  { %v1268_v33 = vmul.f32 %v3234_v27, %v1267_v32 }
0x106d   :  { %v1272_v37 = vsel %vm1271_vm10, %v3234_v27, %v1268_v33 }
0x106e   :  { %v1283_v38 = vmul.f32 %v1272_v37, %v1249_v13  ;;  %v3173_v37 = vld [vmem:[%s4711_s4 + $0x4] ss:$0 sm:$0xff] }
0x1070   :  { %v1286_v40 = vmul.f32 %v3169_v36, %v1283_v38  ;;  %v1339_v38 = vpop.permute.xlu1 %1338 }
0x1072   :  { %v1289_v61 = vadd.f32 %v3170_v29, %v1286_v40 }
0x1074   :  { %3124 = vmatmul.msk.f32.vlgmr.msra.gmra.mxu3 %vm29_vm0, %v1289_v61  ;;  %1291 = vst.msk [vmem:[#allocation2] sm:$0xff] %vm29_vm0, %v1289_v61 }
0x10bf   :  { %v1258_v43 = vpop.xlane.xlu0 %1257 }
0x10c0   :  { %v1260_v44 = vmul.f32 %v1258_v43, %v3378_v10  ;;  %v3783_v10 = vld [vmem:[%s4711_s4 + $0x6] sm:$0x1f] }
0x10c1   :  { %v1440_v56 = vperm.slane %v3783_v10, 1  ;;  %v1461_v57 = vperm.slane %v3783_v10, 4  ;;  %v1433_v58 = vperm.slane %v3783_v10, 0  ;;  %v1447_v59 = vperm.slane %v3783_v10, 2 }
0x10c2   :  { %v1262_v42 = vadd.f32 1e-12, %v1260_v44  ;;  %v1454_v39 = vperm.slane %v3783_v10, 3 }
0x10c3   :  { %1445 = vperm.xlu0 %3142, %v1440_v56   ;;  %1466 = vperm.xlu2 %3143, %v1461_v57  }
0x10c4   :  { %3235 = vrsqrt.f32 %v1262_v42  ;;  %vm1279_vm12 = vweird.f32 %v1262_v42  ;;  %1438 = vperm.xlu1 %3141, %v1433_v58  }
0x10ca   :  { %v3236_v45 = vpop.eup %3235 }
0x10cb   :  { %v1274_v46 = vmul.f32 %v3236_v45, %v1262_v42  ;;  %vm1280_vm11 = vweird.f32 %v3236_v45  ;;  %1452 = vperm.xlu0 %3142, %v1447_v59  }
0x10cc   :  { %vm1281_vm13 = vmor %vm1279_vm12, %vm1280_vm11 }
0x10cd   :  { %v1275_v50 = vmul.f32 %v3236_v45, %v1274_v46 }
0x10cf   :  { %v1276_v47 = vmul.f32 0.5, %v1275_v50 }
0x10d1   :  { %v1277_v48 = vsub.f32 1.5, %v1276_v47 }
0x10d3   :  { %v1278_v49 = vmul.f32 %v3236_v45, %v1277_v48  ;;  %1459 = vperm.xlu0 %3142, %v1454_v39   ;;  %v3324_v39 = vmov 0  }
0x10d5   :  { %v1282_v52 = vsel %vm1281_vm13, %v3236_v45, %v1278_v49 }
0x10d6   :  { %v1284_v51 = vmul.f32 %v1282_v52, %v1250_v17 }
0x10d8   :  { %v1287_v53 = vmul.f32 %v3169_v36, %v1284_v51 }
0x10da   :  { %v1290_v34 = vadd.f32 %v3170_v29, %v1287_v53 }
0x10db   :  { %1589 = vperm.xlu0 %3142, %v3792_v35  }
0x10dc   :  { %1292 = vst.msk [vmem:[#allocation2 + $0x8] sm:$0xff] %vm29_vm0, %v1290_v34  ;;  %3125 = vmatmul.msk.f32.gmra.mxu3 %vm29_vm0, %v1290_v34  ;;  %vm1333_vm0 = vcmask 1040384  }
0x10dd   :  { %3019 = dma.vmem_to_hbm [thread:$0]  %s3012_s12, 256, %s3014_s6, [#allocation3], %s3327_s15, %s3327_s15, %s3328_s16  }
0x10f7   :  { %v1320_v60 = vpop.f32.mrf.mxu3 }
0x10f8   :  { %v1328_v63 = vadd.f32 %v3172_v62, %v1320_v60 }
0x10fa   :  { %v1410_v1 = vrot.slane %v1328_v63, 1  ;;  %v2339_v5 = vrot.slane %v1328_v63, 5  ;;  %v1679_v13 = vrot.slane %v1328_v63, 2  ;;  %v2559_v14 = vrot.slane %v1328_v63, 6 }
0x10fb   :  { %v2779_v12 = vrot.slane %v1328_v63, 7  ;;  %v1899_v25 = vrot.slane %v1328_v63, 3  ;;  %v2119_v30 = vrot.slane %v1328_v63, 4 }
0x111d   :  { %v3818_v52 = vpop.permute.xlu2 %1466 }
0x1135   :  { %v3824_v34 = vpop.permute.xlu0 %1445 }
0x113d   :  { %v3828_v57 = vpop.permute.xlu0 %1452 }
0x1145   :  { %v3832_v59 = vpop.permute.xlu0 %1459 }
0x115f   :  { %v1323_v2 = vpop.f32.mrf.mxu3 }
0x1160   :  { %v1329_v0 = vadd.f32 %v3172_v62, %v1323_v2  ;;  %v1331_v32 = vrot.slane %v1323_v2, 7  ;;  %v3839_v62 = vpop.permute.xlu0 %1589 }
0x1162   :  { %v1412_v3 = vsel %vm1333_vm0, %v1410_v1, %v1329_v0  ;;  %v2341_v4 = vrot.slane %v1329_v0, 4  ;;  %v1681_v9 = vrot.slane %v1329_v0, 1  ;;  %v2561_v16 = vrot.slane %v1329_v0, 5 }
0x1163   :  { %v1421_v6 = vperm.slane %v1412_v3, 1  ;;  %v1414_v7 = vperm.slane %v1412_v3, 0  ;;  %v2781_v17 = vrot.slane %v1329_v0, 6  ;;  %v1901_v23 = vrot.slane %v1329_v0, 2  ;;  %v3843_v3 = vpop.permute.xlu1 %1438 }
0x1164   :  { %v2343_v8 = vsel %vm1333_vm0, %v2339_v5, %v2341_v4  ;;  %v1683_v15 = vsel %vm1333_vm0, %v1679_v13, %v1681_v9  ;;  %v3802_v18 = vsel %vm1333_vm0, %v2559_v14, %v2561_v16  ;;  %v2121_v28 = vrot.slane %v1329_v0, 3 }
0x1165   :  { %1426 = vperm.xlu2 %3143, %v1421_v6   ;;  %1419 = vperm.xlu0 %3142, %v1414_v7   ;;  %v2345_v11 = vperm.slane %v2343_v8, 0  ;;  %v3805_v19 = vsel %vm1333_vm0, %v2779_v12, %v2781_v17  ;;  %v1692_v20 = vperm.slane %v1683_v15, 1  ;;  %v1685_v21 = vperm.slane %v1683_v15, 0 }
0x1166   :  { %v2352_v24 = vperm.slane %v2343_v8, 1  ;;  %v1903_v22 = vsel %vm1333_vm0, %v1899_v25, %v1901_v23  ;;  %v2123_v31 = vsel %vm1333_vm0, %v2119_v30, %v2121_v28  ;;  %v1353_v36 = vrot.slane %v1329_v0, 7 }
0x1167   :  { %2350 = vperm.xlu1 %3141, %v2345_v11   ;;  %v1905_v26 = vperm.slane %v1903_v22, 0  ;;  %v1912_v27 = vperm.slane %v1903_v22, 1  ;;  %v2125_v33 = vperm.slane %v2123_v31, 0  ;;  %v1334_v29 = vsel %vm1333_vm0, %v1320_v60, %v1331_v32 }
0x1168   :  { %v1355_v40 = vsel %vm1333_vm0, %v1328_v63, %v1353_v36  ;;  %v1341_v61 = vadd.f32 %v1339_v38, %v1334_v29  ;;  %v2132_v43 = vperm.slane %v2123_v31, 1 }
0x1169   :  { %v1357_v41 = vadd.f32 %v3173_v37, %v1355_v40 }
0x116a   :  { %3237 = vtanh.f32 %v1341_v61 }
0x116b   :  { %v1360_v44 = vperm.slane %v1357_v41, 0  ;;  %v1359_v45 = vrot.slane %v1357_v41, 1 }
0x116d   :  { %1697 = vperm.xlu2 %3143, %v1692_v20   ;;  %1690 = vperm.xlu0 %3142, %v1685_v21   ;;  %v1364_v42 = vadd.f32 %v1360_v44, %v3783_v10  ;;  %v1361_v47 = vperm.slane %v1359_v45, 0 }
0x116f   :  { %2357 = vperm.xlu1 %3141, %v2352_v24   ;;  %v1367_v50 = vsel %vm1366_vm14, %v1364_v42, -inf  ;;  %v1365_v48 = vadd.f32 %v1361_v47, %v3783_v10 }
0x1170   :  { %v3238_v46 = vpop.eup %3237 }
0x1171   :  { %v1370_v49 = vsel %vm1366_vm14, %v1365_v48, -inf }
0x1175   :  { %1910 = vperm.xlu2 %3143, %v1905_v26   ;;  %3145 = vset.pattern.permute.xlu0 %v3324_v39 }
0x1177   :  { %3144 = vset.pattern.permute.xlu1 %v3324_v39 }
0x117d   :  { %1917 = vperm.xlu2 %3143, %v1912_v27  }
0x1185   :  { %2130 = vperm.xlu2 %3143, %v2125_v33  }
0x118d   :  { %2137 = vperm.xlu2 %3143, %v2132_v43  }
0x1195   :  { %1344 = vrot.lane.b32.xlu2 %v3238_v46, %s3323_s28 }
0x1196   :  { %3146 = vset.pattern.permute.xlu2 %v3324_v39 }
0x1197   :  { %1368 = vmax.xlane.f32.xlu0 %v1367_v50 }
0x119f   :  { %1371 = vmax.xlane.f32.xlu0 %v1370_v49 }
0x11bf   :  { %v1427_v51 = vpop.permute.xlu2 %1426 }
0x11c7   :  { %v3820_v53 = vpop.permute.xlu2 %1697 }
0x11cf   :  { %v3822_v54 = vpop.permute.xlu2 %1910 }
0x11d7   :  { %v3826_v56 = vpop.permute.xlu2 %1917  ;;  %v1420_v63 = vpop.permute.xlu0 %1419 }
0x11d9   :  { %v3889_v27 = vpop.permute.xlu1 %2350 }
0x11df   :  { %v3830_v58 = vpop.permute.xlu2 %2130  ;;  %v3841_v2 = vpop.permute.xlu0 %1690 }
0x11e1   :  { %v3891_v28 = vpop.permute.xlu1 %2357 }
0x11e7   :  { %v3834_v10 = vpop.permute.xlu2 %2137 }
0x11ef   :  { %v1345_v60 = vpop.permute.xlu2 %1344 }
0x11f0   :  { %1348 = vst.msk [vmem:[#allocation4] sm:$0x3] %vm1347_vm15, %v1345_v60 }
0x11f1   :  { %3030 = dma.vmem_to_hbm [thread:$0]  %s3026_s10, 32, %s3028_s2, [#allocation5]  }
0x120a   :  { %v1369_v0 = vpop.xlane.xlu0 %1368 }
0x120b   :  { %v1430_v1 = vadd.f32 %v1420_v63, %v1369_v0  ;;  %vm1375_vm8 = vcmp.eq.f32.partialorder %v1364_v42, %v1369_v0 }
0x120c   :  { %v1377_v20 = vsel %vm1375_vm8, %v3792_v35, 1000000000 }
0x120d   :  { %v3846_v5 = vadd.f32 %v3828_v57, %v1430_v1  ;;  %v3849_v4 = vadd.f32 %v3824_v34, %v1430_v1  ;;  %v3852_v6 = vadd.f32 %v3843_v3, %v1430_v1  ;;  %v3858_v9 = vadd.f32 %v3818_v52, %v1430_v1 }
0x120e   :  { %v3864_v13 = vadd.f32 %v3832_v59, %v1430_v1  ;;  %v1379_v23 = vsel %vm1366_vm14, %v1377_v20, 2147483647 }
0x120f   :  { %1500 = vperm.xlu2 %3146, %v3846_v5   ;;  %1497 = vperm.xlu0 %3145, %v3849_v4   ;;  %v1381_v25 = vshra.s32 %v1379_v23, 16  ;;  %v1380_v60 = vand.u32 65535, %v1379_v23 }
0x1210   :  { %1494 = vperm.xlu1 %3144, %v3852_v6  }
0x1211   :  { %v1383_v26 = vcvt.s32.f32 %v1381_v25 }
0x1212   :  { %v1372_v7 = vpop.xlane.xlu0 %1371 }
0x1213   :  { %v1431_v8 = vadd.f32 %v1427_v51, %v1372_v7  ;;  %vm1376_vm2 = vcmp.eq.f32.partialorder %v1365_v48, %v1372_v7 }
0x1214   :  { %v1378_v17 = vsel %vm1376_vm2, %v3792_v35, 1000000000 }
0x1215   :  { %v3861_v11 = vadd.f32 %v3824_v34, %v1431_v8  ;;  %v3870_v14 = vadd.f32 %v3828_v57, %v1431_v8  ;;  %v3873_v15 = vadd.f32 %v3818_v52, %v1431_v8  ;;  %v3876_v16 = vadd.f32 %v3843_v3, %v1431_v8 }
0x1216   :  { %v3882_v12 = vadd.f32 %v3832_v59, %v1431_v8  ;;  %v1394_v21 = vsel %vm1366_vm14, %v1378_v17, 2147483647 }
0x1217   :  { %1506 = vperm.xlu2 %3146, %v3858_v9   ;;  %1512 = vperm.xlu0 %3145, %v3861_v11   ;;  %v1396_v24 = vshra.s32 %v1394_v21, 16  ;;  %v1395_v49 = vand.u32 65535, %v1394_v21 }
0x1218   :  { %1503 = vperm.xlu1 %3144, %v3864_v13  }
0x1219   :  { %v1398_v22 = vcvt.s32.f32 %v1396_v24  ;;  %v1397_v7 = vcvt.s32.f32 %v1395_v49  ;;  %v1382_v24 = vcvt.s32.f32 %v1380_v60 }
0x121f   :  { %1515 = vperm.xlu2 %3146, %v3870_v14   ;;  %1521 = vperm.xlu0 %3145, %v3873_v15  }
0x1220   :  { %1509 = vperm.xlu1 %3144, %v3876_v16  }
0x1228   :  { %1518 = vperm.xlu1 %3144, %v3882_v12  }
0x1248   :  { %1399 = vmin.xlane.f32.xlu2 %v1398_v22 }
0x1249   :  { %1384 = vmin.xlane.f32.xlu0 %v1383_v26 }
0x1269   :  { %v1501_v30 = vpop.permute.xlu2 %1500 }
0x126a   :  { %v1525_v29 = vperm.slane %v1501_v30, %v3792_v35 }
0x1271   :  { %v1507_v37 = vpop.permute.xlu2 %1506 }
0x1272   :  { %v1527_v41 = vperm.slane %v1507_v37, %v3792_v35 }
0x1279   :  { %v1516_v47 = vpop.permute.xlu2 %1515 }
0x127a   :  { %v1530_v21 = vperm.slane %v1516_v47, %v3792_v35 }
0x1281   :  { %v1498_v32 = vpop.permute.xlu0 %1497 }
0x1282   :  { %v1495_v31 = vpop.permute.xlu1 %1494  ;;  %v1524_v36 = vperm.slane %v1498_v32, %v3792_v35 }
0x1283   :  { %v1523_v33 = vperm.slane %v1495_v31, %v3792_v35 }
0x1285   :  { %v1534_v38 = vsel %vm1533_vm9, %v1524_v36, %v1523_v33 }
0x1286   :  { %v1536_v43 = vsel %vm1535_vm3, %v1525_v29, %v1534_v38 }
0x1289   :  { %v1513_v46 = vpop.permute.xlu0 %1512 }
0x128a   :  { %v1504_v40 = vpop.permute.xlu1 %1503  ;;  %v1529_v0 = vperm.slane %v1513_v46, %v3792_v35 }
0x128b   :  { %v1526_v61 = vperm.slane %v1504_v40, %v3792_v35 }
0x128d   :  { %v1538_v44 = vsel %vm1537_vm4, %v1526_v61, %v1536_v43 }
0x128e   :  { %v1540_v42 = vsel %vm1539_vm5, %v1527_v41, %v1538_v44 }
0x128f   :  { %v1547_v45 = vsel %vm1366_vm14, %v1540_v42, -inf }
0x1290   :  { %1548 = vmax.xlane.f32.xlu2 %v1547_v45 }
0x1291   :  { %v1522_v48 = vpop.permute.xlu0 %1521 }
0x1292   :  { %v1510_v50 = vpop.permute.xlu1 %1509  ;;  %v1532_v32 = vperm.slane %v1522_v48, %v3792_v35 }
0x1293   :  { %v1528_v51 = vperm.slane %v1510_v50, %v3792_v35 }
0x1295   :  { %v1541_v8 = vsel %vm1533_vm9, %v1529_v0, %v1528_v51 }
0x1296   :  { %v1542_v30 = vsel %vm1535_vm3, %v1530_v21, %v1541_v8 }
0x129a   :  { %v1519_v63 = vpop.permute.xlu1 %1518 }
0x129b   :  { %v1531_v17 = vperm.slane %v1519_v63, %v3792_v35 }
0x129d   :  { %v1543_v31 = vsel %vm1537_vm4, %v1531_v17, %v1542_v30 }
0x129e   :  { %v1544_v33 = vsel %vm1539_vm5, %v1532_v32, %v1543_v31 }
0x129f   :  { %v1550_v36 = vsel %vm1366_vm14, %v1544_v33, -inf }
0x12bb   :  { %v3905_v1 = vpop.xlane.xlu2 %1399 }
0x12bc   :  { %4719 = vst [vmem:[#allocation9_spill] sm:$0xff] %v3905_v1  ;;  %v3909_v20 = vpop.xlane.xlu0 %1384  ;;  %vm1401_vm6 = vcmp.eq.f32.partialorder %v1398_v22, %v3905_v1 }
0x12bd   :  { %4720 = vst [vmem:[#allocation10_spill] sm:$0xff] %v3909_v20  ;;  %v1402_v25 = vsel %vm1401_vm6, %v1397_v7, inf  ;;  %vm1386_vm1 = vcmp.eq.f32.partialorder %v1383_v26, %v3909_v20 }
0x12be   :  { %1403 = vmin.xlane.f32.xlu0 %v1402_v25  ;;  %v1387_v23 = vsel %vm1386_vm1, %v1382_v24, inf }
0x12bf   :  { %1388 = vmin.xlane.f32.xlu1 %v1387_v23 }
0x12c7   :  { %1551 = vmax.xlane.f32.xlu1 %v1550_v36 }
0x1303   :  { %v1549_v22 = vpop.xlane.xlu2 %1548 }
0x1304   :  { %v1557_v37 = vperm.slane %v1549_v22, 2  ;;  %v1555_v38 = vperm.slane %v1549_v22, 0  ;;  %v1558_v29 = vperm.slane %v1549_v22, 3  ;;  %v1556_v41 = vperm.slane %v1549_v22, 1 }
0x1305   :  { %v1701_v43 = vadd.f32 %v3841_v2, %v1549_v22  ;;  %v1559_v44 = vperm.slane %v1549_v22, 4 }
0x1306   :  { %vm1577_vm7 = vcmp.eq.f32.partialorder %v3846_v5, %v1557_v37  ;;  %vm1575_vm10 = vcmp.eq.f32.partialorder %v3852_v6, %v1555_v38  ;;  %vm1578_vm11 = vcmp.eq.f32.partialorder %v3864_v13, %v1558_v29  ;;  %vm1576_vm12 = vcmp.eq.f32.partialorder %v3849_v4, %v1556_v41 }
0x1307   :  { %v1593_v26 = vsel %vm1577_vm7, %v3839_v62, 1000000000  ;;  %v1591_v40 = vsel %vm1575_vm10, %v3839_v62, 1000000000  ;;  %v1594_v61 = vsel %vm1578_vm11, %v3839_v62, 1000000000  ;;  %v3928_v5 = vadd.f32 %v1701_v43, %v3828_v57 }
0x1308   :  { %1608 = vperm.xlu2 %3146, %v1593_v26   ;;  %1602 = vperm.xlu0 %3145, %v1591_v40   ;;  %v1592_v6 = vsel %vm1576_vm12, %v3839_v62, 1000000000  ;;  %v3932_v13 = vadd.f32 %v1701_v43, %v3843_v3  ;;  %vm1579_vm13 = vcmp.eq.f32.partialorder %v3858_v9, %v1559_v44  ;;  %v3938_v2 = vadd.f32 %v1701_v43, %v3832_v59 }
0x1309   :  { %1611 = vperm.xlu1 %3144, %v1594_v61   ;;  %v1595_v4 = vsel %vm1579_vm13, %v3839_v62, 1000000000  ;;  %v3943_v42 = vadd.f32 %v1701_v43, %v3824_v34  ;;  %v3947_v45 = vadd.f32 %v1701_v43, %v3818_v52 }
0x1310   :  { %1730 = vperm.xlu2 %3146, %v3928_v5   ;;  %1605 = vperm.xlu0 %3145, %v1592_v6  }
0x1311   :  { %1724 = vperm.xlu1 %3144, %v3932_v13  }
0x1318   :  { %1733 = vperm.xlu2 %3146, %v3938_v2   ;;  %1614 = vperm.xlu0 %3145, %v1595_v4  }
0x1320   :  { %1727 = vperm.xlu0 %3145, %v3943_v42  }
0x1328   :  { %1736 = vperm.xlu0 %3145, %v3947_v45  }
0x1331   :  { %v3983_v17 = vpop.xlane.xlu0 %1403 }
0x1332   :  { %v3950_v46 = vpop.xlane.xlu1 %1388  ;;  %4722 = vst [vmem:[#allocation12_spill] sm:$0xff] %v3983_v17 }
0x1333   :  { %4721 = vst [vmem:[#allocation11_spill] sm:$0xff] %v3950_v46 }
0x133a   :  { %v1552_v9 = vpop.xlane.xlu1 %1551 }
0x133b   :  { %v1563_v50 = vperm.slane %v1552_v9, 3  ;;  %v1562_v47 = vperm.slane %v1552_v9, 2  ;;  %v1560_v48 = vperm.slane %v1552_v9, 0  ;;  %v1564_v63 = vperm.slane %v1552_v9, 4 }
0x133c   :  { %v1561_v0 = vperm.slane %v1552_v9, 1  ;;  %v1702_v7 = vadd.f32 %v3820_v53, %v1552_v9 }
0x133d   :  { %vm1583_vm0 = vcmp.eq.f32.partialorder %v3882_v12, %v1563_v50  ;;  %vm1582_vm15 = vcmp.eq.f32.partialorder %v3870_v14, %v1562_v47  ;;  %vm1580_vm2 = vcmp.eq.f32.partialorder %v3876_v16, %v1560_v48  ;;  %vm1584_vm8 = vcmp.eq.f32.partialorder %v3873_v15, %v1564_v63 }
0x133e   :  { %v1599_v49 = vsel %vm1583_vm0, %v3839_v62, 1000000000  ;;  %v1598_v51 = vsel %vm1582_vm15, %v3839_v62, 1000000000  ;;  %v1596_v60 = vsel %vm1580_vm2, %v3839_v62, 1000000000  ;;  %vm1581_vm6 = vcmp.eq.f32.partialorder %v3861_v11, %v1561_v0 }
0x133f   :  { %1626 = vperm.xlu1 %3144, %v1599_v49   ;;  %1623 = vperm.xlu2 %3146, %v1598_v51   ;;  %v3962_v14 = vadd.f32 %v1702_v7, %v3843_v3  ;;  %v1600_v16 = vsel %vm1584_vm8, %v3839_v62, 1000000000  ;;  %v1597_v12 = vsel %vm1581_vm6, %v3839_v62, 1000000000  ;;  %v3968_v8 = vadd.f32 %v1702_v7, %v3824_v34 }
0x1340   :  { %1617 = vperm.xlu0 %3145, %v1596_v60   ;;  %v3971_v53 = vadd.f32 %v1702_v7, %v3818_v52  ;;  %v3976_v11 = vadd.f32 %v1702_v7, %v3828_v57  ;;  %v3980_v15 = vadd.f32 %v1702_v7, %v3832_v59 }
0x1347   :  { %1629 = vperm.xlu1 %3144, %v1600_v16   ;;  %1739 = vperm.xlu2 %3146, %v3962_v14  }
0x1348   :  { %1620 = vperm.xlu0 %3145, %v1597_v12  }
0x134f   :  { %1742 = vperm.xlu1 %3144, %v3968_v8   ;;  %1751 = vperm.xlu2 %3146, %v3971_v53  }
0x1357   :  { %1745 = vperm.xlu1 %3144, %v3976_v11  }
0x135f   :  { %1748 = vperm.xlu1 %3144, %v3980_v15  }
0x1362   :  { %v1609_v25 = vpop.permute.xlu2 %1608 }
0x1363   :  { %v1633_v32 = vperm.slane %v1609_v25, %v3792_v35 }
0x136a   :  { %v1731_v26 = vpop.permute.xlu2 %1730 }
0x136b   :  { %v1755_v47 = vperm.slane %v1731_v26, %v3792_v35 }
0x1372   :  { %v1734_v48 = vpop.permute.xlu2 %1733 }
0x1373   :  { %v1756_v51 = vperm.slane %v1734_v48, %v3792_v35 }
0x137a   :  { %v1603_v24 = vpop.permute.xlu0 %1602 }
0x137b   :  { %v1631_v30 = vperm.slane %v1603_v24, %v3792_v35  ;;  %v1612_v33 = vpop.permute.xlu1 %1611 }
0x137c   :  { %v1634_v22 = vperm.slane %v1612_v33, %v3792_v35 }
0x1382   :  { %v1606_v21 = vpop.permute.xlu0 %1605 }
0x1383   :  { %v1632_v23 = vperm.slane %v1606_v21, %v3792_v35  ;;  %v1725_v43 = vpop.permute.xlu1 %1724 }
0x1384   :  { %v1753_v9 = vperm.slane %v1725_v43, %v3792_v35 }
0x1385   :  { %v1641_v31 = vsel %vm1533_vm9, %v1632_v23, %v1631_v30 }
0x1386   :  { %v1642_v36 = vsel %vm1535_vm3, %v1633_v32, %v1641_v31 }
0x1387   :  { %v1643_v29 = vsel %vm1537_vm4, %v1634_v22, %v1642_v36 }
0x138a   :  { %v1615_v37 = vpop.permute.xlu0 %1614 }
0x138b   :  { %v1635_v38 = vperm.slane %v1615_v37, %v3792_v35 }
0x138d   :  { %v1644_v40 = vsel %vm1539_vm5, %v1635_v38, %v1643_v29 }
0x138e   :  { %v1649_v61 = vsel %vm1366_vm14, %v1644_v40, 2147483647 }
0x138f   :  { %v1651_v41 = vshra.s32 %v1649_v61, 16 }
0x1391   :  { %v1653_v6 = vcvt.s32.f32 %v1651_v41 }
0x1392   :  { %v1728_v44 = vpop.permute.xlu0 %1727 }
0x1393   :  { %v1754_v4 = vperm.slane %v1728_v44, %v3792_v35  ;;  %1654 = vmin.xlane.f32.xlu2 %v1653_v6 }
0x1395   :  { %v1763_v50 = vsel %vm1533_vm9, %v1754_v4, %v1753_v9 }
0x1396   :  { %v1764_v49 = vsel %vm1535_vm3, %v1755_v47, %v1763_v50 }
0x1397   :  { %v1765_v0 = vsel %vm1537_vm4, %v1756_v51, %v1764_v49 }
0x1399   :  { %v1624_v25 = vpop.permute.xlu2 %1623 }
0x139a   :  { %v1737_v60 = vpop.permute.xlu0 %1736  ;;  %v1638_v37 = vperm.slane %v1624_v25, %v3792_v35 }
0x139b   :  { %v1757_v63 = vperm.slane %v1737_v60, %v3792_v35 }
0x139d   :  { %v1766_v7 = vsel %vm1539_vm5, %v1757_v63, %v1765_v0 }
0x139e   :  { %v1773_v16 = vsel %vm1366_vm14, %v1766_v7, -inf }
0x139f   :  { %1774 = vmax.xlane.f32.xlu1 %v1773_v16 }
0x13a1   :  { %v1740_v31 = vpop.permute.xlu2 %1739 }
0x13a2   :  { %v1758_v41 = vperm.slane %v1740_v31, %v3792_v35 }
0x13a9   :  { %v1752_v43 = vpop.permute.xlu2 %1751 }
0x13aa   :  { %v1762_v48 = vperm.slane %v1752_v43, %v3792_v35 }
0x13b1   :  { %v1627_v12 = vpop.permute.xlu1 %1626 }
0x13b2   :  { %v1618_v24 = vpop.permute.xlu0 %1617  ;;  %v1639_v29 = vperm.slane %v1627_v12, %v3792_v35 }
0x13b3   :  { %v1636_v33 = vperm.slane %v1618_v24, %v3792_v35  ;;  %v1650_v24 = vand.u32 65535, %v1649_v61 }
0x13b5   :  { %v1652_v25 = vcvt.s32.f32 %v1650_v24 }
0x13b9   :  { %v1630_v21 = vpop.permute.xlu1 %1629 }
0x13ba   :  { %v1621_v30 = vpop.permute.xlu0 %1620  ;;  %v1640_v4 = vperm.slane %v1630_v21, %v3792_v35 }
0x13bb   :  { %v1637_v32 = vperm.slane %v1621_v30, %v3792_v35 }
0x13bd   :  { %v1645_v22 = vsel %vm1533_vm9, %v1637_v32, %v1636_v33 }
0x13be   :  { %v1646_v38 = vsel %vm1535_vm3, %v1638_v37, %v1645_v22 }
0x13bf   :  { %v1647_v44 = vsel %vm1537_vm4, %v1639_v29, %v1646_v38 }
0x13c0   :  { %v1648_v51 = vsel %vm1539_vm5, %v1640_v4, %v1647_v44 }
0x13c1   :  { %v1743_v23 = vpop.permute.xlu1 %1742  ;;  %v1664_v7 = vsel %vm1366_vm14, %v1648_v51, 2147483647 }
0x13c2   :  { %v1759_v26 = vperm.slane %v1743_v23, %v3792_v35  ;;  %v1666_v16 = vshra.s32 %v1664_v7, 16 }
0x13c4   :  { %v1767_v50 = vsel %vm1533_vm9, %v1759_v26, %v1758_v41  ;;  %v1668_v12 = vcvt.s32.f32 %v1666_v16 }
0x13c9   :  { %v1746_v36 = vpop.permute.xlu1 %1745 }
0x13ca   :  { %v1760_v40 = vperm.slane %v1746_v36, %v3792_v35 }
0x13cc   :  { %v1768_v49 = vsel %vm1535_vm3, %v1760_v40, %v1767_v50 }
0x13d1   :  { %v1749_v9 = vpop.permute.xlu1 %1748 }
0x13d2   :  { %v1761_v47 = vperm.slane %v1749_v9, %v3792_v35  ;;  %v1665_v9 = vand.u32 65535, %v1664_v7 }
0x13d4   :  { %v1769_v60 = vsel %vm1537_vm4, %v1761_v47, %v1768_v49  ;;  %v1667_v47 = vcvt.s32.f32 %v1665_v9 }
0x13d5   :  { %v1770_v63 = vsel %vm1539_vm5, %v1762_v48, %v1769_v60 }
0x13d6   :  { %v1776_v0 = vsel %vm1366_vm14, %v1770_v63, -inf }
0x13d7   :  { %1777 = vmax.xlane.f32.xlu0 %v1776_v0 }
0x13df   :  { %1669 = vmin.xlane.f32.xlu0 %v1668_v12 }
0x1406   :  { %v4025_v21 = vpop.xlane.xlu2 %1654 }
0x1407   :  { %4723 = vst [vmem:[#allocation13_spill] sm:$0xff] %v4025_v21  ;;  %vm1656_vm1 = vcmp.eq.f32.partialorder %v1653_v6, %v4025_v21 }
0x1408   :  { %v1657_v23 = vsel %vm1656_vm1, %v1652_v25, inf }
0x1409   :  { %1658 = vmin.xlane.f32.xlu1 %v1657_v23 }
0x1412   :  { %v4028_v30 = vpop.xlane.xlu1 %1774 }
0x1413   :  { %v1921_v31 = vadd.f32 %v3822_v54, %v4028_v30 }
0x1415   :  { %v4033_v32 = vadd.f32 %v1921_v31, %v3843_v3  ;;  %v4036_v33 = vadd.f32 %v1921_v31, %v3818_v52  ;;  %v4041_v61 = vadd.f32 %v1921_v31, %v3824_v34  ;;  %v4045_v6 = vadd.f32 %v1921_v31, %v3828_v57 }
0x1416   :  { %v4049_v54 = vadd.f32 %v1921_v31, %v3832_v59  ;;  %v2785_v31 = vperm.slane %v3805_v19, 0 }
0x1417   :  { %1944 = vperm.xlu2 %3146, %v4033_v32   ;;  %1956 = vperm.xlu0 %3145, %v4036_v33  }
0x141f   :  { %1947 = vperm.xlu2 %3146, %v4041_v61  }
0x1427   :  { %1950 = vperm.xlu2 %3146, %v4045_v6  }
0x142f   :  { %1953 = vperm.xlu2 %3146, %v4049_v54  }
0x144a   :  { %v4052_v36 = vpop.xlane.xlu0 %1777 }
0x144b   :  { %v1922_v22 = vadd.f32 %v3826_v56, %v4052_v36  ;;  %v2565_v56 = vperm.slane %v3802_v18, 0 }
0x144d   :  { %v4057_v37 = vadd.f32 %v1922_v22, %v3828_v57  ;;  %v4060_v38 = vadd.f32 %v1922_v22, %v3824_v34  ;;  %v4063_v29 = vadd.f32 %v1922_v22, %v3843_v3  ;;  %v4069_v26 = vadd.f32 %v1922_v22, %v3832_v59 }
0x144e   :  { %v4076_v40 = vadd.f32 %v1922_v22, %v3818_v52 }
0x144f   :  { %1965 = vperm.xlu0 %3145, %v4057_v37   ;;  %1962 = vperm.xlu1 %3144, %v4060_v38  }
0x1450   :  { %1959 = vperm.xlu2 %3146, %v4063_v29  }
0x1452   :  { %v4080_v44 = vpop.xlane.xlu0 %1669 }
0x1453   :  { %4724 = vst [vmem:[#allocation14_spill] sm:$0xff] %v4080_v44  ;;  %vm1671_vm7 = vcmp.eq.f32.partialorder %v1668_v12, %v4080_v44 }
0x1454   :  { %v1672_v51 = vsel %vm1671_vm7, %v1667_v47, inf }
0x1457   :  { %3147 = vset.pattern.permute.xlu0 %v3775_v55  ;;  %3150 = vset.pattern.permute.xlu1 %v3775_v55 }
0x1458   :  { %1968 = vperm.xlu2 %3146, %v4069_v26  }
0x145f   :  { %2570 = vperm.xlu0 %3147, %v2565_v56   ;;  %v2792_v56 = vperm.slane %v3805_v19, 1 }
0x1460   :  { %1971 = vperm.xlu2 %3146, %v4076_v40  }
0x1467   :  { %3148 = vset.pattern.permute.xlu0 %v3324_v39 }
0x1471   :  { %v1945_v41 = vpop.permute.xlu2 %1944 }
0x1472   :  { %v1973_v49 = vperm.slane %v1945_v41, %v3792_v35 }
0x1479   :  { %v1948_v43 = vpop.permute.xlu2 %1947 }
0x147a   :  { %v1974_v50 = vperm.slane %v1948_v43, %v3792_v35 }
0x147c   :  { %v1983_v0 = vsel %vm1533_vm9, %v1974_v50, %v1973_v49  ;;  %v4095_v43 = vpop.xlane.xlu1 %1658 }
0x147d   :  { %4725 = vst [vmem:[#allocation15_spill] sm:$0xff] %v4095_v43 }
0x1481   :  { %v1951_v4 = vpop.permute.xlu2 %1950 }
0x1482   :  { %v1975_v48 = vperm.slane %v1951_v4, %v3792_v35 }
0x1484   :  { %v1984_v7 = vsel %vm1535_vm3, %v1975_v48, %v1983_v0 }
0x1489   :  { %v1954_v60 = vpop.permute.xlu2 %1953  ;;  %1673 = vmin.xlane.f32.xlu2 %v1672_v51  ;;  %v1957_v63 = vpop.permute.xlu0 %1956 }
0x148a   :  { %v1976_v16 = vperm.slane %v1954_v60, %v3792_v35  ;;  %v1977_v24 = vperm.slane %v1957_v63, %v3792_v35 }
0x148c   :  { %v1985_v12 = vsel %vm1537_vm4, %v1976_v16, %v1984_v7 }
0x148d   :  { %v1986_v25 = vsel %vm1539_vm5, %v1977_v24, %v1985_v12 }
0x148e   :  { %v1993_v23 = vsel %vm1366_vm14, %v1986_v25, -inf }
0x148f   :  { %1994 = vmax.xlane.f32.xlu1 %v1993_v23 }
0x14a8   :  { %2790 = vperm.xlu1 %3150, %v2785_v31   ;;  %v3174_v31 = vld [vmem:[%s4711_s4 + $0x5] ss:$0 sm:$0xff] }
0x14aa   :  { %v1960_v22 = vpop.permute.xlu2 %1959 }
0x14ab   :  { %v1978_v50 = vperm.slane %v1960_v22, %v3792_v35 }
0x14b0   :  { %2797 = vperm.xlu1 %3150, %v2792_v56  }
0x14b2   :  { %v1969_v41 = vpop.permute.xlu2 %1968 }
0x14b3   :  { %v1981_v51 = vperm.slane %v1969_v41, %v3792_v35  ;;  %v2572_v41 = vperm.slane %v3802_v18, 1 }
0x14b8   :  { %2809 = vperm.xlu1 %3150, %v3174_v31  }
0x14ba   :  { %v1972_v47 = vpop.permute.xlu2 %1971 }
0x14bb   :  { %v1982_v63 = vperm.slane %v1972_v47, %v3792_v35 }
0x14c0   :  { %3152 = vset.pattern.permute.xlu1 %v3324_v39 }
0x14c1   :  { %v1963_v4 = vpop.permute.xlu1 %1962  ;;  %v1966_v9 = vpop.permute.xlu0 %1965 }
0x14c2   :  { %v1979_v48 = vperm.slane %v1963_v4, %v3792_v35  ;;  %v1980_v49 = vperm.slane %v1966_v9, %v3792_v35  ;;  %v1781_v4 = vperm.slane %v4028_v30, 0 }
0x14c4   :  { %v1987_v60 = vsel %vm1533_vm9, %v1979_v48, %v1978_v50  ;;  %vm1801_vm10 = vcmp.eq.f32.partialorder %v3932_v13, %v1781_v4 }
0x14c5   :  { %v1988_v19 = vsel %vm1535_vm3, %v1980_v49, %v1987_v60  ;;  %v1811_v9 = vsel %vm1801_vm10, %v3839_v62, 1000000000 }
0x14c6   :  { %v1989_v0 = vsel %vm1537_vm4, %v1981_v51, %v1988_v19 }
0x14c7   :  { %v1990_v16 = vsel %vm1539_vm5, %v1982_v63, %v1989_v0 }
0x14c8   :  { %v1996_v24 = vsel %vm1366_vm14, %v1990_v16, -inf }
0x14c9   :  { %1997 = vmax.xlane.f32.xlu0 %v1996_v24 }
0x14d1   :  { %v4141_v50 = vpop.permute.xlu0 %2570 }
0x14fc   :  { %v4167_v49 = vpop.xlane.xlu2 %1673 }
0x14fd   :  { %4726 = vst [vmem:[#allocation16_spill] sm:$0xff] %v4167_v49 }
0x1502   :  { %v4107_v7 = vpop.xlane.xlu1 %1994 }
0x1503   :  { %v2141_v12 = vadd.f32 %v3830_v58, %v4107_v7 }
0x1505   :  { %v4112_v25 = vadd.f32 %v2141_v12, %v3843_v3  ;;  %v4115_v23 = vadd.f32 %v2141_v12, %v3828_v57  ;;  %v4123_v22 = vadd.f32 %v2141_v12, %v3824_v34  ;;  %v4126_v58 = vadd.f32 %v2141_v12, %v3818_v52 }
0x1506   :  { %v4132_v56 = vadd.f32 %v2141_v12, %v3832_v59 }
0x1507   :  { %2164 = vperm.xlu2 %3146, %v4112_v25   ;;  %2170 = vperm.xlu0 %3148, %v4115_v23  }
0x150f   :  { %2167 = vperm.xlu2 %3146, %v4123_v22   ;;  %2176 = vperm.xlu0 %3148, %v4126_v58  }
0x1517   :  { %2173 = vperm.xlu2 %3146, %v4132_v56   ;;  %3149 = vset.pattern.permute.xlu0 %v3775_v55 }
0x151f   :  { %2577 = vperm.xlu0 %3149, %v2572_v41  }
0x1527   :  { %3151 = vset.pattern.permute.xlu0 %v3324_v39 }
0x1528   :  { %1822 = vperm.xlu0 %3151, %v1811_v9  }
0x153c   :  { %v4143_v47 = vpop.xlane.xlu0 %1997 }
0x153d   :  { %v2142_v48 = vadd.f32 %v3834_v10, %v4143_v47 }
0x153f   :  { %v4148_v55 = vadd.f32 %v2142_v48, %v3824_v34  ;;  %v4151_v18 = vadd.f32 %v2142_v48, %v3843_v3  ;;  %v4156_v39 = vadd.f32 %v2142_v48, %v3818_v52  ;;  %v4159_v13 = vadd.f32 %v2142_v48, %v3828_v57 }
0x1540   :  { %v4164_v10 = vadd.f32 %v2142_v48, %v3832_v59 }
0x1541   :  { %2182 = vperm.xlu1 %3152, %v4148_v55   ;;  %2179 = vperm.xlu2 %3146, %v4151_v18  }
0x1549   :  { %2191 = vperm.xlu1 %3152, %v4156_v39   ;;  %2185 = vperm.xlu2 %3146, %v4159_v13  }
0x1551   :  { %2188 = vperm.xlu2 %3146, %v4164_v10  }
0x1561   :  { %v2165_v51 = vpop.permute.xlu2 %2164 }
0x1562   :  { %v2193_v16 = vperm.slane %v2165_v51, %v3792_v35 }
0x1569   :  { %v2168_v60 = vpop.permute.xlu2 %2167 }
0x156a   :  { %v2194_v19 = vperm.slane %v2168_v60, %v3792_v35 }
0x156c   :  { %v2203_v12 = vsel %vm1533_vm9, %v2194_v19, %v2193_v16 }
0x1571   :  { %v2174_v24 = vpop.permute.xlu2 %2173 }
0x1572   :  { %v2196_v41 = vperm.slane %v2174_v24, %v3792_v35 }
0x1579   :  { %v2171_v63 = vpop.permute.xlu0 %2170 }
0x157a   :  { %v2195_v0 = vperm.slane %v2171_v63, %v3792_v35  ;;  %v4179_v63 = vpop.permute.xlu1 %2790 }
0x157c   :  { %v2204_v31 = vsel %vm1535_vm3, %v2195_v0, %v2203_v12 }
0x157d   :  { %v2205_v48 = vsel %vm1537_vm4, %v2196_v41, %v2204_v31 }
0x1581   :  { %v2177_v4 = vpop.permute.xlu0 %2176 }
0x1582   :  { %v2197_v9 = vperm.slane %v2177_v4, %v3792_v35  ;;  %v4181_v51 = vpop.permute.xlu1 %2797 }
0x1584   :  { %v2206_v46 = vsel %vm1539_vm5, %v2197_v9, %v2205_v48 }
0x1585   :  { %v2213_v60 = vsel %vm1366_vm14, %v2206_v46, -inf }
0x1586   :  { %2214 = vmax.xlane.f32.xlu2 %v2213_v60 }
0x158a   :  { %v4183_v19 = vpop.permute.xlu1 %2809 }
0x159b   :  { %v2180_v17 = vpop.permute.xlu2 %2179 }
0x159c   :  { %v2198_v12 = vperm.slane %v2180_v17, %v3792_v35 }
0x15a3   :  { %v2186_v0 = vpop.permute.xlu2 %2185 }
0x15a4   :  { %v2200_v41 = vperm.slane %v2186_v0, %v3792_v35 }
0x15ab   :  { %v2189_v4 = vpop.permute.xlu2 %2188 }
0x15ac   :  { %v2201_v9 = vperm.slane %v2189_v4, %v3792_v35 }
0x15b3   :  { %v2183_v16 = vpop.permute.xlu1 %2182 }
0x15b4   :  { %v2199_v24 = vperm.slane %v2183_v16, %v3792_v35 }
0x15b6   :  { %v2207_v31 = vsel %vm1533_vm9, %v2199_v24, %v2198_v12 }
0x15b7   :  { %v2208_v46 = vsel %vm1535_vm3, %v2200_v41, %v2207_v31 }
0x15b8   :  { %v2209_v20 = vsel %vm1537_vm4, %v2201_v9, %v2208_v46  ;;  %v4220_v9 = vpop.permute.xlu0 %2577 }
0x15bb   :  { %v2192_v48 = vpop.permute.xlu1 %2191 }
0x15bc   :  { %v2202_v60 = vperm.slane %v2192_v48, %v3792_v35 }
0x15be   :  { %v2210_v1 = vsel %vm1539_vm5, %v2202_v60, %v2209_v20 }
0x15bf   :  { %v2216_v16 = vsel %vm1366_vm14, %v2210_v1, -inf }
0x15c0   :  { %2217 = vmax.xlane.f32.xlu0 %v2216_v16  ;;  %v4224_v60 = vpop.permute.xlu0 %1822 }
0x15c1   :  { %4727 = vst [vmem:[#allocation17_spill] sm:$0xff] %v4224_v60 }
0x15f9   :  { %v2215_v17 = vpop.xlane.xlu2 %2214 }
0x15fa   :  { %v2361_v24 = vadd.f32 %v3889_v27, %v2215_v17  ;;  %v2222_v31 = vperm.slane %v2215_v17, 1  ;;  %v2221_v4 = vperm.slane %v2215_v17, 0  ;;  %v2223_v46 = vperm.slane %v2215_v17, 2 }
0x15fc   :  { %v4197_v0 = vadd.f32 %v2361_v24, %v3818_v52  ;;  %v4200_v12 = vadd.f32 %v2361_v24, %v3843_v3  ;;  %vm2242_vm11 = vcmp.eq.f32.partialorder %v4123_v22, %v2222_v31  ;;  %v4206_v20 = vadd.f32 %v2361_v24, %v3824_v34 }
0x15fd   :  { %v2252_v1 = vsel %vm2242_vm11, %v3839_v62, 1000000000  ;;  %v4211_v27 = vadd.f32 %v2361_v24, %v3828_v57  ;;  %v4215_v41 = vadd.f32 %v2361_v24, %v3832_v59  ;;  %vm2241_vm12 = vcmp.eq.f32.partialorder %v4112_v25, %v2221_v4 }
0x15fe   :  { %2396 = vperm.xlu2 %3146, %v4197_v0   ;;  %2384 = vperm.xlu1 %3152, %v4200_v12   ;;  %v2251_v22 = vsel %vm2241_vm12, %v3839_v62, 1000000000  ;;  %vm2243_vm13 = vcmp.eq.f32.partialorder %v4115_v23, %v2223_v46  ;;  %v2225_v23 = vperm.slane %v2215_v17, 4  ;;  %v2224_v46 = vperm.slane %v2215_v17, 3 }
0x15ff   :  { %v2253_v48 = vsel %vm2243_vm13, %v3839_v62, 1000000000 }
0x1600   :  { %vm2245_vm0 = vcmp.eq.f32.partialorder %v4126_v58, %v2225_v23  ;;  %vm2244_vm15 = vcmp.eq.f32.partialorder %v4132_v56, %v2224_v46 }
0x1601   :  { %v2255_v4 = vsel %vm2245_vm0, %v3839_v62, 1000000000  ;;  %v2254_v58 = vsel %vm2244_vm15, %v3839_v62, 1000000000 }
0x1606   :  { %2387 = vperm.xlu1 %3152, %v4206_v20   ;;  %2265 = vperm.xlu2 %3146, %v2252_v1  }
0x160e   :  { %2390 = vperm.xlu1 %3152, %v4211_v27  }
0x1616   :  { %2393 = vperm.xlu1 %3152, %v4215_v41  }
0x161e   :  { %2262 = vperm.xlu1 %3152, %v2251_v22  }
0x1626   :  { %2268 = vperm.xlu1 %3152, %v2253_v48  }
0x1633   :  { %v4226_v16 = vpop.xlane.xlu0 %2217 }
0x1634   :  { %v2362_v24 = vadd.f32 %v3891_v28, %v4226_v16  ;;  %v2228_v48 = vperm.slane %v4226_v16, 2 }
0x1636   :  { %v4231_v25 = vadd.f32 %v2362_v24, %v3828_v57  ;;  %v4234_v31 = vadd.f32 %v2362_v24, %v3824_v34  ;;  %v4237_v1 = vadd.f32 %v2362_v24, %v3843_v3  ;;  %v4244_v28 = vadd.f32 %v2362_v24, %v3818_v52 }
0x1637   :  { %v4248_v22 = vadd.f32 %v2362_v24, %v3832_v59  ;;  %vm2248_vm2 = vcmp.eq.f32.partialorder %v4159_v13, %v2228_v48  ;;  %v2226_v24 = vperm.slane %v4226_v16, 0 }
0x1638   :  { %2405 = vperm.xlu0 %3151, %v4231_v25   ;;  %2402 = vperm.xlu2 %3146, %v4234_v31   ;;  %v2258_v23 = vsel %vm2248_vm2, %v3839_v62, 1000000000 }
0x1639   :  { %2399 = vperm.xlu1 %3152, %v4237_v1   ;;  %vm2246_vm8 = vcmp.eq.f32.partialorder %v4151_v18, %v2226_v24 }
0x163a   :  { %v2256_v17 = vsel %vm2246_vm8, %v3839_v62, 1000000000 }
0x1640   :  { %2411 = vperm.xlu0 %3151, %v4244_v28   ;;  %2274 = vperm.xlu2 %3146, %v2255_v4   ;;  %v2227_v4 = vperm.slane %v4226_v16, 1 }
0x1641   :  { %2408 = vperm.xlu1 %3152, %v4248_v22  }
0x1642   :  { %vm2247_vm6 = vcmp.eq.f32.partialorder %v4148_v55, %v2227_v4 }
0x1643   :  { %v2257_v56 = vsel %vm2247_vm6, %v3839_v62, 1000000000 }
0x1648   :  { %2271 = vperm.xlu0 %3151, %v2254_v58   ;;  %2283 = vperm.xlu2 %3146, %v2258_v23  }
0x1650   :  { %2277 = vperm.xlu0 %3151, %v2256_v17  }
0x1658   :  { %2280 = vperm.xlu0 %3151, %v2257_v56   ;;  %v2397_v43 = vpop.permute.xlu2 %2396 }
0x1659   :  { %v2417_v55 = vperm.slane %v2397_v43, %v3792_v35 }
0x1670   :  { %v2385_v13 = vpop.permute.xlu1 %2384 }
0x1671   :  { %v2413_v18 = vperm.slane %v2385_v13, %v3792_v35 }
0x1678   :  { %v2388_v46 = vpop.permute.xlu1 %2387 }
0x1679   :  { %v2414_v58 = vperm.slane %v2388_v46, %v3792_v35  ;;  %v2266_v46 = vpop.permute.xlu2 %2265 }
0x167a   :  { %v2292_v13 = vperm.slane %v2266_v46, %v3792_v35 }
0x167b   :  { %v2423_v17 = vsel %vm1533_vm9, %v2414_v58, %v2413_v18 }
0x1680   :  { %v2391_v48 = vpop.permute.xlu1 %2390 }
0x1681   :  { %v2415_v23 = vperm.slane %v2391_v48, %v3792_v35 }
0x1683   :  { %v2424_v4 = vsel %vm1535_vm3, %v2415_v23, %v2423_v17 }
0x1688   :  { %v2394_v24 = vpop.permute.xlu1 %2393 }
0x1689   :  { %v2416_v49 = vperm.slane %v2394_v24, %v3792_v35 }
0x168b   :  { %v2425_v56 = vsel %vm1537_vm4, %v2416_v49, %v2424_v4 }
0x168c   :  { %v2426_v21 = vsel %vm1539_vm5, %v2417_v55, %v2425_v56 }
0x168d   :  { %v2433_v44 = vsel %vm1366_vm14, %v2426_v21, -inf }
0x168e   :  { %2434 = vmax.xlane.f32.xlu1 %v2433_v44 }
0x1690   :  { %v2263_v48 = vpop.permute.xlu1 %2262 }
0x1691   :  { %v2291_v60 = vperm.slane %v2263_v48, %v3792_v35 }
0x1692   :  { %v2403_v17 = vpop.permute.xlu2 %2402 }
0x1693   :  { %v2301_v58 = vsel %vm1533_vm9, %v2292_v13, %v2291_v60  ;;  %v2419_v21 = vperm.slane %v2403_v17, %v3792_v35 }
0x1698   :  { %v2269_v18 = vpop.permute.xlu1 %2268 }
0x1699   :  { %v2293_v43 = vperm.slane %v2269_v18, %v3792_v35 }
0x169b   :  { %v2302_v23 = vsel %vm1535_vm3, %v2293_v43, %v2301_v58 }
0x16aa   :  { %v2406_v24 = vpop.permute.xlu0 %2405 }
0x16ab   :  { %v2400_v49 = vpop.permute.xlu1 %2399  ;;  %v2420_v44 = vperm.slane %v2406_v24, %v3792_v35 }
0x16ac   :  { %v2418_v55 = vperm.slane %v2400_v49, %v3792_v35  ;;  %v2275_v49 = vpop.permute.xlu2 %2274 }
0x16ae   :  { %v2427_v4 = vsel %vm1533_vm9, %v2419_v21, %v2418_v55  ;;  %v2295_v55 = vperm.slane %v2275_v49, %v3792_v35 }
0x16af   :  { %v2428_v13 = vsel %vm1535_vm3, %v2420_v44, %v2427_v4 }
0x16b2   :  { %v2412_v56 = vpop.permute.xlu0 %2411 }
0x16b3   :  { %v2422_v46 = vperm.slane %v2412_v56, %v3792_v35  ;;  %v2409_v60 = vpop.permute.xlu1 %2408 }
0x16b4   :  { %v2421_v48 = vperm.slane %v2409_v60, %v3792_v35 }
0x16b6   :  { %v2429_v58 = vsel %vm1537_vm4, %v2421_v48, %v2428_v13 }
0x16b7   :  { %v2430_v18 = vsel %vm1539_vm5, %v2422_v46, %v2429_v58 }
0x16b8   :  { %v2436_v43 = vsel %vm1366_vm14, %v2430_v18, -inf }
0x16b9   :  { %2437 = vmax.xlane.f32.xlu2 %v2436_v43 }
0x16ba   :  { %v2272_v17 = vpop.permute.xlu0 %2271 }
0x16bb   :  { %v2294_v24 = vperm.slane %v2272_v17, %v3792_v35 }
0x16bd   :  { %v2303_v21 = vsel %vm1537_vm4, %v2294_v24, %v2302_v23 }
0x16be   :  { %v4292_v56 = vsel %vm1539_vm5, %v2295_v55, %v2303_v21 }
0x1701   :  { %v2435_v60 = vpop.xlane.xlu1 %2434 }
0x1702   :  { %v2581_v44 = vadd.f32 %v4141_v50, %v2435_v60  ;;  %v2442_v23 = vperm.slane %v2435_v60, 1  ;;  %v2444_v18 = vperm.slane %v2435_v60, 3  ;;  %v2443_v43 = vperm.slane %v2435_v60, 2 }
0x1703   :  { %v2441_v49 = vperm.slane %v2435_v60, 0  ;;  %v2445_v55 = vperm.slane %v2435_v60, 4 }
0x1704   :  { %v4296_v4 = vadd.f32 %v2581_v44, %v3824_v34  ;;  %v4299_v46 = vadd.f32 %v2581_v44, %v3818_v52  ;;  %v4302_v48 = vadd.f32 %v2581_v44, %v3843_v3  ;;  %vm2462_vm1 = vcmp.eq.f32.partialorder %v4206_v20, %v2442_v23 }
0x1705   :  { %v4309_v50 = vadd.f32 %v2581_v44, %v3832_v59  ;;  %v2472_v13 = vsel %vm2462_vm1, %v3839_v62, 1000000000  ;;  %v4313_v58 = vadd.f32 %v2581_v44, %v3828_v57  ;;  %vm2464_vm7 = vcmp.eq.f32.partialorder %v4215_v41, %v2444_v18  ;;  %v4325_v41 = vpop.permute.xlu2 %2283 }
0x1706   :  { %2607 = vperm.xlu1 %3152, %v4296_v4   ;;  %2616 = vperm.xlu2 %3146, %v4299_v46   ;;  %vm2463_vm10 = vcmp.eq.f32.partialorder %v4211_v27, %v2443_v43  ;;  %vm2461_vm11 = vcmp.eq.f32.partialorder %v4200_v12, %v2441_v49  ;;  %v2474_v20 = vsel %vm2464_vm7, %v3839_v62, 1000000000  ;;  %vm2465_vm12 = vcmp.eq.f32.partialorder %v4197_v0, %v2445_v55 }
0x1707   :  { %2604 = vperm.xlu0 %3151, %v4302_v48   ;;  %v2473_v17 = vsel %vm2463_vm10, %v3839_v62, 1000000000  ;;  %v2471_v24 = vsel %vm2461_vm11, %v3839_v62, 1000000000  ;;  %v2475_v21 = vsel %vm2465_vm12, %v3839_v62, 1000000000 }
0x170e   :  { %2613 = vperm.xlu1 %3152, %v4309_v50   ;;  %2485 = vperm.xlu2 %3146, %v2472_v13  }
0x170f   :  { %2610 = vperm.xlu0 %3151, %v4313_v58  }
0x1716   :  { %2491 = vperm.xlu1 %3152, %v2474_v20   ;;  %2488 = vperm.xlu2 %3146, %v2473_v17   ;;  %v4366_v17 = vpop.permute.xlu0 %2277 }
0x1717   :  { %2482 = vperm.xlu0 %3151, %v2471_v24  }
0x171f   :  { %2494 = vperm.xlu0 %3151, %v2475_v21  }
0x172c   :  { %v2438_v27 = vpop.xlane.xlu2 %2437 }
0x172d   :  { %v2582_v12 = vadd.f32 %v4220_v9, %v2438_v27  ;;  %v2449_v0 = vperm.slane %v2438_v27, 3  ;;  %v2446_v60 = vperm.slane %v2438_v27, 0  ;;  %v2450_v18 = vperm.slane %v2438_v27, 4 }
0x172f   :  { %v4329_v44 = vadd.f32 %v2582_v12, %v3818_v52  ;;  %v4332_v23 = vadd.f32 %v2582_v12, %v3824_v34  ;;  %v4335_v13 = vadd.f32 %v2582_v12, %v3843_v3  ;;  %vm2469_vm13 = vcmp.eq.f32.partialorder %v4248_v22, %v2449_v0 }
0x1730   :  { %vm2466_vm0 = vcmp.eq.f32.partialorder %v4237_v1, %v2446_v60  ;;  %v2479_v52 = vsel %vm2469_vm13, %v3839_v62, 1000000000  ;;  %v4345_v9 = vadd.f32 %v2582_v12, %v3828_v57  ;;  %v2001_v3 = vperm.slane %v4107_v7, 0 }
0x1731   :  { %2631 = vperm.xlu1 %3152, %v4329_v44   ;;  %2622 = vperm.xlu2 %3146, %v4332_v23   ;;  %v2476_v34 = vsel %vm2466_vm0, %v3839_v62, 1000000000  ;;  %vm2470_vm2 = vcmp.eq.f32.partialorder %v4244_v28, %v2450_v18  ;;  %v4354_v43 = vadd.f32 %v2582_v12, %v3832_v59  ;;  %v2447_v57 = vperm.slane %v2438_v27, 1 }
0x1732   :  { %2619 = vperm.xlu0 %3151, %v4335_v13   ;;  %vm2021_vm15 = vcmp.eq.f32.partialorder %v4033_v32, %v2001_v3  ;;  %v2480_v22 = vsel %vm2470_vm2, %v3839_v62, 1000000000  ;;  %v2448_v32 = vperm.slane %v2438_v27, 2  ;;  %v4363_v59 = vsel %vm1366_vm14, %v4292_v56, 2147483647 }
0x1733   :  { %v2031_v1 = vsel %vm2021_vm15, %v3839_v62, 1000000000  ;;  %vm2467_vm8 = vcmp.eq.f32.partialorder %v4234_v31, %v2447_v57  ;;  %v2311_v20 = vshra.s32 %v4363_v59, 16  ;;  %v4371_v31 = vpop.permute.xlu0 %2280  ;;  %v2002_v57 = vperm.slane %v4107_v7, 1 }
0x1734   :  { %v2477_v49 = vsel %vm2467_vm8, %v3839_v62, 1000000000  ;;  %vm2468_vm6 = vcmp.eq.f32.partialorder %v4231_v25, %v2448_v32  ;;  %v2229_v25 = vperm.slane %v4226_v16, 3 }
0x1735   :  { %v2478_v28 = vsel %vm2468_vm6, %v3839_v62, 1000000000  ;;  %v4368_v24 = vcvt.s32.f32 %v2311_v20  ;;  %vm2022_vm7 = vcmp.eq.f32.partialorder %v4041_v61, %v2002_v57 }
0x1736   :  { %vm2249_vm1 = vcmp.eq.f32.partialorder %v4164_v10, %v2229_v25 }
0x1737   :  { %v2259_v18 = vsel %vm2249_vm1, %v3839_v62, 1000000000 }
0x1739   :  { %2506 = vperm.xlu2 %3146, %v2479_v52   ;;  %2497 = vperm.xlu1 %3152, %v2476_v34  }
0x173a   :  { %2625 = vperm.xlu0 %3151, %v4345_v9  }
0x1741   :  { %2042 = vperm.xlu2 %3146, %v2031_v1   ;;  %2509 = vperm.xlu1 %3152, %v2480_v22  }
0x1742   :  { %2628 = vperm.xlu0 %3151, %v4354_v43  }
0x174a   :  { %2500 = vperm.xlu0 %3151, %v2477_v49  }
0x1752   :  { %2503 = vperm.xlu0 %3151, %v2478_v28   ;;  %v2032_v28 = vsel %vm2022_vm7, %v3839_v62, 1000000000 }
0x1760   :  { %v2617_v0 = vpop.permute.xlu2 %2616 }
0x1761   :  { %v2637_v1 = vperm.slane %v2617_v0, %v3792_v35 }
0x176b   :  { %2314 = vmin.xlane.f32.xlu1 %v4368_v24 }
0x1778   :  { %v2608_v55 = vpop.permute.xlu1 %2607 }
0x1779   :  { %v2605_v21 = vpop.permute.xlu0 %2604  ;;  %v2634_v27 = vperm.slane %v2608_v55, %v3792_v35  ;;  %v2230_v55 = vperm.slane %v4226_v16, 4 }
0x177a   :  { %v2633_v12 = vperm.slane %v2605_v21, %v3792_v35 }
0x177b   :  { %vm2250_vm10 = vcmp.eq.f32.partialorder %v4156_v39, %v2230_v55 }
0x177c   :  { %v2643_v3 = vsel %vm1533_vm9, %v2634_v27, %v2633_v12  ;;  %v2260_v21 = vsel %vm2250_vm10, %v3839_v62, 1000000000  ;;  %v2486_v27 = vpop.permute.xlu2 %2485 }
0x177d   :  { %v2512_v61 = vperm.slane %v2486_v27, %v3792_v35 }
0x1780   :  { %v2614_v56 = vpop.permute.xlu1 %2613 }
0x1781   :  { %v2636_v60 = vperm.slane %v2614_v56, %v3792_v35  ;;  %v2611_v52 = vpop.permute.xlu0 %2610 }
0x1782   :  { %v2635_v34 = vperm.slane %v2611_v52, %v3792_v35 }
0x1784   :  { %v2644_v22 = vsel %vm1535_vm3, %v2635_v34, %v2643_v3  ;;  %2286 = vperm.xlu1 %3152, %v2259_v18   ;;  %v2489_v56 = vpop.permute.xlu2 %2488 }
0x1785   :  { %v2645_v49 = vsel %vm1537_vm4, %v2636_v60, %v2644_v22  ;;  %v2513_v3 = vperm.slane %v2489_v56, %v3792_v35 }
0x1786   :  { %v2646_v10 = vsel %vm1539_vm5, %v2637_v1, %v2645_v49 }
0x1787   :  { %v2653_v32 = vsel %vm1366_vm14, %v2646_v10, -inf }
0x1788   :  { %2654 = vmax.xlane.f32.xlu0 %v2653_v32  ;;  %v2492_v0 = vpop.permute.xlu1 %2491 }
0x1789   :  { %v2483_v20 = vpop.permute.xlu0 %2482  ;;  %v2514_v57 = vperm.slane %v2492_v0, %v3792_v35 }
0x178a   :  { %v2511_v60 = vperm.slane %v2483_v20, %v3792_v35 }
0x178c   :  { %2045 = vperm.xlu1 %3152, %v2032_v28   ;;  %v2521_v34 = vsel %vm1533_vm9, %v2512_v61, %v2511_v60  ;;  %v2623_v16 = vpop.permute.xlu2 %2622 }
0x178d   :  { %v2522_v18 = vsel %vm1535_vm3, %v2513_v3, %v2521_v34  ;;  %v2639_v49 = vperm.slane %v2623_v16, %v3792_v35  ;;  %v2310_v16 = vand.u32 65535, %v4363_v59 }
0x178e   :  { %v2523_v28 = vsel %vm1537_vm4, %v2514_v57, %v2522_v18 }
0x178f   :  { %v2312_v18 = vcvt.s32.f32 %v2310_v16 }
0x1791   :  { %v2495_v25 = vpop.permute.xlu0 %2494 }
0x1792   :  { %v2515_v1 = vperm.slane %v2495_v25, %v3792_v35 }
0x179c   :  { %2289 = vperm.xlu0 %3151, %v2260_v21   ;;  %v2524_v21 = vsel %vm1539_vm5, %v2515_v1, %v2523_v28 }
0x179d   :  { %v4412_v60 = vsel %vm1366_vm14, %v2524_v21, 2147483647 }
0x17a3   :  { %v2632_v10 = vpop.permute.xlu1 %2631 }
0x17a4   :  { %v2620_v12 = vpop.permute.xlu0 %2619  ;;  %v2642_v27 = vperm.slane %v2632_v10, %v3792_v35 }
0x17a5   :  { %v2638_v39 = vperm.slane %v2620_v12, %v3792_v35 }
0x17a7   :  { %v2647_v20 = vsel %vm1533_vm9, %v2639_v49, %v2638_v39 }
0x17ab   :  { %v2498_v34 = vpop.permute.xlu1 %2497 }
0x17ac   :  { %v2626_v52 = vpop.permute.xlu0 %2625 }
0x17ad   :  { %v2640_v22 = vperm.slane %v2626_v52, %v3792_v35  ;;  %v2531_v52 = vshra.s32 %v4412_v60, 16 }
0x17af   :  { %v2648_v25 = vsel %vm1535_vm3, %v2640_v22, %v2647_v20  ;;  %v4415_v61 = vcvt.s32.f32 %v2531_v52 }
0x17b3   :  { %v2510_v3 = vpop.permute.xlu1 %2509 }
0x17b4   :  { %v2629_v32 = vpop.permute.xlu0 %2628 }
0x17b5   :  { %v2641_v55 = vperm.slane %v2629_v32, %v3792_v35 }
0x17b7   :  { %v2649_v12 = vsel %vm1537_vm4, %v2641_v55, %v2648_v25  ;;  %v2297_v55 = vperm.slane %v4371_v31, %v3792_v35  ;;  %v2296_v25 = vperm.slane %v4366_v17, %v3792_v35  ;;  %v2298_v31 = vperm.slane %v4325_v41, %v3792_v35 }
0x17b8   :  { %v2650_v56 = vsel %vm1539_vm5, %v2642_v27, %v2649_v12  ;;  %v2516_v12 = vperm.slane %v2498_v34, %v3792_v35 }
0x17b9   :  { %v2656_v0 = vsel %vm1366_vm14, %v2650_v56, -inf  ;;  %v2507_v56 = vpop.permute.xlu2 %2506 }
0x17ba   :  { %2657 = vmax.xlane.f32.xlu2 %v2656_v0 }
0x17bc   :  { %v2501_v22 = vpop.permute.xlu0 %2500 }
0x17c2   :  { %2534 = vmin.xlane.f32.xlu2 %v4415_v61 }
0x17c4   :  { %v2504_v57 = vpop.permute.xlu0 %2503 }
0x17c5   :  { %v2518_v27 = vperm.slane %v2504_v57, %v3792_v35 }
0x17de   :  { %v4419_v39 = vpop.xlane.xlu1 %2314 }
0x17df   :  { %vm2316_vm11 = vcmp.eq.f32.partialorder %v4368_v24, %v4419_v39 }
0x17e0   :  { %v4423_v1 = vsel %vm2316_vm11, %v2312_v18, inf  ;;  %v2519_v18 = vperm.slane %v2507_v56, %v3792_v35 }
0x17fb   :  { %v2655_v49 = vpop.xlane.xlu0 %2654 }
0x17fc   :  { %v2801_v10 = vadd.f32 %v4179_v63, %v2655_v49  ;;  %v2662_v32 = vperm.slane %v2655_v49, 1  ;;  %v2661_v20 = vperm.slane %v2655_v49, 0  ;;  %v2517_v63 = vperm.slane %v2501_v22, %v3792_v35 }
0x17fd   :  { %v2665_v21 = vperm.slane %v2655_v49, 4 }
0x17fe   :  { %v4427_v28 = vadd.f32 %v4183_v19, %v2801_v10  ;;  %vm2682_vm12 = vcmp.eq.f32.partialorder %v4296_v4, %v2662_v32  ;;  %vm2681_vm13 = vcmp.eq.f32.partialorder %v4302_v48, %v2661_v20  ;;  %v2287_v4 = vpop.permute.xlu1 %2286  ;;  %v2305_v48 = vsel %vm1533_vm9, %v2297_v55, %v2296_v25 }
0x17ff   :  { %v2692_v59 = vsel %vm2682_vm12, %v3839_v62, 1000000000  ;;  %v2691_v24 = vsel %vm2681_vm13, %v3839_v62, 1000000000  ;;  %v2525_v0 = vsel %vm1533_vm9, %v2517_v63, %v2516_v12  ;;  %v2299_v52 = vperm.slane %v2287_v4, %v3792_v35  ;;  %v4459_v4 = vpop.permute.xlu2 %2042 }
0x1800   :  { %2817 = vperm.xlu1 %3152, %v4427_v28   ;;  %2705 = vperm.xlu2 %3146, %v2692_v59   ;;  %vm2685_vm0 = vcmp.eq.f32.partialorder %v4299_v46, %v2665_v21  ;;  %v2526_v16 = vsel %vm1535_vm3, %v2518_v27, %v2525_v0  ;;  %v2306_v17 = vsel %vm1535_vm3, %v2298_v31, %v2305_v48  ;;  %v2663_v25 = vperm.slane %v2655_v49, 2 }
0x1801   :  { %v2695_v57 = vsel %vm2685_vm0, %v3839_v62, 1000000000  ;;  %v2527_v10 = vsel %vm1537_vm4, %v2519_v18, %v2526_v16  ;;  %v2307_v32 = vsel %vm1537_vm4, %v2299_v52, %v2306_v17  ;;  %v2520_v46 = vperm.slane %v2510_v3, %v3792_v35 }
0x1802   :  { %vm2683_vm15 = vcmp.eq.f32.partialorder %v4313_v58, %v2663_v25  ;;  %v2664_v16 = vperm.slane %v2655_v49, 3  ;;  %v2530_v17 = vand.u32 65535, %v4412_v60  ;;  %vm2826_vm0 = vcmask 33792  }
0x1803   :  { %v2693_v52 = vsel %vm2683_vm15, %v3839_v62, 1000000000 }
0x1804   :  { %vm2684_vm6 = vcmp.eq.f32.partialorder %v4309_v50, %v2664_v16 }
0x1808   :  { %2702 = vperm.xlu1 %3152, %v2691_v24   ;;  %v2528_v24 = vsel %vm1539_vm5, %v2520_v46, %v2527_v10 }
0x1809   :  { %v2544_v63 = vsel %vm1366_vm14, %v2528_v24, 2147483647 }
0x180a   :  { %v2546_v21 = vshra.s32 %v2544_v63, 16 }
0x180c   :  { %v2548_v27 = vcvt.s32.f32 %v2546_v21 }
0x180e   :  { %v2290_v22 = vpop.permute.xlu0 %2289 }
0x180f   :  { %v2300_v34 = vperm.slane %v2290_v22, %v3792_v35 }
0x1810   :  { %2714 = vperm.xlu1 %3152, %v2695_v57  }
0x1811   :  { %v2308_v41 = vsel %vm1539_vm5, %v2300_v34, %v2307_v32  ;;  %v4485_v34 = vpop.permute.xlu1 %2045 }
0x1812   :  { %v2324_v59 = vsel %vm1366_vm14, %v2308_v41, 2147483647  ;;  %v2545_v41 = vand.u32 65535, %v2544_v63 }
0x1813   :  { %v2326_v20 = vshra.s32 %v2324_v59, 16  ;;  %v2325_v57 = vand.u32 65535, %v2324_v59 }
0x1814   :  { %v2547_v24 = vcvt.s32.f32 %v2545_v41 }
0x1815   :  { %v2328_v55 = vcvt.s32.f32 %v2326_v20 }
0x1817   :  { %2329 = vmin.xlane.f32.xlu0 %v2328_v55 }
0x181f   :  { %2549 = vmin.xlane.f32.xlu0 %v2548_v27 }
0x182d   :  { %v2658_v12 = vpop.xlane.xlu2 %2657 }
0x182e   :  { %v2669_v56 = vperm.slane %v2658_v12, 3  ;;  %v2802_v3 = vadd.f32 %v4181_v51, %v2658_v12  ;;  %v2666_v31 = vperm.slane %v2658_v12, 0  ;;  %v2667_v58 = vperm.slane %v2658_v12, 1 }
0x1830   :  { %vm2689_vm2 = vcmp.eq.f32.partialorder %v4354_v43, %v2669_v56  ;;  %v4465_v48 = vadd.f32 %v4183_v19, %v2802_v3  ;;  %vm2686_vm8 = vcmp.eq.f32.partialorder %v4335_v13, %v2666_v31  ;;  %v2694_v19 = vsel %vm2684_vm6, %v3839_v62, 1000000000 }
0x1831   :  { %v2699_v0 = vsel %vm2689_vm2, %v3839_v62, 1000000000  ;;  %v2696_v51 = vsel %vm2686_vm8, %v3839_v62, 1000000000  ;;  %v2670_v43 = vperm.slane %v2658_v12, 4  ;;  %vm2687_vm1 = vcmp.eq.f32.partialorder %v4332_v23, %v2667_v58 }
0x1832   :  { %2726 = vperm.xlu2 %3146, %v2699_v0   ;;  %2820 = vperm.xlu1 %3152, %v4465_v48   ;;  %v2697_v18 = vsel %vm2687_vm1, %v3839_v62, 1000000000  ;;  %v2668_v13 = vperm.slane %v2658_v12, 2 }
0x1833   :  { %2708 = vperm.xlu0 %3151, %v2693_v52   ;;  %vm2690_vm7 = vcmp.eq.f32.partialorder %v4329_v44, %v2670_v43  ;;  %v2532_v44 = vcvt.s32.f32 %v2530_v17  ;;  %v2007_v17 = vperm.slane %v4143_v47, 1 }
0x1834   :  { %v2700_v49 = vsel %vm2690_vm7, %v3839_v62, 1000000000  ;;  %vm2688_vm10 = vcmp.eq.f32.partialorder %v4345_v9, %v2668_v13  ;;  %v2327_v9 = vcvt.s32.f32 %v2325_v57  ;;  %v2006_v57 = vperm.slane %v4143_v47, 0 }
0x1835   :  { %v2698_v50 = vsel %vm2688_vm10, %v3839_v62, 1000000000  ;;  %v4480_v22 = vpop.xlane.xlu2 %2534  ;;  %vm2027_vm15 = vcmp.eq.f32.partialorder %v4060_v38, %v2007_v17 }
0x1836   :  { %vm2536_vm11 = vcmp.eq.f32.partialorder %v4415_v61, %v4480_v22  ;;  %vm2026_vm2 = vcmp.eq.f32.partialorder %v4063_v29, %v2006_v57 }
0x1837   :  { %v2537_v23 = vsel %vm2536_vm11, %v2532_v44, inf }
0x183a   :  { %2717 = vperm.xlu1 %3152, %v2696_v51  }
0x183b   :  { %2711 = vperm.xlu0 %3151, %v2694_v19  }
0x1842   :  { %2720 = vperm.xlu1 %3152, %v2697_v18  }
0x1843   :  { %2729 = vperm.xlu0 %3151, %v2700_v49  }
0x184a   :  { %2723 = vperm.xlu1 %3152, %v2698_v50  }
0x185a   :  { %v2706_v0 = vpop.permute.xlu2 %2705 }
0x185b   :  { %v2732_v52 = vperm.slane %v2706_v0, %v3792_v35 }
0x1872   :  { %v2818_v10 = vpop.permute.xlu1 %2817 }
0x1873   :  { %v2822_v12 = vperm.slane %v2818_v10, %v3792_v35 }
0x1874   :  { %2538 = vmin.xlane.f32.xlu1 %v2537_v23  ;;  %v2037_v23 = vsel %vm2027_vm15, %v3839_v62, 1000000000 }
0x187a   :  { %v2703_v20 = vpop.permute.xlu1 %2702 }
0x187b   :  { %v2731_v63 = vperm.slane %v2703_v20, %v3792_v35 }
0x187d   :  { %v2741_v16 = vsel %vm1533_vm9, %v2732_v52, %v2731_v63  ;;  %v2541_v52 = vcvt.f32.s32 %v4480_v22 }
0x1882   :  { %v2715_v21 = vpop.permute.xlu1 %2714 }
0x1883   :  { %v2735_v19 = vperm.slane %v2715_v21, %v3792_v35 }
0x188a   :  { %v4487_v32 = vpop.xlane.xlu0 %2329 }
0x188b   :  { %vm2331_vm12 = vcmp.eq.f32.partialorder %v2328_v55, %v4487_v32 }
0x188c   :  { %v4490_v46 = vsel %vm2331_vm12, %v2327_v9, inf  ;;  %v2036_v9 = vsel %vm2026_vm2, %v3839_v62, 1000000000  ;;  %v2727_v21 = vpop.permute.xlu2 %2726 }
0x1892   :  { %v2550_v60 = vpop.xlane.xlu0 %2549 }
0x1893   :  { %vm2551_vm13 = vcmp.eq.f32.partialorder %v2548_v27, %v2550_v60 }
0x1894   :  { %v2552_v61 = vsel %vm2551_vm13, %v2547_v24, inf }
0x1895   :  { %2553 = vmin.xlane.f32.xlu2 %v2552_v61 }
0x18a4   :  { %v2821_v25 = vpop.permute.xlu1 %2820 }
0x18a5   :  { %v2823_v59 = vperm.slane %v2821_v25, %v3792_v35  ;;  %v2709_v56 = vpop.permute.xlu0 %2708 }
0x18a6   :  { %v2733_v27 = vperm.slane %v2709_v56, %v3792_v35 }
0x18a7   :  { %v2824_v3 = vsel %vm1533_vm9, %v2823_v59, %v2822_v12  ;;  %v2739_v12 = vperm.slane %v2727_v21, %v3792_v35 }
0x18a8   :  { %v2827_v55 = vsel %vm2826_vm0, %v2824_v3, -inf  ;;  %v2742_v58 = vsel %vm1535_vm3, %v2733_v27, %v2741_v16 }
0x18a9   :  { %2828 = vmax.xlane.f32.xlu2 %v2827_v55 }
0x18ac   :  { %v2718_v44 = vpop.permute.xlu1 %2717 }
0x18ad   :  { %v2712_v31 = vpop.permute.xlu0 %2711  ;;  %v2736_v61 = vperm.slane %v2718_v44, %v3792_v35 }
0x18ae   :  { %v2734_v51 = vperm.slane %v2712_v31, %v3792_v35  ;;  %v2556_v31 = vcvt.f32.s32 %v2550_v60 }
0x18b0   :  { %v2743_v43 = vsel %vm1537_vm4, %v2734_v51, %v2742_v58  ;;  %v2542_v51 = vshll.u32 %v2541_v52, 16  ;;  %v2557_v58 = vshll.u32 %v2556_v31, 16 }
0x18b1   :  { %v2744_v18 = vsel %vm1539_vm5, %v2735_v19, %v2743_v43 }
0x18b2   :  { %v2749_v49 = vsel %vm1366_vm14, %v2744_v18, 2147483647 }
0x18b3   :  { %v2751_v13 = vshra.s32 %v2749_v49, 16 }
0x18b4   :  { %v2721_v10 = vpop.permute.xlu1 %2720 }
0x18b5   :  { %v2753_v50 = vcvt.s32.f32 %v2751_v13  ;;  %v2737_v20 = vperm.slane %v2721_v10, %v3792_v35  ;;  %v2730_v59 = vpop.permute.xlu0 %2729 }
0x18b6   :  { %v2740_v56 = vperm.slane %v2730_v59, %v3792_v35 }
0x18b7   :  { %2754 = vmin.xlane.f32.xlu0 %v2753_v50  ;;  %v2745_v38 = vsel %vm1533_vm9, %v2737_v20, %v2736_v61  ;;  %v2750_v20 = vand.u32 65535, %v2749_v49  ;;  %v2010_v49 = vperm.slane %v4143_v47, 4 }
0x18b9   :  { %vm2030_vm11 = vcmp.eq.f32.partialorder %v4076_v40, %v2010_v49  ;;  %v2321_v49 = vcvt.f32.s32 %v4419_v39 }
0x18bc   :  { %v2724_v41 = vpop.permute.xlu1 %2723 }
0x18bd   :  { %v2738_v24 = vperm.slane %v2724_v41, %v3792_v35 }
0x18bf   :  { %v2746_v25 = vsel %vm1535_vm3, %v2738_v24, %v2745_v38  ;;  %v2752_v24 = vcvt.s32.f32 %v2750_v20 }
0x18c0   :  { %v2747_v29 = vsel %vm1537_vm4, %v2739_v12, %v2746_v25  ;;  %v2004_v25 = vperm.slane %v4107_v7, 3 }
0x18c1   :  { %2060 = vperm.xlu2 %3146, %v2037_v23   ;;  %v2748_v3 = vsel %vm1539_vm5, %v2740_v56, %v2747_v29  ;;  %v2008_v29 = vperm.slane %v4143_v47, 2 }
0x18c2   :  { %v2764_v55 = vsel %vm1366_vm14, %v2748_v3, 2147483647  ;;  %vm2024_vm10 = vcmp.eq.f32.partialorder %v4049_v54, %v2004_v25  ;;  %v2005_v54 = vperm.slane %v4107_v7, 4 }
0x18c3   :  { %v2766_v0 = vshra.s32 %v2764_v55, 16  ;;  %v2765_v38 = vand.u32 65535, %v2764_v55  ;;  %v2034_v59 = vsel %vm2024_vm10, %v3839_v62, 1000000000  ;;  %vm2028_vm12 = vcmp.eq.f32.partialorder %v4057_v37, %v2008_v29 }
0x18c4   :  { %v2038_v56 = vsel %vm2028_vm12, %v3839_v62, 1000000000  ;;  %vm2025_vm13 = vcmp.eq.f32.partialorder %v4036_v33, %v2005_v54  ;;  %v2003_v33 = vperm.slane %v4107_v7, 2 }
0x18c5   :  { %v2768_v63 = vcvt.s32.f32 %v2766_v0  ;;  %v2767_v12 = vcvt.s32.f32 %v2765_v38  ;;  %v2035_v3 = vsel %vm2025_vm13, %v3839_v62, 1000000000  ;;  %v1782_v38 = vperm.slane %v4028_v30, 1 }
0x18c6   :  { %vm2023_vm15 = vcmp.eq.f32.partialorder %v4045_v6, %v2003_v33 }
0x18cb   :  { %2057 = vperm.xlu0 %3151, %v2036_v9  }
0x18e7   :  { %v2539_v27 = vpop.xlane.xlu1 %2538 }
0x18e8   :  { %v2540_v16 = vcvt.f32.s32 %v2539_v27 }
0x18ea   :  { %2769 = vmin.xlane.f32.xlu2 %v2768_v63  ;;  %v2543_v43 = vadd.s32 %v2542_v51, %v2540_v16  ;;  %v2033_v16 = vsel %vm2023_vm15, %v3839_v62, 1000000000 }
0x18ec   :  { %v2886_v17 = vperm.slane %v2543_v43, %v3792_v35 }
0x1908   :  { %v2554_v19 = vpop.xlane.xlu2 %2553 }
0x1909   :  { %v2555_v18 = vcvt.f32.s32 %v2554_v19 }
0x190b   :  { %v2558_v13 = vadd.s32 %v2557_v58, %v2555_v18 }
0x190d   :  { %v2887_v44 = vperm.slane %v2558_v13, %v3792_v35 }
0x190f   :  { %v4526_v23 = vsel %vm1533_vm9, %v2887_v44, %v2886_v17 }
0x191c   :  { %v2829_v57 = vpop.xlane.xlu2 %2828 }
0x191d   :  { %v2831_v10 = vperm.slane %v2829_v57, 0  ;;  %v2832_v9 = vperm.slane %v2829_v57, 1 }
0x191f   :  { %vm2835_vm8 = vcmp.eq.f32.partialorder %v4427_v28, %v2831_v10  ;;  %vm2836_vm6 = vcmp.eq.f32.partialorder %v4465_v48, %v2832_v9 }
0x1920   :  { %v2838_v22 = vsel %vm2836_vm6, %v3839_v62, 1000000000  ;;  %v2837_v60 = vsel %vm2835_vm8, %v3839_v62, 1000000000  ;;  %vm1802_vm6 = vcmp.eq.f32.partialorder %v3943_v42, %v1782_v38 }
0x1921   :  { %2843 = vperm.xlu1 %3152, %v2838_v22   ;;  %2840 = vperm.xlu2 %3146, %v2837_v60   ;;  %v1812_v25 = vsel %vm1802_vm6, %v3839_v62, 1000000000  ;;  %vm2863_vm6 = vcmp.eq.s32.totalorder %v3792_v35, 7 }
0x1924   :  { %v4532_v21 = vpop.permute.xlu2 %2060 }
0x192a   :  { %v2755_v41 = vpop.xlane.xlu0 %2754 }
0x192b   :  { %vm2756_vm1 = vcmp.eq.f32.partialorder %v2753_v50, %v2755_v41  ;;  %v2040_v50 = vsel %vm2030_vm11, %v3839_v62, 1000000000  ;;  %v2761_v58 = vcvt.f32.s32 %v2755_v41 }
0x192c   :  { %v2757_v61 = vsel %vm2756_vm1, %v2752_v24, inf  ;;  %v2009_v24 = vperm.slane %v4143_v47, 3 }
0x192d   :  { %v2762_v13 = vshll.u32 %v2761_v58, 16 }
0x192e   :  { %vm2029_vm8 = vcmp.eq.f32.partialorder %v4069_v26, %v2009_v24 }
0x193d   :  { %v4554_v51 = vpop.permute.xlu0 %2057 }
0x194a   :  { %2758 = vmin.xlane.f32.xlu2 %v2757_v61  ;;  %v2039_v61 = vsel %vm2029_vm8, %v3839_v62, 1000000000 }
0x195d   :  { %v2770_v28 = vpop.xlane.xlu2 %2769 }
0x195e   :  { %vm2771_vm7 = vcmp.eq.f32.partialorder %v2768_v63, %v2770_v28  ;;  %v2776_v43 = vcvt.f32.s32 %v2770_v28 }
0x195f   :  { %v2772_v48 = vsel %vm2771_vm7, %v2767_v12, inf }
0x1960   :  { %2773 = vmin.xlane.f32.xlu0 %v2772_v48  ;;  %v2777_v44 = vshll.u32 %v2776_v43, 16 }
0x1962   :  { %2051 = vperm.xlu2 %3146, %v2034_v59   ;;  %v2336_v59 = vcvt.f32.s32 %v4487_v32 }
0x1964   :  { %v2337_v42 = vshll.u32 %v2336_v59, 16  ;;  %v1789_v59 = vperm.slane %v4052_v36, 3 }
0x1966   :  { %vm1809_vm12 = vcmp.eq.f32.partialorder %v3980_v15, %v1789_v59 }
0x196a   :  { %2069 = vperm.xlu2 %3146, %v2040_v50  }
0x1974   :  { %2063 = vperm.xlu0 %3151, %v2038_v56   ;;  %v2322_v56 = vshll.u32 %v2321_v49, 16  ;;  %v1787_v49 = vperm.slane %v4052_v36, 1 }
0x1976   :  { %vm1807_vm13 = vcmp.eq.f32.partialorder %v3968_v8, %v1787_v49 }
0x197b   :  { %v2841_v55 = vpop.permute.xlu2 %2840 }
0x197c   :  { %2054 = vperm.xlu0 %3151, %v2035_v3   ;;  %v2845_v40 = vperm.slane %v2841_v55, %v3792_v35 }
0x1993   :  { %v2844_v0 = vpop.permute.xlu1 %2843 }
0x1994   :  { %v2846_v63 = vperm.slane %v2844_v0, %v3792_v35 }
0x1996   :  { %v2847_v27 = vsel %vm1533_vm9, %v2846_v63, %v2845_v40  ;;  %v2072_v63 = vperm.slane %v4485_v34, %v3792_v35 }
0x1997   :  { %v2848_v37 = vsel %vm2826_vm0, %v2847_v27, 2147483647  ;;  %v2071_v27 = vperm.slane %v4459_v4, %v3792_v35 }
0x1998   :  { %v2850_v52 = vshra.s32 %v2848_v37, 16  ;;  %v2849_v22 = vand.u32 65535, %v2848_v37 }
0x199a   :  { %v2852_v31 = vcvt.s32.f32 %v2850_v52  ;;  %v2851_v20 = vcvt.s32.f32 %v2849_v22 }
0x199c   :  { %2853 = vmin.xlane.f32.xlu1 %v2852_v31 }
0x19a6   :  { %2333 = vmin.xlane.f32.xlu0 %v4490_v46 }
0x19b5   :  { %2048 = vperm.xlu1 %3152, %v2033_v16  }
0x19bd   :  { %v2759_v19 = vpop.xlane.xlu2 %2758 }
0x19be   :  { %v2760_v18 = vcvt.f32.s32 %v2759_v19 }
0x19c0   :  { %v2763_v57 = vadd.s32 %v2762_v13, %v2760_v18 }
0x19c2   :  { %v2866_v46 = vperm.slane %v2763_v57, %v3792_v35 }
0x19c5   :  { %v2052_v37 = vpop.permute.xlu2 %2051 }
0x19c6   :  { %v2074_v58 = vperm.slane %v2052_v37, %v3792_v35 }
0x19d3   :  { %v2774_v17 = vpop.xlane.xlu0 %2773 }
0x19d4   :  { %v2775_v10 = vcvt.f32.s32 %v2774_v17 }
0x19d6   :  { %v2778_v9 = vadd.s32 %v2777_v44, %v2775_v10 }
0x19d8   :  { %v2867_v7 = vperm.slane %v2778_v9, %v3792_v35 }
0x19da   :  { %v2868_v6 = vsel %vm1533_vm9, %v2867_v7, %v2866_v46  ;;  %v2076_v7 = vperm.slane %v4554_v51, %v3792_v35 }
0x19df   :  { %2318 = vmin.xlane.f32.xlu1 %v4423_v1  ;;  %v1788_v1 = vperm.slane %v4052_v36, 2 }
0x19e1   :  { %vm1808_vm1 = vcmp.eq.f32.partialorder %v3976_v11, %v1788_v1 }
0x19e2   :  { %v1818_v12 = vsel %vm1808_vm1, %v3839_v62, 1000000000  ;;  %vm2883_vm1 = vcmp.eq.s32.totalorder %v3792_v35, 6 }
0x19e6   :  { %v2064_v28 = vpop.permute.xlu0 %2063 }
0x19e7   :  { %v2078_v22 = vperm.slane %v2064_v28, %v3792_v35 }
0x19ee   :  { %v2055_v47 = vpop.permute.xlu0 %2054 }
0x19ef   :  { %v2075_v18 = vperm.slane %v2055_v47, %v3792_v35 }
0x1a0f   :  { %v2854_v60 = vpop.xlane.xlu1 %2853 }
0x1a10   :  { %vm2855_vm2 = vcmp.eq.f32.partialorder %v2852_v31, %v2854_v60  ;;  %v2860_v32 = vcvt.f32.s32 %v2854_v60  ;;  %v2081_v31 = vsel %vm1533_vm9, %v2072_v63, %v2071_v27  ;;  %v2070_v60 = vpop.permute.xlu2 %2069 }
0x1a11   :  { %v2856_v41 = vsel %vm2855_vm2, %v2851_v20, inf }
0x1a12   :  { %2857 = vmin.xlane.f32.xlu1 %v2856_v41  ;;  %v2861_v33 = vshll.u32 %v2860_v32, 16 }
0x1a19   :  { %v2334_v48 = vpop.xlane.xlu0 %2333 }
0x1a1a   :  { %v2335_v50 = vcvt.f32.s32 %v2334_v48 }
0x1a1c   :  { %v2338_v54 = vadd.s32 %v2337_v42, %v2335_v50  ;;  %v1817_v50 = vsel %vm1807_vm13, %v3839_v62, 1000000000 }
0x1a1e   :  { %v2907_v11 = vperm.slane %v2338_v54, %v3792_v35 }
0x1a27   :  { %v2049_v26 = vpop.permute.xlu1 %2048 }
0x1a28   :  { %v2073_v39 = vperm.slane %v2049_v26, %v3792_v35  ;;  %v1783_v26 = vperm.slane %v4028_v30, 2 }
0x1a2a   :  { %v2082_v19 = vsel %vm1535_vm3, %v2073_v39, %v2081_v31  ;;  %vm1803_vm11 = vcmp.eq.f32.partialorder %v3928_v5, %v1783_v26  ;;  %v1784_v5 = vperm.slane %v4028_v30, 3 }
0x1a2b   :  { %2066 = vperm.xlu1 %3152, %v2039_v61   ;;  %v2083_v34 = vsel %vm1537_vm4, %v2074_v58, %v2082_v19  ;;  %v2080_v61 = vperm.slane %v2070_v60, %v3792_v35  ;;  %v1813_v48 = vsel %vm1803_vm11, %v3839_v62, 1000000000 }
0x1a2c   :  { %v2084_v44 = vsel %vm1539_vm5, %v2075_v18, %v2083_v34  ;;  %vm1804_vm15 = vcmp.eq.f32.partialorder %v3938_v2, %v1784_v5  ;;  %v4728_v5 = vld [vmem:[#allocation17_spill] sm:$0xff] }
0x1a2d   :  { %v2089_v10 = vsel %vm1366_vm14, %v2084_v44, 2147483647  ;;  %v1785_v44 = vperm.slane %v4028_v30, 4 }
0x1a2e   :  { %v2091_v9 = vshra.s32 %v2089_v10, 16  ;;  %v2090_v15 = vand.u32 65535, %v2089_v10 }
0x1a2f   :  { %vm1805_vm11 = vcmp.eq.f32.partialorder %v3947_v45, %v1785_v44 }
0x1a30   :  { %v2093_v46 = vcvt.s32.f32 %v2091_v9  ;;  %v2092_v8 = vcvt.s32.f32 %v2090_v15 }
0x1a33   :  { %1825 = vperm.xlu1 %3152, %v1812_v25  }
0x1a3b   :  { %1843 = vperm.xlu1 %3152, %v1818_v12  }
0x1a52   :  { %v2319_v29 = vpop.xlane.xlu1 %2318 }
0x1a53   :  { %v2320_v3 = vcvt.f32.s32 %v2319_v29 }
0x1a55   :  { %v2323_v55 = vadd.s32 %v2322_v56, %v2320_v3  ;;  %v1814_v56 = vsel %vm1804_vm15, %v3839_v62, 1000000000  ;;  %vm2943_vm15 = vcmp.eq.s32.totalorder %v3792_v35, 3 }
0x1a57   :  { %v2906_v0 = vperm.slane %v2323_v55, %v3792_v35 }
0x1a59   :  { %v4574_v40 = vsel %vm1533_vm9, %v2907_v11, %v2906_v0 }
0x1a85   :  { %v2858_v52 = vpop.xlane.xlu1 %2857 }
0x1a86   :  { %v2859_v16 = vcvt.f32.s32 %v2858_v52 }
0x1a88   :  { %v4584_v43 = vadd.s32 %v2861_v33, %v2859_v16 }
0x1a8a   :  { %vm2865_vm7 = vcmp.eq.s32.totalorder %v3792_v35, %v4584_v43  ;;  %v2864_v33 = vsel %vm2863_vm6, %v4584_v43, 0 }
0x1a8b   :  { %v2869_v4 = vsel %vm2865_vm7, %v2868_v6, 0  ;;  %v2077_v6 = vperm.slane %v4532_v21, %v3792_v35  ;;  %v1786_v21 = vperm.slane %v4052_v36, 0 }
0x1a8c   :  { %v2870_v13 = vsel %vm2826_vm0, %v2869_v4, 0 }
0x1a8d   :  { %v2872_v17 = vshrl.u32 %v2870_v13, 16  ;;  %v2085_v41 = vsel %vm1533_vm9, %v2077_v6, %v2076_v7  ;;  %vm1806_vm10 = vcmp.eq.f32.partialorder %v3962_v14, %v1786_v21  ;;  %v1819_v14 = vsel %vm1809_vm12, %v3839_v62, 1000000000 }
0x1a8e   :  { %v2086_v38 = vsel %vm1535_vm3, %v2078_v22, %v2085_v41  ;;  %v1816_v47 = vsel %vm1806_vm10, %v3839_v62, 1000000000  ;;  %v2871_v42 = vand.u32 65535, %v2870_v13  ;;  %vm2903_vm12 = vcmp.eq.s32.totalorder %v3792_v35, 5 }
0x1a8f   :  { %v2874_v57 = vcvt.s32.f32 %v2872_v17  ;;  %v1790_v17 = vperm.slane %v4052_v36, 4 }
0x1a90   :  { %v2873_v29 = vcvt.s32.f32 %v2871_v42 }
0x1a91   :  { %2877 = vadd.xlane.f32.xlu0 %v2874_v57  ;;  %vm1810_vm10 = vcmp.eq.f32.partialorder %v3971_v53, %v1790_v17 }
0x1a92   :  { %v1820_v43 = vsel %vm1810_vm10, %v3839_v62, 1000000000 }
0x1a99   :  { %2094 = vmin.xlane.f32.xlu0 %v2093_v46 }
0x1a9d   :  { %v2067_v20 = vpop.permute.xlu1 %2066 }
0x1a9e   :  { %v2079_v24 = vperm.slane %v2067_v20, %v3792_v35 }
0x1aa0   :  { %v2087_v25 = vsel %vm1537_vm4, %v2079_v24, %v2086_v38 }
0x1aa1   :  { %v2088_v1 = vsel %vm1539_vm5, %v2080_v61, %v2087_v25 }
0x1aa2   :  { %v2104_v51 = vsel %vm1366_vm14, %v2088_v1, 2147483647 }
0x1aa3   :  { %v2106_v28 = vshra.s32 %v2104_v51, 16  ;;  %v2105_v11 = vand.u32 65535, %v2104_v51 }
0x1aa5   :  { %v2108_v12 = vcvt.s32.f32 %v2106_v28  ;;  %v2107_v63 = vcvt.s32.f32 %v2105_v11  ;;  %v1826_v57 = vpop.permute.xlu1 %1825 }
0x1aa7   :  { %2109 = vmin.xlane.f32.xlu2 %v2108_v12 }
0x1aad   :  { %1837 = vperm.xlu0 %3151, %v1816_v47   ;;  %v1844_v9 = vpop.permute.xlu1 %1843 }
0x1aae   :  { %v1858_v61 = vperm.slane %v1844_v9, %v3792_v35 }
0x1ab5   :  { %1828 = vperm.xlu0 %3151, %v1813_v48  }
0x1abd   :  { %1846 = vperm.xlu0 %3151, %v1819_v14  }
0x1abf   :  { %1840 = vperm.xlu2 %3146, %v1817_v50   ;;  %v1852_v50 = vperm.slane %v1826_v57, %v3792_v35 }
0x1ae8   :  { %2875 = vadd.xlane.f32.xlu2 %v2873_v29 }
0x1b00   :  { %1831 = vperm.xlu2 %3146, %v1814_v56   ;;  %v1851_v56 = vperm.slane %v4728_v5, %v3792_v35 }
0x1b02   :  { %v1861_v15 = vsel %vm1533_vm9, %v1852_v50, %v1851_v56 }
0x1b04   :  { %v2878_v54 = vpop.xlane.xlu0 %2877 }
0x1b05   :  { %v2880_v39 = vcvt.f32.s32 %v2878_v54 }
0x1b07   :  { %v2881_v37 = vshll.u32 %v2880_v39, 16 }
0x1b0c   :  { %v4620_v3 = vpop.xlane.xlu0 %2094 }
0x1b0d   :  { %vm2096_vm2 = vcmp.eq.f32.partialorder %v2093_v46, %v4620_v3 }
0x1b0e   :  { %v2097_v55 = vsel %vm2096_vm2, %v2092_v8, inf }
0x1b0f   :  { %2098 = vmin.xlane.f32.xlu0 %v2097_v55 }
0x1b1a   :  { %v4623_v0 = vpop.xlane.xlu2 %2109 }
0x1b1b   :  { %vm2111_vm8 = vcmp.eq.f32.partialorder %v2108_v12, %v4623_v0 }
0x1b1c   :  { %v2112_v32 = vsel %vm2111_vm8, %v2107_v63, inf  ;;  %vm2963_vm8 = vcmp.eq.s32.totalorder %v3792_v35, 2 }
0x1b1f   :  { %v1838_v10 = vpop.permute.xlu0 %1837 }
0x1b20   :  { %v1856_v20 = vperm.slane %v1838_v10, %v3792_v35 }
0x1b22   :  { %v1841_v2 = vpop.permute.xlu2 %1840 }
0x1b23   :  { %v1857_v30 = vperm.slane %v1841_v2, %v3792_v35 }
0x1b25   :  { %v1865_v41 = vsel %vm1533_vm9, %v1857_v30, %v1856_v20 }
0x1b26   :  { %v1866_v51 = vsel %vm1535_vm3, %v1858_v61, %v1865_v41 }
0x1b27   :  { %v1829_v7 = vpop.permute.xlu0 %1828 }
0x1b28   :  { %v1853_v29 = vperm.slane %v1829_v7, %v3792_v35 }
0x1b2a   :  { %v1862_v55 = vsel %vm1535_vm3, %v1853_v29, %v1861_v15 }
0x1b2f   :  { %v1847_v53 = vpop.permute.xlu0 %1846 }
0x1b30   :  { %v1859_v24 = vperm.slane %v1847_v53, %v3792_v35 }
0x1b32   :  { %v1867_v21 = vsel %vm1537_vm4, %v1859_v24, %v1866_v51 }
0x1b5b   :  { %v2876_v27 = vpop.xlane.xlu2 %2875 }
0x1b5c   :  { %v2879_v52 = vcvt.f32.s32 %v2876_v27 }
0x1b5e   :  { %v2882_v31 = vadd.s32 %v2881_v37, %v2879_v52  ;;  %v2101_v52 = vcvt.f32.s32 %v4620_v3 }
0x1b60   :  { %v2884_v16 = vsel %vm2883_vm1, %v2882_v31, %v2864_v33  ;;  %vm2885_vm7 = vcmp.eq.s32.totalorder %v3792_v35, %v2882_v31  ;;  %v2116_v31 = vcvt.f32.s32 %v4623_v0  ;;  %vm2983_vm1 = vcmp.eq.s32.totalorder %v3792_v35, 1 }
0x1b61   :  { %v2889_v19 = vsel %vm2885_vm7, %v4526_v23, 0  ;;  %v1815_v23 = vsel %vm1805_vm11, %v3839_v62, 1000000000 }
0x1b62   :  { %v2890_v58 = vsel %vm2826_vm0, %v2889_v19, 0 }
0x1b63   :  { %v2892_v34 = vshrl.u32 %v2890_v58, 16  ;;  %v2891_v18 = vand.u32 65535, %v2890_v58  ;;  %v1832_v46 = vpop.permute.xlu2 %1831  ;;  %v2117_v58 = vshll.u32 %v2116_v31, 16 }
0x1b64   :  { %v1854_v54 = vperm.slane %v1832_v46, %v3792_v35 }
0x1b65   :  { %v2894_v4 = vcvt.s32.f32 %v2892_v34  ;;  %v2893_v13 = vcvt.s32.f32 %v2891_v18 }
0x1b66   :  { %v1863_v63 = vsel %vm1537_vm4, %v1854_v54, %v1862_v55 }
0x1b67   :  { %2897 = vadd.xlane.f32.xlu2 %v2894_v4  ;;  %2895 = vadd.xlane.f32.xlu1 %v2893_v13 }
0x1b7f   :  { %1849 = vperm.xlu2 %3146, %v1820_v43  }
0x1b80   :  { %1834 = vperm.xlu1 %3152, %v1815_v23  }
0x1b82   :  { %v2099_v37 = vpop.xlane.xlu0 %2098 }
0x1b83   :  { %v2100_v33 = vcvt.f32.s32 %v2099_v37 }
0x1baa   :  { %2113 = vmin.xlane.f32.xlu1 %v2112_v32 }
0x1bda   :  { %v2898_v22 = vpop.xlane.xlu2 %2897  ;;  %v2896_v36 = vpop.xlane.xlu1 %2895 }
0x1bdb   :  { %v2900_v6 = vcvt.f32.s32 %v2898_v22  ;;  %v2899_v45 = vcvt.f32.s32 %v2896_v36 }
0x1bdd   :  { %v2901_v60 = vshll.u32 %v2900_v6, 16 }
0x1bdf   :  { %v2902_v62 = vadd.s32 %v2901_v60, %v2899_v45 }
0x1be1   :  { %v2904_v38 = vsel %vm2903_vm12, %v2902_v62, %v2884_v16  ;;  %vm2905_vm13 = vcmp.eq.s32.totalorder %v3792_v35, %v2902_v62  ;;  %v2102_v16 = vshll.u32 %v2101_v52, 16  ;;  %v4731_v52 = vld [vmem:[#allocation16_spill] sm:$0xff] }
0x1be2   :  { %v2909_v25 = vsel %vm2905_vm13, %v4574_v40, 0  ;;  %v1850_v1 = vpop.permute.xlu2 %1849  ;;  %v1675_v31 = vcvt.f32.s32 %v4731_v52 }
0x1be3   :  { %v1860_v28 = vperm.slane %v1850_v1, %v3792_v35  ;;  %v2910_v12 = vsel %vm2826_vm0, %v2909_v25, 0  ;;  %v2103_v34 = vadd.s32 %v2102_v16, %v2100_v33  ;;  %v4732_v16 = vld [vmem:[#allocation15_spill] sm:$0xff] }
0x1be4   :  { %v2912_v47 = vshrl.u32 %v2910_v12, 16  ;;  %v2911_v26 = vand.u32 65535, %v2910_v12 }
0x1be5   :  { %v1868_v48 = vsel %vm1539_vm5, %v1860_v28, %v1867_v21  ;;  %v2926_v13 = vperm.slane %v2103_v34, %v3792_v35 }
0x1be6   :  { %v2914_v59 = vcvt.s32.f32 %v2912_v47  ;;  %v2913_v49 = vcvt.s32.f32 %v2911_v26  ;;  %v1884_v14 = vsel %vm1366_vm14, %v1868_v48, 2147483647 }
0x1be7   :  { %v1886_v40 = vshra.s32 %v1884_v14, 16  ;;  %v1885_v0 = vand.u32 65535, %v1884_v14 }
0x1be8   :  { %2917 = vadd.xlane.f32.xlu2 %v2914_v59  ;;  %2915 = vadd.xlane.f32.xlu0 %v2913_v49 }
0x1be9   :  { %v1888_v42 = vcvt.s32.f32 %v1886_v40  ;;  %v1887_v36 = vcvt.s32.f32 %v1885_v0 }
0x1bf0   :  { %1889 = vmin.xlane.f32.xlu2 %v1888_v42 }
0x1bf2   :  { %v1835_v8 = vpop.permute.xlu1 %1834 }
0x1bf3   :  { %v1855_v11 = vperm.slane %v1835_v8, %v3792_v35 }
0x1bf5   :  { %v1864_v32 = vsel %vm1539_vm5, %v1855_v11, %v1863_v63 }
0x1bf6   :  { %v1869_v2 = vsel %vm1366_vm14, %v1864_v32, 2147483647  ;;  %vm2923_vm14 = vcmp.eq.s32.totalorder %v3792_v35, 4 }
0x1bf7   :  { %v1871_v39 = vshra.s32 %v1869_v2, 16  ;;  %v1870_v45 = vand.u32 65535, %v1869_v2  ;;  %v4729_v2 = vld [vmem:[#allocation14_spill] sm:$0xff] }
0x1bf9   :  { %v1873_v27 = vcvt.s32.f32 %v1871_v39  ;;  %v1872_v62 = vcvt.s32.f32 %v1870_v45  ;;  %v1676_v39 = vcvt.f32.s32 %v4729_v2 }
0x1bfb   :  { %1874 = vmin.xlane.f32.xlu1 %v1873_v27  ;;  %v1677_v33 = vshll.u32 %v1676_v39, 16 }
0x1bfd   :  { %v1678_v34 = vadd.s32 %v1677_v33, %v1675_v31 }
0x1c1d   :  { %v2114_v19 = vpop.xlane.xlu1 %2113 }
0x1c1e   :  { %v2115_v18 = vcvt.f32.s32 %v2114_v19  ;;  %v1660_v19 = vcvt.f32.s32 %v4732_v16 }
0x1c20   :  { %v2118_v4 = vadd.s32 %v2117_v58, %v2115_v18 }
0x1c22   :  { %v2927_v17 = vperm.slane %v2118_v4, %v3792_v35 }
0x1c24   :  { %v2928_v44 = vsel %vm1533_vm9, %v2927_v17, %v2926_v13 }
0x1c5b   :  { %v2918_v43 = vpop.xlane.xlu2 %2917  ;;  %v2916_v23 = vpop.xlane.xlu0 %2915 }
0x1c5c   :  { %v2920_v57 = vcvt.f32.s32 %v2918_v43  ;;  %v2919_v3 = vcvt.f32.s32 %v2916_v23 }
0x1c5e   :  { %v2921_v10 = vshll.u32 %v2920_v57, 16 }
0x1c60   :  { %v2922_v9 = vadd.s32 %v2921_v10, %v2919_v3 }
0x1c62   :  { %v2924_v46 = vsel %vm2923_vm14, %v2922_v9, %v2904_v38  ;;  %vm2925_vm3 = vcmp.eq.s32.totalorder %v3792_v35, %v2922_v9 }
0x1c63   :  { %v2929_v7 = vsel %vm2925_vm3, %v2928_v44, 0  ;;  %v1890_v22 = vpop.xlane.xlu2 %1889  ;;  %v2967_v44 = vperm.slane %v1678_v34, %v3792_v35 }
0x1c64   :  { %vm1891_vm4 = vcmp.eq.f32.partialorder %v1888_v42, %v1890_v22  ;;  %v2930_v6 = vsel %vm2826_vm0, %v2929_v7, 0  ;;  %v1896_v51 = vcvt.f32.s32 %v1890_v22 }
0x1c65   :  { %v1892_v30 = vsel %vm1891_vm4, %v1887_v36, inf  ;;  %v2932_v53 = vshrl.u32 %v2930_v6, 16  ;;  %v2931_v24 = vand.u32 65535, %v2930_v6 }
0x1c66   :  { %1893 = vmin.xlane.f32.xlu1 %v1892_v30  ;;  %v1897_v26 = vshll.u32 %v1896_v51, 16  ;;  %v4733_v30 = vld [vmem:[#allocation9_spill] sm:$0xff] }
0x1c67   :  { %v2934_v60 = vcvt.s32.f32 %v2932_v53  ;;  %v2933_v61 = vcvt.s32.f32 %v2931_v24  ;;  %v1406_v53 = vcvt.f32.s32 %v4733_v30 }
0x1c69   :  { %2937 = vadd.xlane.f32.xlu2 %v2934_v60  ;;  %v4734_v60 = vld [vmem:[#allocation10_spill] sm:$0xff] }
0x1c6a   :  { %v1391_v45 = vcvt.f32.s32 %v4734_v60 }
0x1c6e   :  { %v1875_v20 = vpop.xlane.xlu1 %1874 }
0x1c6f   :  { %vm1876_vm5 = vcmp.eq.f32.partialorder %v1873_v27, %v1875_v20  ;;  %v1881_v38 = vcvt.f32.s32 %v1875_v20  ;;  %v4730_v27 = vld [vmem:[#allocation13_spill] sm:$0xff]  ;;  %v4735_v20 = vld [vmem:[#allocation12_spill] sm:$0xff] }
0x1c70   :  { %v1877_v41 = vsel %vm1876_vm5, %v1872_v62, inf  ;;  %v1661_v37 = vcvt.f32.s32 %v4730_v27  ;;  %v1405_v62 = vcvt.f32.s32 %v4735_v20 }
0x1c71   :  { %1878 = vmin.xlane.f32.xlu0 %v1877_v41  ;;  %v1882_v21 = vshll.u32 %v1881_v38, 16  ;;  %v4736_v41 = vld [vmem:[#allocation11_spill] sm:$0xff]  ;;  %v1392_v38 = vshll.u32 %v1391_v45, 16 }
0x1c72   :  { %v1662_v58 = vshll.u32 %v1661_v37, 16  ;;  %v1390_v24 = vcvt.f32.s32 %v4736_v41 }
0x1c74   :  { %v1663_v13 = vadd.s32 %v1662_v58, %v1660_v19 }
0x1c76   :  { %v2966_v57 = vperm.slane %v1663_v13, %v3792_v35 }
0x1c78   :  { %v2968_v3 = vsel %vm1533_vm9, %v2967_v44, %v2966_v57 }
0x1c79   :  { %2935 = vadd.xlane.f32.xlu0 %v2933_v61  ;;  %v1407_v61 = vshll.u32 %v1406_v53, 16 }
0x1cd9   :  { %v1894_v25 = vpop.xlane.xlu1 %1893 }
0x1cda   :  { %v1895_v47 = vcvt.f32.s32 %v1894_v25  ;;  %v1408_v25 = vadd.s32 %v1407_v61, %v1405_v62 }
0x1cdc   :  { %v2938_v12 = vpop.xlane.xlu2 %2937  ;;  %v1898_v49 = vadd.s32 %v1897_v26, %v1895_v47 }
0x1cdd   :  { %v2940_v48 = vcvt.f32.s32 %v2938_v12 }
0x1cde   :  { %v2947_v29 = vperm.slane %v1898_v49, %v3792_v35 }
0x1cdf   :  { %v2941_v40 = vshll.u32 %v2940_v48, 16 }
0x1ce4   :  { %v1879_v1 = vpop.xlane.xlu0 %1878 }
0x1ce5   :  { %v1880_v28 = vcvt.f32.s32 %v1879_v1  ;;  %v1393_v1 = vadd.s32 %v1392_v38, %v1390_v24 }
0x1ce7   :  { %v1883_v59 = vadd.s32 %v1882_v21, %v1880_v28  ;;  %v2987_v21 = vperm.slane %v1408_v25, %v3792_v35  ;;  %v2986_v47 = vperm.slane %v1393_v1, %v3792_v35 }
0x1ce9   :  { %v2946_v50 = vperm.slane %v1883_v59, %v3792_v35  ;;  %v2988_v49 = vsel %vm1533_vm9, %v2987_v21, %v2986_v47 }
0x1ceb   :  { %v2948_v56 = vsel %vm1533_vm9, %v2947_v29, %v2946_v50  ;;  %vm3003_vm9 = vcmp.eq.s32.totalorder %v3792_v35, 0 }
0x1cec   :  { %v2936_v14 = vpop.xlane.xlu0 %2935 }
0x1ced   :  { %v2939_v42 = vcvt.f32.s32 %v2936_v14 }
0x1cef   :  { %v2942_v5 = vadd.s32 %v2941_v40, %v2939_v42 }
0x1cf1   :  { %v2944_v54 = vsel %vm2943_vm15, %v2942_v5, %v2924_v46  ;;  %vm2945_vm2 = vcmp.eq.s32.totalorder %v3792_v35, %v2942_v5 }
0x1cf2   :  { %v2949_v15 = vsel %vm2945_vm2, %v2948_v56, 0 }
0x1cf3   :  { %v2950_v8 = vsel %vm2826_vm0, %v2949_v15, 0 }
0x1cf4   :  { %v2952_v55 = vshrl.u32 %v2950_v8, 16  ;;  %v2951_v11 = vand.u32 65535, %v2950_v8 }
0x1cf6   :  { %v2954_v63 = vcvt.s32.f32 %v2952_v55  ;;  %v2953_v32 = vcvt.s32.f32 %v2951_v11 }
0x1cf8   :  { %2957 = vadd.xlane.f32.xlu1 %v2954_v63  ;;  %2955 = vadd.xlane.f32.xlu2 %v2953_v32 }
0x1d6b   :  { %v2958_v18 = vpop.xlane.xlu1 %2957  ;;  %v2956_v4 = vpop.xlane.xlu2 %2955 }
0x1d6c   :  { %v2960_v17 = vcvt.f32.s32 %v2958_v18  ;;  %v2959_v23 = vcvt.f32.s32 %v2956_v4 }
0x1d6e   :  { %v2961_v43 = vshll.u32 %v2960_v17, 16 }
0x1d70   :  { %v2962_v10 = vadd.s32 %v2961_v43, %v2959_v23 }
0x1d72   :  { %v2964_v0 = vsel %vm2963_vm8, %v2962_v10, %v2944_v54  ;;  %vm2965_vm6 = vcmp.eq.s32.totalorder %v3792_v35, %v2962_v10 }
0x1d73   :  { %v2969_v9 = vsel %vm2965_vm6, %v2968_v3, 0 }
0x1d74   :  { %v2970_v46 = vsel %vm2826_vm0, %v2969_v9, 0 }
0x1d75   :  { %v2972_v7 = vshrl.u32 %v2970_v46, 16  ;;  %v2971_v22 = vand.u32 65535, %v2970_v46 }
0x1d77   :  { %v2974_v36 = vcvt.s32.f32 %v2972_v7  ;;  %v2973_v6 = vcvt.s32.f32 %v2971_v22 }
0x1d79   :  { %2977 = vadd.xlane.f32.xlu0 %v2974_v36  ;;  %2975 = vadd.xlane.f32.xlu1 %v2973_v6 }
0x1dec   :  { %v2978_v51 = vpop.xlane.xlu0 %2977  ;;  %v2976_v28 = vpop.xlane.xlu1 %2975 }
0x1ded   :  { %v2980_v12 = vcvt.f32.s32 %v2978_v51  ;;  %v2979_v48 = vcvt.f32.s32 %v2976_v28 }
0x1def   :  { %v2981_v26 = vshll.u32 %v2980_v12, 16 }
0x1df1   :  { %v2982_v59 = vadd.s32 %v2981_v26, %v2979_v48 }
0x1df3   :  { %v2984_v14 = vsel %vm2983_vm1, %v2982_v59, %v2964_v0  ;;  %vm2985_vm7 = vcmp.eq.s32.totalorder %v3792_v35, %v2982_v59 }
0x1df4   :  { %v2989_v40 = vsel %vm2985_vm7, %v2988_v49, 0 }
0x1df5   :  { %v2990_v50 = vsel %vm2826_vm0, %v2989_v40, 0  ;;  %vm3005_vm0 = vcmask 58368  }
0x1df6   :  { %v2992_v42 = vshrl.u32 %v2990_v50, 16  ;;  %v2991_v29 = vand.u32 65535, %v2990_v50 }
0x1df8   :  { %v2994_v5 = vcvt.s32.f32 %v2992_v42  ;;  %v2993_v56 = vcvt.s32.f32 %v2991_v29 }
0x1dfa   :  { %2997 = vadd.xlane.f32.xlu2 %v2994_v5  ;;  %2995 = vadd.xlane.f32.xlu0 %v2993_v56 }
0x1e6d   :  { %v2998_v54 = vpop.xlane.xlu2 %2997  ;;  %v2996_v15 = vpop.xlane.xlu0 %2995 }
0x1e6e   :  { %v3000_v8 = vcvt.f32.s32 %v2998_v54  ;;  %v2999_v11 = vcvt.f32.s32 %v2996_v15 }
0x1e70   :  { %v3001_v55 = vshll.u32 %v3000_v8, 16 }
0x1e72   :  { %v3002_v63 = vadd.s32 %v3001_v55, %v2999_v11 }
0x1e74   :  { %v3004_v32 = vsel %vm3003_vm9, %v3002_v63, %v2984_v14 }
0x1e75   :  { %3006 = vst.msk [vmem:[#allocation6] sm:$0x3] %vm3005_vm0, %v3004_v32 }
0x1e76   :  { %3041 = dma.vmem_to_hbm [thread:$0]  %s3037_s21, 32, %s3039_s5, [#allocation5]  }
0x1e77   :  { %3311 = dma.done.wait [#allocation3], 256  }
0x1e78   :  { %3312 = vsyncadd [#allocation3], 4294967040 }
0x1e79   :  { %3313 = dma.done.wait [#allocation5], 64  }
0x1e7a   :  { %3314 = vsyncadd [#allocation5], 4294967232 }
0x1e7b   :  { %3054 = vsyncpa [#allocation3], 1 }
0x1e7c   :  { %3055 = vsyncpa [#allocation5], 1 }

</bundles_post_ra>
